<compile_context>
chip_gen: v5e
topology: v5e:2x2
jax: 0.10.0
libtpu: 0.0.40
codegen_flags: <defaults>
</compile_context>

<pallas_src>
import functools
import math

import jax
import jax.numpy as jnp
from jax import lax
from jax.experimental import pallas as pl
from jax.experimental.pallas import tpu as pltpu

_LANE = 128      # TPU lane width
_BORDER = 1      # fixed spatial zero-border kept by the padded-flat layout
_HALO = 128      # lane halo used by the in-kernel shifted-tap convolution


# ---------------------------------------------------------------------------
# Padded-flat layout helpers (wrapper side, plain XLA glue).
# ---------------------------------------------------------------------------
def _padded_dims(h, w):
    hp, wp = h + 2 * _BORDER, w + 2 * _BORDER
    sp = ((hp * wp + _LANE - 1) // _LANE) * _LANE
    return hp, wp, sp


def _interior_mask(h, w):
    """(1, Sp) float32 mask: 1.0 on real interior pixels, 0.0 on border/tail."""
    hp, wp, sp = _padded_dims(h, w)
    q = jnp.arange(sp, dtype=jnp.int32)
    row, col = q // wp, q % wp
    valid = ((q < hp * wp)
             & (row >= _BORDER) & (row < hp - _BORDER)
             & (col >= _BORDER) & (col < wp - _BORDER))
    return valid.astype(jnp.float32).reshape(1, sp)


def _to_padded_flat(x_cf):
    """(C, B, H, W) -> (C, B*Sp) with zero border and zero tail."""
    c, b, h, w = x_cf.shape
    hp, wp, sp = _padded_dims(h, w)
    xp = jnp.pad(x_cf, ((0, 0), (0, 0), (_BORDER, _BORDER), (_BORDER, _BORDER)))
    xp = xp.reshape(c, b, hp * wp)
    xp = jnp.pad(xp, ((0, 0), (0, 0), (0, sp - hp * wp)))
    return xp.reshape(c, b * sp)


def _from_padded_flat(xf, b, h, w):
    """(C, B*Sp) -> (B, C, H, W)."""
    c = xf.shape[0]
    hp, wp, sp = _padded_dims(h, w)
    x = xf.reshape(c, b, sp)[:, :, :hp * wp].reshape(c, b, hp, wp)
    x = x[:, :, _BORDER:hp - _BORDER, _BORDER:wp - _BORDER]
    return jnp.transpose(x, (1, 0, 2, 3))


# ---------------------------------------------------------------------------
# In-kernel Lorentz math helpers (channels on sublanes, pixels on lanes).
# ---------------------------------------------------------------------------
def _logmap_ratio(z, c):
    # logmap0 of an on-manifold point depends only on its space part z:
    #   v = z * asinh(sqrt(c)*||z||) / (sqrt(c)*||z||)
    # (asinh form: numerically stable near 0, never touches the time channel).
    sqrt_c = math.sqrt(c)
    ss = jnp.maximum(jnp.sum(z * z, axis=0, keepdims=True), 1e-30)
    ct = sqrt_c * jnp.sqrt(ss)
    dist = jnp.log(ct + jnp.sqrt(ct * ct + 1.0)) * (1.0 / sqrt_c)  # asinh(ct)/sqrt(c)
    return dist * lax.rsqrt(ss)


def _expmap_space(v, c):
    # Space part of expmap0(v) = v * sinh(sqrt(c)*||v||) / (sqrt(c)*||v||).
    sqrt_c = math.sqrt(c)
    r2 = jnp.maximum(jnp.sum(v * v, axis=0, keepdims=True), 1e-30)
    a = jnp.minimum(sqrt_c * jnp.sqrt(r2), 32.0)     # clamp: no exp overflow
    sinh_a = 0.5 * (jnp.exp(a) - jnp.exp(-a))
    sf = jnp.where(a < 1e-4, 1.0, sinh_a * pl.reciprocal(a, approx=True))
    return v * sf


def _bn_space(z, scale, shift, c):
    # Tangent-space batch-norm (per-channel scale/shift precomputed in the
    # wrapper from the two-pass statistics) followed by expmap0.
    v = z * _logmap_ratio(z, c)
    return _expmap_space(v * scale + shift, c)


def _time_from_space(s, c):
    return jnp.sqrt(1.0 / c + jnp.sum(s * s, axis=0, keepdims=True))


# ---------------------------------------------------------------------------
# Pallas kernels.
# ---------------------------------------------------------------------------
def _lorentz_conv_kernel(a_ref, w_ref, b_ref, m_ref, z_ref, xh_ref, *,
                         offsets, sp):
    # a_ref : (Din, Sp)  bf16 padded-flat Lorentz points of one image.
    # w_ref : (T, Cout, Din) bf16 per-tap weights; b_ref: (Cout, 1) f32 bias.
    # m_ref : (1, Sp) f32 interior mask;  z_ref: (Cout, Sp) f32 space output.
    # xh_ref: (Din, Sp + 2*HALO) bf16 scratch.  Implicit im2col: each tap is a
    # shifted lane slice of the scratch; halo lanes are never read for
    # interior outputs (zero border of the layout provides the conv padding).
    xh_ref[:, _HALO:_HALO + sp] = a_ref[...]
    acc = None
    for t, off in enumerate(offsets):
        xs = xh_ref[:, _HALO + off:_HALO + off + sp]
        d = jnp.dot(w_ref[t], xs, preferred_element_type=jnp.float32)
        acc = d if acc is None else acc + d
    acc = acc + b_ref[...]
    # Keep border/tail at exactly zero (it is the next conv's zero padding).
    # The Lorentz time output is intentionally NOT materialized: every
    # consumer recomputes it from the space part (saves a column of traffic).
    z_ref[...] = jnp.where(m_ref[...] != 0.0, acc, 0.0)


def _bn_stats_kernel(z_ref, o_ref, *, c):
    # Pass 1 of the two-pass BN: per-channel sum(v) / sum(v*v) of the tangent
    # vectors, accumulated over the whole grid into a resident output block.
    cout = z_ref.shape[0]

    @pl.when(pl.program_id(0) == 0)
    def _init():
        o_ref[...] = jnp.zeros_like(o_ref)

    z = z_ref[...]
    v = z * _logmap_ratio(z, c)              # border/tail columns are exactly 0
    o_ref[:cout, :] = o_ref[:cout, :] + jnp.sum(v, axis=1, keepdims=True)
    o_ref[cout:, :] = o_ref[cout:, :] + jnp.sum(v * v, axis=1, keepdims=True)


def _bn_relu_kernel(z_ref, p_ref, m_ref, o_ref, *, c):
    # Fused LorentzBatchNorm2d (normalize + expmap0) + LorentzActivation(ReLU).
    # Emits the full Lorentz point with time recomputed from the ReLU'd space.
    s = _bn_space(z_ref[...], p_ref[:, 0:1], p_ref[:, 1:2], c)
    s = jnp.maximum(s, 0.0)
    t = _time_from_space(s, c)
    m = m_ref[...]
    # Sublane-sliced, full-lane-width stores (lane-dense; the time row and the
    # space rows share one output tile).
    o_ref[0:1, :] = (t * m).astype(o_ref.dtype)
    o_ref[1:, :] = (s * m).astype(o_ref.dtype)


def _residual_relu_store(t2, s2, tsc, ssc, m, o_ref, c, res_w):
    # TODO(synk): exact LResNet weight parameterization unknown; uses the
    # fixed mixing coefficient weight*scale = 0.5*2.0 = 1.0.
    zt = t2 + res_w * tsc
    zs = s2 + res_w * ssc
    inner = jnp.sum(zs * zs, axis=0, keepdims=True) - zt * zt      # <z,z>_L
    scale = lax.rsqrt(jnp.maximum(c * (-inner), 1e-30))            # renormalize
    sr = jnp.maximum(zs * scale, 0.0)                              # ReLU (space)
    tr = _time_from_space(sr, c)
    o_ref[0:1, :] = tr * m
    o_ref[1:, :] = sr * m


def _bn_residual_relu_kernel(z2_ref, zsc_ref, p2_ref, psc_ref, m_ref, o_ref, *,
                             c, res_w):
    # Fused bn2 + shortcut-bn + LResNet residual + final ReLU.
    s2 = _bn_space(z2_ref[...], p2_ref[:, 0:1], p2_ref[:, 1:2], c)
    ssc = _bn_space(zsc_ref[...], psc_ref[:, 0:1], psc_ref[:, 1:2], c)
    _residual_relu_store(_time_from_space(s2, c), s2,
                         _time_from_space(ssc, c), ssc,
                         m_ref[...], o_ref, c, res_w)


def _residual_relu_kernel_identity(z2_ref, xsc_ref, p2_ref, m_ref, o_ref, *,
                                   c, res_w):
    # Identity-shortcut variant (stride == 1 and in_channels == out_channels).
    s2 = _bn_space(z2_ref[...], p2_ref[:, 0:1], p2_ref[:, 1:2], c)
    xsc = xsc_ref[...]
    _residual_relu_store(_time_from_space(s2, c), s2,
                         xsc[0:1, :], xsc[1:, :],
                         m_ref[...], o_ref, c, res_w)


# ---------------------------------------------------------------------------
# pallas_call wrappers.
# ---------------------------------------------------------------------------
def _parallel():
    # Grid over batch images: shard across TensorCores (2x on v7x megacore).
    return pltpu.CompilerParams(dimension_semantics=("parallel",))


def lorentz_conv2d(a, w, bias, mask, *, batch, h, wd, k, stride, pad):
    """Implicit-im2col Lorentz convolution on padded-flat activations.

    a: (Din, batch*Sp) bf16 Lorentz points.  w: (k*k*Din, Cout) f32 (im2col
    order, tap-major / channel-minor).  Returns (z, ho, wo) with
    z = (Cout, batch*Sp_out) f32 *space* output, border/tail zeroed.
    """
    din = a.shape[0]
    cout = w.shape[1]
    hp, wp, sp = _padded_dims(h, wd)
    # TODO(synk): hnn.LorentzConv2d padding convention assumed to be zero-
    # padded im2col over all (time + space) channels.
    assert (k, pad) in ((3, 1), (1, 0)), "layout supports 3x3/pad=1 and 1x1/pad=0"
    offsets = [(di - pad) * wp + (dj - pad) for di in range(k) for dj in range(k)]
    assert max(abs(o) for o in offsets) < _HALO
    w_t = w.reshape(k * k, din, cout).transpose(0, 2, 1).astype(jnp.bfloat16)
    b2 = bias.reshape(cout, 1).astype(jnp.float32)

    z = pl.pallas_call(
        functools.partial(_lorentz_conv_kernel, offsets=offsets, sp=sp),
        out_shape=jax.ShapeDtypeStruct((cout, batch * sp), jnp.float32),
        grid=(batch,),
        in_specs=[
            pl.BlockSpec((din, sp), lambda i: (0, i)),
            pl.BlockSpec((k * k, cout, din), lambda i: (0, 0, 0)),
            pl.BlockSpec((cout, 1), lambda i: (0, 0)),
            pl.BlockSpec((1, sp), lambda i: (0, 0)),
        ],
        out_specs=pl.BlockSpec((cout, sp), lambda i: (0, i)),
        scratch_shapes=[pltpu.VMEM((din, sp + 2 * _HALO), jnp.bfloat16)],
        compiler_params=_parallel(),
    )(a, w_t, b2, mask)

    if stride == 1:
        return z, h, wd
    # TODO(synk): stride>1 falls back to the dense (stride-1) kernel plus
    # wrapper-side subsampling (correct, but stride^2 extra work).
    ho = (h + 2 * pad - k) // stride + 1
    wo = (wd + 2 * pad - k) // stride + 1
    zs = z.reshape(cout, batch, sp)[:, :, :hp * wp].reshape(cout, batch, hp, wp)
    zs = zs[:, :, _BORDER:hp - _BORDER, _BORDER:wp - _BORDER]
    zs = zs[:, :, ::stride, ::stride][:, :, :ho, :wo]
    return _to_padded_flat(zs), ho, wo


def lorentz_bn_stats(z, gamma, beta, *, batch, h, wd, c, eps=1e-5):
    """Two-pass BN, pass 1: gridded accumulation of per-channel sums (Pallas);
    the tiny mean/var -> (scale, shift) math is left to XLA."""
    cout = z.shape[0]
    _, _, sp = _padded_dims(h, wd)
    sums = pl.pallas_call(
        functools.partial(_bn_stats_kernel, c=c),
        out_shape=jax.ShapeDtypeStruct((2 * cout, _LANE), jnp.float32),
        grid=(batch,),
        in_specs=[pl.BlockSpec((cout, sp), lambda i: (0, i))],
        out_specs=pl.BlockSpec((2 * cout, _LANE), lambda i: (0, 0)),
        compiler_params=pltpu.CompilerParams(dimension_semantics=("arbitrary",)),
    )(z)
    n = float(batch * h * wd)                 # border/tail pixels contribute 0
    s = sums[:, 0]
    mean = s[:cout] / n
    var = jnp.maximum(s[cout:] / n - mean * mean, 0.0)
    scale = gamma * lax.rsqrt(var + eps)
    shift = beta - mean * scale
    return jnp.stack([scale, shift], axis=1).astype(jnp.float32)     # (Cout, 2)


def lorentz_bn_relu(z, p, mask, *, batch, h, wd, c):
    cout = z.shape[0]
    _, _, sp = _padded_dims(h, wd)
    return pl.pallas_call(
        functools.partial(_bn_relu_kernel, c=c),
        out_shape=jax.ShapeDtypeStruct((cout + 1, batch * sp), jnp.bfloat16),
        grid=(batch,),
        in_specs=[pl.BlockSpec((cout, sp), lambda i: (0, i)),
                  pl.BlockSpec((cout, 2), lambda i: (0, 0)),
                  pl.BlockSpec((1, sp), lambda i: (0, 0))],
        out_specs=pl.BlockSpec((cout + 1, sp), lambda i: (0, i)),
        compiler_params=_parallel(),
    )(z, p, mask)


def lorentz_bn_residual_relu(z2, p2, zsc, psc, mask, *, batch, h, wd, c, res_w):
    cout = z2.shape[0]
    _, _, sp = _padded_dims(h, wd)
    return pl.pallas_call(
        functools.partial(_bn_residual_relu_kernel, c=c, res_w=res_w),
        out_shape=jax.ShapeDtypeStruct((cout + 1, batch * sp), jnp.float32),
        grid=(batch,),
        in_specs=[pl.BlockSpec((cout, sp), lambda i: (0, i)),
                  pl.BlockSpec((cout, sp), lambda i: (0, i)),
                  pl.BlockSpec((cout, 2), lambda i: (0, 0)),
                  pl.BlockSpec((cout, 2), lambda i: (0, 0)),
                  pl.BlockSpec((1, sp), lambda i: (0, 0))],
        out_specs=pl.BlockSpec((cout + 1, sp), lambda i: (0, i)),
        compiler_params=_parallel(),
    )(z2, zsc, p2, psc, mask)


def lorentz_residual_relu_identity(z2, p2, x_point, mask, *, batch, h, wd, c,
                                   res_w):
    cout = z2.shape[0]
    din = x_point.shape[0]
    _, _, sp = _padded_dims(h, wd)
    return pl.pallas_call(
        functools.partial(_residual_relu_kernel_identity, c=c, res_w=res_w),
        out_shape=jax.ShapeDtypeStruct((cout + 1, batch * sp), jnp.float32),
        grid=(batch,),
        in_specs=[pl.BlockSpec((cout, sp), lambda i: (0, i)),
                  pl.BlockSpec((din, sp), lambda i: (0, i)),
                  pl.BlockSpec((cout, 2), lambda i: (0, 0)),
                  pl.BlockSpec((1, sp), lambda i: (0, 0))],
        out_specs=pl.BlockSpec((cout + 1, sp), lambda i: (0, i)),
        compiler_params=_parallel(),
    )(z2, x_point, p2, mask)


# ---------------------------------------------------------------------------
# LorentzBasicBlock forward.
# ---------------------------------------------------------------------------
def lorentz_basic_block(x_nchw, params, *, in_channels, out_channels, stride, c):
    """Forward pass of LorentzBasicBlock.  Input/output: NCHW float32."""
    b, cin, h, wd = x_nchw.shape
    assert cin == in_channels
    x_cf = jnp.transpose(x_nchw.astype(jnp.float32), (1, 0, 2, 3))   # (C,B,H,W)
    x_flat = _to_padded_flat(x_cf)                                   # (Cin, B*Sp)
    x_bf = x_flat.astype(jnp.bfloat16)                               # bf16 conv feed
    mask0 = _interior_mask(h, wd)

    z1, h1, w1 = lorentz_conv2d(x_bf, params["conv1_w"], params["conv1_b"],
                                mask0, batch=b, h=h, wd=wd,
                                k=3, stride=stride, pad=1)
    mask1 = mask0 if (h1, w1) == (h, wd) else _interior_mask(h1, w1)
    p1 = lorentz_bn_stats(z1, params["bn1_gamma"], params["bn1_beta"],
                          batch=b, h=h1, wd=w1, c=c)
    a1 = lorentz_bn_relu(z1, p1, mask1, batch=b, h=h1, wd=w1, c=c)

    z2, _, _ = lorentz_conv2d(a1, params["conv2_w"], params["conv2_b"],
                              mask1, batch=b, h=h1, wd=w1, k=3, stride=1, pad=1)
    p2 = lorentz_bn_stats(z2, params["bn2_gamma"], params["bn2_beta"],
                          batch=b, h=h1, wd=w1, c=c)

    res_w = 0.5 * 2.0                         # LResNet(weight=0.5, scale=2.0)
    if stride != 1 or in_channels != out_channels:
        zsc, _, _ = lorentz_conv2d(x_bf, params["sc_w"], params["sc_b"],
                                   mask0, batch=b, h=h, wd=wd,
                                   k=1, stride=stride, pad=0)
        psc = lorentz_bn_stats(zsc, params["sc_gamma"], params["sc_beta"],
                               batch=b, h=h1, wd=w1, c=c)
        out = lorentz_bn_residual_relu(z2, p2, zsc, psc, mask1,
                                       batch=b, h=h1, wd=w1, c=c, res_w=res_w)
    else:
        out = lorentz_residual_relu_identity(z2, p2, x_flat, mask1,
                                             batch=b, h=h1, wd=w1, c=c,
                                             res_w=res_w)
    return _from_padded_flat(out, b, h1, w1)


# ---------------------------------------------------------------------------
# Deterministic parameter init (synthetic; shapes follow the module __init__).
# ---------------------------------------------------------------------------
def init_params(key, in_channels, out_channels, stride):
    keys = jax.random.split(key, 3)

    def conv_w(k, ksz, cin, cout):
        fan = ksz * ksz * cin
        return (jax.random.normal(k, (ksz * ksz * cin, cout), jnp.float32)
                / jnp.sqrt(jnp.float32(fan)))

    p = {
        "conv1_w": conv_w(keys[0], 3, in_channels, out_channels),
        "conv1_b": jnp.zeros((out_channels,), jnp.float32),
        "bn1_gamma": jnp.ones((out_channels,), jnp.float32),
        "bn1_beta": jnp.zeros((out_channels,), jnp.float32),
        "conv2_w": conv_w(keys[1], 3, out_channels + 1, out_channels),
        "conv2_b": jnp.zeros((out_channels,), jnp.float32),
        "bn2_gamma": jnp.ones((out_channels,), jnp.float32),
        "bn2_beta": jnp.zeros((out_channels,), jnp.float32),
    }
    if stride != 1 or in_channels != out_channels:
        p["sc_w"] = conv_w(keys[2], 1, in_channels, out_channels)
        p["sc_b"] = jnp.zeros((out_channels,), jnp.float32)
        p["sc_gamma"] = jnp.ones((out_channels,), jnp.float32)
        p["sc_beta"] = jnp.zeros((out_channels,), jnp.float32)
    return p


if __name__ == "__main__":
    key = jax.random.PRNGKey(0)
    k_x, k_p = jax.random.split(key)

    # Small shapes consistent with the module: in_channels = Lorentz ambient
    # dim of the input (1 time + 4 space), out_channels = 8.
    B, in_channels, H, W = 2, 5, 16, 16
    out_channels, stride, curvature = 8, 1, 1.0

    # On-manifold NCHW input: channel 0 is the Lorentz time component.
    space = 0.1 * jax.random.normal(k_x, (B, in_channels - 1, H, W), jnp.float32)
    time = jnp.sqrt(1.0 / curvature + jnp.sum(space * space, axis=1, keepdims=True))
    x = jnp.concatenate([time, space], axis=1)          # (2, 5, 16, 16) NCHW

    params = init_params(k_p, in_channels, out_channels, stride)

    fwd = jax.jit(functools.partial(
        lorentz_basic_block,
        in_channels=in_channels, out_channels=out_channels,
        stride=stride, c=curvature))

    y = jax.block_until_ready(fwd(x, params))

    assert y.shape == (B, out_channels + 1, H // stride, W // stride), y.shape
    assert bool(jnp.isfinite(y).all())
    print("KERNEL_OK")
</pallas_src>

<mosaic_0001>
module attributes {stable_mosaic.version = 11 : i64} {
  func.func @_lorentz_conv_kernel(%arg0: i32, %arg1: memref<5x384xbf16, #tpu.memory_space<vmem>>, %arg2: memref<9x8x5xbf16, #tpu.memory_space<vmem>>, %arg3: memref<8x1xf32, #tpu.memory_space<vmem>>, %arg4: memref<1x384xf32, #tpu.memory_space<vmem>>, %arg5: memref<8x384xf32, #tpu.memory_space<vmem>>, %arg6: memref<5x640xbf16, #tpu.memory_space<vmem>>) attributes {dimension_semantics = [#tpu.dimension_semantics<parallel>], iteration_bounds = array<i64: 2>, scalar_prefetch = 0 : i64, scratch_operands = 1 : i64, tpu.core_type = #tpu.core_type<tc>, window_params = [{transform_indices = @transform_0, window_bounds = array<i64: 5, 384>}, {pipeline_mode = #tpu.pipeline_mode<synchronous>, transform_indices = @transform_1, window_bounds = array<i64: 9, 8, 5>}, {pipeline_mode = #tpu.pipeline_mode<synchronous>, transform_indices = @transform_2, window_bounds = array<i64: 8, 1>}, {pipeline_mode = #tpu.pipeline_mode<synchronous>, transform_indices = @transform_3, window_bounds = array<i64: 1, 384>}, {transform_indices = @transform_4, window_bounds = array<i64: 8, 384>}]} {
    %c0 = arith.constant 0 : index
    %c0_0 = arith.constant 0 : index
    %0 = vector.load %arg1[%c0, %c0_0] : memref<5x384xbf16, #tpu.memory_space<vmem>>, vector<5x384xbf16>
    %c0_1 = arith.constant 0 : index
    %c128 = arith.constant 128 : index
    %1 = vector.load %arg6[%c0_1, %c128] : memref<5x640xbf16, #tpu.memory_space<vmem>>, vector<5x384xbf16>
    tpu.vector_store %arg6[%c0_1, %c128], %0 {strides = array<i32>} : memref<5x640xbf16, #tpu.memory_space<vmem>>, vector<5x384xbf16>,
    %c0_2 = arith.constant 0 : index
    %c109 = arith.constant 109 : index
    %2 = vector.load %arg6[%c0_2, %c109] : memref<5x640xbf16, #tpu.memory_space<vmem>>, vector<5x384xbf16>
    %c0_3 = arith.constant 0 : index
    %c0_4 = arith.constant 0 : index
    %c0_5 = arith.constant 0 : index
    %3 = vector.load %arg2[%c0_3, %c0_4, %c0_5] : memref<9x8x5xbf16, #tpu.memory_space<vmem>>, vector<1x8x5xbf16>
    %4 = vector.shape_cast %3 : vector<1x8x5xbf16> to vector<8x5xbf16>
    %cst = arith.constant dense<0.000000e+00> : vector<8x384xf32>
    %5 = tpu.matmul %4, %2, %cst {dimension_numbers = #tpu.dot_dimension_numbers<[1], [0], [0], [1], [0, 0, 1, 1], [], []>} : vector<8x5xbf16>, vector<5x384xbf16>, vector<8x384xf32> -> vector<8x384xf32>
    %c0_6 = arith.constant 0 : index
    %c110 = arith.constant 110 : index
    %6 = vector.load %arg6[%c0_6, %c110] : memref<5x640xbf16, #tpu.memory_space<vmem>>, vector<5x384xbf16>
    %c1 = arith.constant 1 : index
    %c0_7 = arith.constant 0 : index
    %c0_8 = arith.constant 0 : index
    %7 = vector.load %arg2[%c1, %c0_7, %c0_8] : memref<9x8x5xbf16, #tpu.memory_space<vmem>>, vector<1x8x5xbf16>
    %8 = vector.shape_cast %7 : vector<1x8x5xbf16> to vector<8x5xbf16>
    %cst_9 = arith.constant dense<0.000000e+00> : vector<8x384xf32>
    %9 = tpu.matmul %8, %6, %cst_9 {dimension_numbers = #tpu.dot_dimension_numbers<[1], [0], [0], [1], [0, 0, 1, 1], [], []>} : vector<8x5xbf16>, vector<5x384xbf16>, vector<8x384xf32> -> vector<8x384xf32>
    %10 = arith.addf %5, %9 : vector<8x384xf32>
    %c0_10 = arith.constant 0 : index
    %c111 = arith.constant 111 : index
    %11 = vector.load %arg6[%c0_10, %c111] : memref<5x640xbf16, #tpu.memory_space<vmem>>, vector<5x384xbf16>
    %c2 = arith.constant 2 : index
    %c0_11 = arith.constant 0 : index
    %c0_12 = arith.constant 0 : index
    %12 = vector.load %arg2[%c2, %c0_11, %c0_12] : memref<9x8x5xbf16, #tpu.memory_space<vmem>>, vector<1x8x5xbf16>
    %13 = vector.shape_cast %12 : vector<1x8x5xbf16> to vector<8x5xbf16>
    %cst_13 = arith.constant dense<0.000000e+00> : vector<8x384xf32>
    %14 = tpu.matmul %13, %11, %cst_13 {dimension_numbers = #tpu.dot_dimension_numbers<[1], [0], [0], [1], [0, 0, 1, 1], [], []>} : vector<8x5xbf16>, vector<5x384xbf16>, vector<8x384xf32> -> vector<8x384xf32>
    %15 = arith.addf %10, %14 : vector<8x384xf32>
    %c0_14 = arith.constant 0 : index
    %c127 = arith.constant 127 : index
    %16 = vector.load %arg6[%c0_14, %c127] : memref<5x640xbf16, #tpu.memory_space<vmem>>, vector<5x384xbf16>
    %c3 = arith.constant 3 : index
    %c0_15 = arith.constant 0 : index
    %c0_16 = arith.constant 0 : index
    %17 = vector.load %arg2[%c3, %c0_15, %c0_16] : memref<9x8x5xbf16, #tpu.memory_space<vmem>>, vector<1x8x5xbf16>
    %18 = vector.shape_cast %17 : vector<1x8x5xbf16> to vector<8x5xbf16>
    %cst_17 = arith.constant dense<0.000000e+00> : vector<8x384xf32>
    %19 = tpu.matmul %18, %16, %cst_17 {dimension_numbers = #tpu.dot_dimension_numbers<[1], [0], [0], [1], [0, 0, 1, 1], [], []>} : vector<8x5xbf16>, vector<5x384xbf16>, vector<8x384xf32> -> vector<8x384xf32>
    %20 = arith.addf %15, %19 : vector<8x384xf32>
    %c0_18 = arith.constant 0 : index
    %c128_19 = arith.constant 128 : index
    %21 = vector.load %arg6[%c0_18, %c128_19] : memref<5x640xbf16, #tpu.memory_space<vmem>>, vector<5x384xbf16>
    %c4 = arith.constant 4 : index
    %c0_20 = arith.constant 0 : index
    %c0_21 = arith.constant 0 : index
    %22 = vector.load %arg2[%c4, %c0_20, %c0_21] : memref<9x8x5xbf16, #tpu.memory_space<vmem>>, vector<1x8x5xbf16>
    %23 = vector.shape_cast %22 : vector<1x8x5xbf16> to vector<8x5xbf16>
    %cst_22 = arith.constant dense<0.000000e+00> : vector<8x384xf32>
    %24 = tpu.matmul %23, %21, %cst_22 {dimension_numbers = #tpu.dot_dimension_numbers<[1], [0], [0], [1], [0, 0, 1, 1], [], []>} : vector<8x5xbf16>, vector<5x384xbf16>, vector<8x384xf32> -> vector<8x384xf32>
    %25 = arith.addf %20, %24 : vector<8x384xf32>
    %c0_23 = arith.constant 0 : index
    %c129 = arith.constant 129 : index
    %26 = vector.load %arg6[%c0_23, %c129] : memref<5x640xbf16, #tpu.memory_space<vmem>>, vector<5x384xbf16>
    %c5 = arith.constant 5 : index
    %c0_24 = arith.constant 0 : index
    %c0_25 = arith.constant 0 : index
    %27 = vector.load %arg2[%c5, %c0_24, %c0_25] : memref<9x8x5xbf16, #tpu.memory_space<vmem>>, vector<1x8x5xbf16>
    %28 = vector.shape_cast %27 : vector<1x8x5xbf16> to vector<8x5xbf16>
    %cst_26 = arith.constant dense<0.000000e+00> : vector<8x384xf32>
    %29 = tpu.matmul %28, %26, %cst_26 {dimension_numbers = #tpu.dot_dimension_numbers<[1], [0], [0], [1], [0, 0, 1, 1], [], []>} : vector<8x5xbf16>, vector<5x384xbf16>, vector<8x384xf32> -> vector<8x384xf32>
    %30 = arith.addf %25, %29 : vector<8x384xf32>
    %c0_27 = arith.constant 0 : index
    %c145 = arith.constant 145 : index
    %31 = vector.load %arg6[%c0_27, %c145] : memref<5x640xbf16, #tpu.memory_space<vmem>>, vector<5x384xbf16>
    %c6 = arith.constant 6 : index
    %c0_28 = arith.constant 0 : index
    %c0_29 = arith.constant 0 : index
    %32 = vector.load %arg2[%c6, %c0_28, %c0_29] : memref<9x8x5xbf16, #tpu.memory_space<vmem>>, vector<1x8x5xbf16>
    %33 = vector.shape_cast %32 : vector<1x8x5xbf16> to vector<8x5xbf16>
    %cst_30 = arith.constant dense<0.000000e+00> : vector<8x384xf32>
    %34 = tpu.matmul %33, %31, %cst_30 {dimension_numbers = #tpu.dot_dimension_numbers<[1], [0], [0], [1], [0, 0, 1, 1], [], []>} : vector<8x5xbf16>, vector<5x384xbf16>, vector<8x384xf32> -> vector<8x384xf32>
    %35 = arith.addf %30, %34 : vector<8x384xf32>
    %c0_31 = arith.constant 0 : index
    %c146 = arith.constant 146 : index
    %36 = vector.load %arg6[%c0_31, %c146] : memref<5x640xbf16, #tpu.memory_space<vmem>>, vector<5x384xbf16>
    %c7 = arith.constant 7 : index
    %c0_32 = arith.constant 0 : index
    %c0_33 = arith.constant 0 : index
    %37 = vector.load %arg2[%c7, %c0_32, %c0_33] : memref<9x8x5xbf16, #tpu.memory_space<vmem>>, vector<1x8x5xbf16>
    %38 = vector.shape_cast %37 : vector<1x8x5xbf16> to vector<8x5xbf16>
    %cst_34 = arith.constant dense<0.000000e+00> : vector<8x384xf32>
    %39 = tpu.matmul %38, %36, %cst_34 {dimension_numbers = #tpu.dot_dimension_numbers<[1], [0], [0], [1], [0, 0, 1, 1], [], []>} : vector<8x5xbf16>, vector<5x384xbf16>, vector<8x384xf32> -> vector<8x384xf32>
    %40 = arith.addf %35, %39 : vector<8x384xf32>
    %c0_35 = arith.constant 0 : index
    %c147 = arith.constant 147 : index
    %41 = vector.load %arg6[%c0_35, %c147] : memref<5x640xbf16, #tpu.memory_space<vmem>>, vector<5x384xbf16>
    %c8 = arith.constant 8 : index
    %c0_36 = arith.constant 0 : index
    %c0_37 = arith.constant 0 : index
    %42 = vector.load %arg2[%c8, %c0_36, %c0_37] : memref<9x8x5xbf16, #tpu.memory_space<vmem>>, vector<1x8x5xbf16>
    %43 = vector.shape_cast %42 : vector<1x8x5xbf16> to vector<8x5xbf16>
    %cst_38 = arith.constant dense<0.000000e+00> : vector<8x384xf32>
    %44 = tpu.matmul %43, %41, %cst_38 {dimension_numbers = #tpu.dot_dimension_numbers<[1], [0], [0], [1], [0, 0, 1, 1], [], []>} : vector<8x5xbf16>, vector<5x384xbf16>, vector<8x384xf32> -> vector<8x384xf32>
    %45 = arith.addf %40, %44 : vector<8x384xf32>
    %c0_39 = arith.constant 0 : index
    %c0_40 = arith.constant 0 : index
    %46 = vector.load %arg3[%c0_39, %c0_40] : memref<8x1xf32, #tpu.memory_space<vmem>>, vector<8x1xf32>
    %47 = vector.broadcast %46 : vector<8x1xf32> to vector<8x384xf32>
    %48 = arith.addf %45, %47 : vector<8x384xf32>
    %c0_41 = arith.constant 0 : index
    %c0_42 = arith.constant 0 : index
    %49 = vector.load %arg4[%c0_41, %c0_42] : memref<1x384xf32, #tpu.memory_space<vmem>>, vector<1x384xf32>
    %cst_43 = arith.constant 0.000000e+00 : f32
    %50 = vector.broadcast %cst_43 : f32 to vector<1x384xf32>
    %51 = arith.cmpf one, %49, %50 : vector<1x384xf32>
    %cst_44 = arith.constant 0.000000e+00 : f32
    %52 = vector.shape_cast %51 : vector<1x384xi1> to vector<1x384xi1>
    %53 = vector.broadcast %52 : vector<1x384xi1> to vector<8x384xi1>
    %54 = vector.broadcast %cst_44 : f32 to vector<8x384xf32>
    %55 = arith.select %53, %48, %54 : vector<8x384xi1>, vector<8x384xf32>
    %c0_45 = arith.constant 0 : index
    %c0_46 = arith.constant 0 : index
    %56 = vector.load %arg5[%c0_45, %c0_46] : memref<8x384xf32, #tpu.memory_space<vmem>>, vector<8x384xf32>
    tpu.vector_store %arg5[%c0_45, %c0_46], %55 {strides = array<i32>} : memref<8x384xf32, #tpu.memory_space<vmem>>, vector<8x384xf32>,
    return
  }
  func.func @transform_0(%arg0: i32) -> (i32, i32) {
    %c0_i32 = arith.constant 0 : i32
    %c0_i32_0 = arith.constant 0 : i32
    return %c0_i32, %arg0 : i32, i32
  }
  func.func @transform_1(%arg0: i32) -> (i32, i32, i32) {
    %c0_i32 = arith.constant 0 : i32
    %c0_i32_0 = arith.constant 0 : i32
    %c0_i32_1 = arith.constant 0 : i32
    %c0_i32_2 = arith.constant 0 : i32
    return %c0_i32, %c0_i32_0, %c0_i32_1 : i32, i32, i32
  }
  func.func @transform_2(%arg0: i32) -> (i32, i32) {
    %c0_i32 = arith.constant 0 : i32
    %c0_i32_0 = arith.constant 0 : i32
    %c0_i32_1 = arith.constant 0 : i32
    return %c0_i32, %c0_i32_0 : i32, i32
  }
  func.func @transform_3(%arg0: i32) -> (i32, i32) {
    %c0_i32 = arith.constant 0 : i32
    %c0_i32_0 = arith.constant 0 : i32
    %c0_i32_1 = arith.constant 0 : i32
    return %c0_i32, %c0_i32_0 : i32, i32
  }
  func.func @transform_4(%arg0: i32) -> (i32, i32) {
    %c0_i32 = arith.constant 0 : i32
    %c0_i32_0 = arith.constant 0 : i32
    return %c0_i32, %arg0 : i32, i32
  }
}

module attributes {stable_mosaic.version = 11 : i64} {
  func.func @_lorentz_conv_kernel(%arg0: i32, %arg1: memref<5x384xbf16, #tpu.memory_space<vmem>>, %arg2: memref<1x8x5xbf16, #tpu.memory_space<vmem>>, %arg3: memref<8x1xf32, #tpu.memory_space<vmem>>, %arg4: memref<1x384xf32, #tpu.memory_space<vmem>>, %arg5: memref<8x384xf32, #tpu.memory_space<vmem>>, %arg6: memref<5x640xbf16, #tpu.memory_space<vmem>>) attributes {dimension_semantics = [#tpu.dimension_semantics<parallel>], iteration_bounds = array<i64: 2>, scalar_prefetch = 0 : i64, scratch_operands = 1 : i64, tpu.core_type = #tpu.core_type<tc>, window_params = [{transform_indices = @transform_0, window_bounds = array<i64: 5, 384>}, {pipeline_mode = #tpu.pipeline_mode<synchronous>, transform_indices = @transform_1, window_bounds = array<i64: 1, 8, 5>}, {pipeline_mode = #tpu.pipeline_mode<synchronous>, transform_indices = @transform_2, window_bounds = array<i64: 8, 1>}, {pipeline_mode = #tpu.pipeline_mode<synchronous>, transform_indices = @transform_3, window_bounds = array<i64: 1, 384>}, {transform_indices = @transform_4, window_bounds = array<i64: 8, 384>}]} {
    %c0 = arith.constant 0 : index
    %c0_0 = arith.constant 0 : index
    %0 = vector.load %arg1[%c0, %c0_0] : memref<5x384xbf16, #tpu.memory_space<vmem>>, vector<5x384xbf16>
    %c0_1 = arith.constant 0 : index
    %c128 = arith.constant 128 : index
    %1 = vector.load %arg6[%c0_1, %c128] : memref<5x640xbf16, #tpu.memory_space<vmem>>, vector<5x384xbf16>
    tpu.vector_store %arg6[%c0_1, %c128], %0 {strides = array<i32>} : memref<5x640xbf16, #tpu.memory_space<vmem>>, vector<5x384xbf16>,
    %c0_2 = arith.constant 0 : index
    %c128_3 = arith.constant 128 : index
    %2 = vector.load %arg6[%c0_2, %c128_3] : memref<5x640xbf16, #tpu.memory_space<vmem>>, vector<5x384xbf16>
    %c0_4 = arith.constant 0 : index
    %c0_5 = arith.constant 0 : index
    %c0_6 = arith.constant 0 : index
    %3 = vector.load %arg2[%c0_4, %c0_5, %c0_6] : memref<1x8x5xbf16, #tpu.memory_space<vmem>>, vector<1x8x5xbf16>
    %4 = vector.shape_cast %3 : vector<1x8x5xbf16> to vector<8x5xbf16>
    %cst = arith.constant dense<0.000000e+00> : vector<8x384xf32>
    %5 = tpu.matmul %4, %2, %cst {dimension_numbers = #tpu.dot_dimension_numbers<[1], [0], [0], [1], [0, 0, 1, 1], [], []>} : vector<8x5xbf16>, vector<5x384xbf16>, vector<8x384xf32> -> vector<8x384xf32>
    %c0_7 = arith.constant 0 : index
    %c0_8 = arith.constant 0 : index
    %6 = vector.load %arg3[%c0_7, %c0_8] : memref<8x1xf32, #tpu.memory_space<vmem>>, vector<8x1xf32>
    %7 = vector.broadcast %6 : vector<8x1xf32> to vector<8x384xf32>
    %8 = arith.addf %5, %7 : vector<8x384xf32>
    %c0_9 = arith.constant 0 : index
    %c0_10 = arith.constant 0 : index
    %9 = vector.load %arg4[%c0_9, %c0_10] : memref<1x384xf32, #tpu.memory_space<vmem>>, vector<1x384xf32>
    %cst_11 = arith.constant 0.000000e+00 : f32
    %10 = vector.broadcast %cst_11 : f32 to vector<1x384xf32>
    %11 = arith.cmpf one, %9, %10 : vector<1x384xf32>
    %cst_12 = arith.constant 0.000000e+00 : f32
    %12 = vector.shape_cast %11 : vector<1x384xi1> to vector<1x384xi1>
    %13 = vector.broadcast %12 : vector<1x384xi1> to vector<8x384xi1>
    %14 = vector.broadcast %cst_12 : f32 to vector<8x384xf32>
    %15 = arith.select %13, %8, %14 : vector<8x384xi1>, vector<8x384xf32>
    %c0_13 = arith.constant 0 : index
    %c0_14 = arith.constant 0 : index
    %16 = vector.load %arg5[%c0_13, %c0_14] : memref<8x384xf32, #tpu.memory_space<vmem>>, vector<8x384xf32>
    tpu.vector_store %arg5[%c0_13, %c0_14], %15 {strides = array<i32>} : memref<8x384xf32, #tpu.memory_space<vmem>>, vector<8x384xf32>,
    return
  }
  func.func @transform_0(%arg0: i32) -> (i32, i32) {
    %c0_i32 = arith.constant 0 : i32
    %c0_i32_0 = arith.constant 0 : i32
    return %c0_i32, %arg0 : i32, i32
  }
  func.func @transform_1(%arg0: i32) -> (i32, i32, i32) {
    %c0_i32 = arith.constant 0 : i32
    %c0_i32_0 = arith.constant 0 : i32
    %c0_i32_1 = arith.constant 0 : i32
    %c0_i32_2 = arith.constant 0 : i32
    return %c0_i32, %c0_i32_0, %c0_i32_1 : i32, i32, i32
  }
  func.func @transform_2(%arg0: i32) -> (i32, i32) {
    %c0_i32 = arith.constant 0 : i32
    %c0_i32_0 = arith.constant 0 : i32
    %c0_i32_1 = arith.constant 0 : i32
    return %c0_i32, %c0_i32_0 : i32, i32
  }
  func.func @transform_3(%arg0: i32) -> (i32, i32) {
    %c0_i32 = arith.constant 0 : i32
    %c0_i32_0 = arith.constant 0 : i32
    %c0_i32_1 = arith.constant 0 : i32
    return %c0_i32, %c0_i32_0 : i32, i32
  }
  func.func @transform_4(%arg0: i32) -> (i32, i32) {
    %c0_i32 = arith.constant 0 : i32
    %c0_i32_0 = arith.constant 0 : i32
    return %c0_i32, %arg0 : i32, i32
  }
}

module attributes {stable_mosaic.version = 11 : i64} {
  func.func @_bn_stats_kernel(%arg0: i32, %arg1: memref<8x384xf32, #tpu.memory_space<vmem>>, %arg2: memref<16x128xf32, #tpu.memory_space<vmem>>) attributes {dimension_semantics = [#tpu.dimension_semantics<arbitrary>], iteration_bounds = array<i64: 2>, scalar_prefetch = 0 : i64, scratch_operands = 0 : i64, tpu.core_type = #tpu.core_type<tc>, window_params = [{transform_indices = @transform_0, window_bounds = array<i64: 8, 384>}, {pipeline_mode = #tpu.pipeline_mode<synchronous>, transform_indices = @transform_1, window_bounds = array<i64: 16, 128>}]} {
    %c0_i32 = arith.constant 0 : i32
    %0 = arith.cmpi eq, %arg0, %c0_i32 : i32
    %1 = arith.extui %0 : i1 to i32
    %c0_i32_0 = arith.constant 0 : i32
    %2 = arith.cmpi ne, %1, %c0_i32_0 : i32
    scf.if %2 {
      %cst_15 = arith.constant 0.000000e+00 : f32
      %37 = vector.broadcast %cst_15 : f32 to vector<16x128xf32>
      %c0_16 = arith.constant 0 : index
      %c0_17 = arith.constant 0 : index
      %38 = vector.load %arg2[%c0_16, %c0_17] : memref<16x128xf32, #tpu.memory_space<vmem>>, vector<16x128xf32>
      tpu.vector_store %arg2[%c0_16, %c0_17], %37 {strides = array<i32>} : memref<16x128xf32, #tpu.memory_space<vmem>>, vector<16x128xf32>,
    } else {
    }
    %c0 = arith.constant 0 : index
    %c0_1 = arith.constant 0 : index
    %3 = vector.load %arg1[%c0, %c0_1] : memref<8x384xf32, #tpu.memory_space<vmem>>, vector<8x384xf32>
    %4 = arith.mulf %3, %3 : vector<8x384xf32>
    %cst = arith.constant dense<0.000000e+00> : vector<384xf32>
    %5 = vector.multi_reduction <add>, %4, %cst [0] : vector<8x384xf32> to vector<384xf32>
    %6 = vector.shape_cast %5 : vector<384xf32> to vector<1x384xf32>
    %cst_2 = arith.constant 1.000000e-30 : f32
    %7 = vector.broadcast %cst_2 : f32 to vector<1x384xf32>
    %8 = arith.maximumf %6, %7 : vector<1x384xf32>
    %9 = math.sqrt %8 : vector<1x384xf32>
    %cst_3 = arith.constant 1.000000e+00 : f32
    %10 = vector.broadcast %cst_3 : f32 to vector<1x384xf32>
    %11 = arith.mulf %10, %9 : vector<1x384xf32>
    %12 = arith.mulf %11, %11 : vector<1x384xf32>
    %cst_4 = arith.constant 1.000000e+00 : f32
    %13 = vector.broadcast %cst_4 : f32 to vector<1x384xf32>
    %14 = arith.addf %12, %13 : vector<1x384xf32>
    %15 = math.sqrt %14 : vector<1x384xf32>
    %16 = arith.addf %11, %15 : vector<1x384xf32>
    %17 = math.log %16 : vector<1x384xf32>
    %cst_5 = arith.constant 1.000000e+00 : f32
    %18 = vector.broadcast %cst_5 : f32 to vector<1x384xf32>
    %19 = arith.mulf %17, %18 : vector<1x384xf32>
    %20 = math.rsqrt %8 : vector<1x384xf32>
    %21 = arith.mulf %19, %20 : vector<1x384xf32>
    %22 = vector.broadcast %21 : vector<1x384xf32> to vector<8x384xf32>
    %23 = arith.mulf %3, %22 : vector<8x384xf32>
    %c0_6 = arith.constant 0 : index
    %c0_7 = arith.constant 0 : index
    %24 = vector.load %arg2[%c0_6, %c0_7] : memref<16x128xf32, #tpu.memory_space<vmem>>, vector<8x128xf32>
    %cst_8 = arith.constant dense<0.000000e+00> : vector<8xf32>
    %25 = vector.multi_reduction <add>, %23, %cst_8 [1] : vector<8x384xf32> to vector<8xf32>
    %26 = vector.shape_cast %25 : vector<8xf32> to vector<8x1xf32>
    %27 = vector.broadcast %26 : vector<8x1xf32> to vector<8x128xf32>
    %28 = arith.addf %24, %27 : vector<8x128xf32>
    %c0_9 = arith.constant 0 : index
    %c0_10 = arith.constant 0 : index
    %29 = vector.load %arg2[%c0_9, %c0_10] : memref<16x128xf32, #tpu.memory_space<vmem>>, vector<8x128xf32>
    tpu.vector_store %arg2[%c0_9, %c0_10], %28 {strides = array<i32>} : memref<16x128xf32, #tpu.memory_space<vmem>>, vector<8x128xf32>,
    %c8 = arith.constant 8 : index
    %c0_11 = arith.constant 0 : index
    %30 = vector.load %arg2[%c8, %c0_11] : memref<16x128xf32, #tpu.memory_space<vmem>>, vector<8x128xf32>
    %31 = arith.mulf %23, %23 : vector<8x384xf32>
    %cst_12 = arith.constant dense<0.000000e+00> : vector<8xf32>
    %32 = vector.multi_reduction <add>, %31, %cst_12 [1] : vector<8x384xf32> to vector<8xf32>
    %33 = vector.shape_cast %32 : vector<8xf32> to vector<8x1xf32>
    %34 = vector.broadcast %33 : vector<8x1xf32> to vector<8x128xf32>
    %35 = arith.addf %30, %34 : vector<8x128xf32>
    %c8_13 = arith.constant 8 : index
    %c0_14 = arith.constant 0 : index
    %36 = vector.load %arg2[%c8_13, %c0_14] : memref<16x128xf32, #tpu.memory_space<vmem>>, vector<8x128xf32>
    tpu.vector_store %arg2[%c8_13, %c0_14], %35 {strides = array<i32>} : memref<16x128xf32, #tpu.memory_space<vmem>>, vector<8x128xf32>,
    return
  }
  func.func @transform_0(%arg0: i32) -> (i32, i32) {
    %c0_i32 = arith.constant 0 : i32
    %c0_i32_0 = arith.constant 0 : i32
    return %c0_i32, %arg0 : i32, i32
  }
  func.func @transform_1(%arg0: i32) -> (i32, i32) {
    %c0_i32 = arith.constant 0 : i32
    %c0_i32_0 = arith.constant 0 : i32
    %c0_i32_1 = arith.constant 0 : i32
    return %c0_i32, %c0_i32_0 : i32, i32
  }
}

module attributes {stable_mosaic.version = 11 : i64} {
  func.func @_bn_relu_kernel(%arg0: i32, %arg1: memref<8x384xf32, #tpu.memory_space<vmem>>, %arg2: memref<8x2xf32, #tpu.memory_space<vmem>>, %arg3: memref<1x384xf32, #tpu.memory_space<vmem>>, %arg4: memref<9x384xbf16, #tpu.memory_space<vmem>>) attributes {dimension_semantics = [#tpu.dimension_semantics<parallel>], iteration_bounds = array<i64: 2>, scalar_prefetch = 0 : i64, scratch_operands = 0 : i64, tpu.core_type = #tpu.core_type<tc>, window_params = [{transform_indices = @transform_0, window_bounds = array<i64: 8, 384>}, {pipeline_mode = #tpu.pipeline_mode<synchronous>, transform_indices = @transform_1, window_bounds = array<i64: 8, 2>}, {pipeline_mode = #tpu.pipeline_mode<synchronous>, transform_indices = @transform_2, window_bounds = array<i64: 1, 384>}, {transform_indices = @transform_3, window_bounds = array<i64: 9, 384>}]} {
    %c0 = arith.constant 0 : index
    %c0_0 = arith.constant 0 : index
    %0 = vector.load %arg1[%c0, %c0_0] : memref<8x384xf32, #tpu.memory_space<vmem>>, vector<8x384xf32>
    %c0_1 = arith.constant 0 : index
    %c0_2 = arith.constant 0 : index
    %1 = vector.load %arg2[%c0_1, %c0_2] : memref<8x2xf32, #tpu.memory_space<vmem>>, vector<8x1xf32>
    %c0_3 = arith.constant 0 : index
    %c1 = arith.constant 1 : index
    %2 = vector.load %arg2[%c0_3, %c1] : memref<8x2xf32, #tpu.memory_space<vmem>>, vector<8x1xf32>
    %3 = arith.mulf %0, %0 : vector<8x384xf32>
    %cst = arith.constant dense<0.000000e+00> : vector<384xf32>
    %4 = vector.multi_reduction <add>, %3, %cst [0] : vector<8x384xf32> to vector<384xf32>
    %5 = vector.shape_cast %4 : vector<384xf32> to vector<1x384xf32>
    %cst_4 = arith.constant 1.000000e-30 : f32
    %6 = vector.broadcast %cst_4 : f32 to vector<1x384xf32>
    %7 = arith.maximumf %5, %6 : vector<1x384xf32>
    %8 = math.sqrt %7 : vector<1x384xf32>
    %cst_5 = arith.constant 1.000000e+00 : f32
    %9 = vector.broadcast %cst_5 : f32 to vector<1x384xf32>
    %10 = arith.mulf %9, %8 : vector<1x384xf32>
    %11 = arith.mulf %10, %10 : vector<1x384xf32>
    %cst_6 = arith.constant 1.000000e+00 : f32
    %12 = vector.broadcast %cst_6 : f32 to vector<1x384xf32>
    %13 = arith.addf %11, %12 : vector<1x384xf32>
    %14 = math.sqrt %13 : vector<1x384xf32>
    %15 = arith.addf %10, %14 : vector<1x384xf32>
    %16 = math.log %15 : vector<1x384xf32>
    %cst_7 = arith.constant 1.000000e+00 : f32
    %17 = vector.broadcast %cst_7 : f32 to vector<1x384xf32>
    %18 = arith.mulf %16, %17 : vector<1x384xf32>
    %19 = math.rsqrt %7 : vector<1x384xf32>
    %20 = arith.mulf %18, %19 : vector<1x384xf32>
    %21 = vector.broadcast %20 : vector<1x384xf32> to vector<8x384xf32>
    %22 = arith.mulf %0, %21 : vector<8x384xf32>
    %23 = vector.broadcast %1 : vector<8x1xf32> to vector<8x384xf32>
    %24 = arith.mulf %22, %23 : vector<8x384xf32>
    %25 = vector.broadcast %2 : vector<8x1xf32> to vector<8x384xf32>
    %26 = arith.addf %24, %25 : vector<8x384xf32>
    %27 = arith.mulf %26, %26 : vector<8x384xf32>
    %cst_8 = arith.constant dense<0.000000e+00> : vector<384xf32>
    %28 = vector.multi_reduction <add>, %27, %cst_8 [0] : vector<8x384xf32> to vector<384xf32>
    %29 = vector.shape_cast %28 : vector<384xf32> to vector<1x384xf32>
    %cst_9 = arith.constant 1.000000e-30 : f32
    %30 = vector.broadcast %cst_9 : f32 to vector<1x384xf32>
    %31 = arith.maximumf %29, %30 : vector<1x384xf32>
    %32 = math.sqrt %31 : vector<1x384xf32>
    %cst_10 = arith.constant 1.000000e+00 : f32
    %33 = vector.broadcast %cst_10 : f32 to vector<1x384xf32>
    %34 = arith.mulf %33, %32 : vector<1x384xf32>
    %cst_11 = arith.constant 3.200000e+01 : f32
    %35 = vector.broadcast %cst_11 : f32 to vector<1x384xf32>
    %36 = arith.minimumf %34, %35 : vector<1x384xf32>
    %37 = math.exp %36 : vector<1x384xf32>
    %cst_12 = arith.constant 0.000000e+00 : f32
    %38 = vector.broadcast %cst_12 : f32 to vector<1x384xf32>
    %39 = arith.subf %38, %36 : vector<1x384xf32>
    %40 = math.exp %39 : vector<1x384xf32>
    %41 = arith.subf %37, %40 : vector<1x384xf32>
    %cst_13 = arith.constant 5.000000e-01 : f32
    %42 = vector.broadcast %cst_13 : f32 to vector<1x384xf32>
    %43 = arith.mulf %42, %41 : vector<1x384xf32>
    %cst_14 = arith.constant 9.99999974E-5 : f32
    %44 = vector.broadcast %cst_14 : f32 to vector<1x384xf32>
    %45 = arith.cmpf olt, %36, %44 : vector<1x384xf32>
    %46 = tpu.reciprocal %36 {approx = true} : vector<1x384xf32> -> vector<1x384xf32>
    %47 = arith.mulf %43, %46 : vector<1x384xf32>
    %cst_15 = arith.constant 1.000000e+00 : f32
    %48 = vector.broadcast %cst_15 : f32 to vector<1x384xf32>
    %49 = arith.select %45, %48, %47 : vector<1x384xi1>, vector<1x384xf32>
    %50 = vector.broadcast %49 : vector<1x384xf32> to vector<8x384xf32>
    %51 = arith.mulf %26, %50 : vector<8x384xf32>
    %cst_16 = arith.constant 0.000000e+00 : f32
    %52 = vector.broadcast %cst_16 : f32 to vector<8x384xf32>
    %53 = arith.maximumf %51, %52 : vector<8x384xf32>
    %54 = arith.mulf %53, %53 : vector<8x384xf32>
    %cst_17 = arith.constant dense<0.000000e+00> : vector<384xf32>
    %55 = vector.multi_reduction <add>, %54, %cst_17 [0] : vector<8x384xf32> to vector<384xf32>
    %56 = vector.shape_cast %55 : vector<384xf32> to vector<1x384xf32>
    %cst_18 = arith.constant 1.000000e+00 : f32
    %57 = vector.broadcast %cst_18 : f32 to vector<1x384xf32>
    %58 = arith.addf %57, %56 : vector<1x384xf32>
    %59 = math.sqrt %58 : vector<1x384xf32>
    %c0_19 = arith.constant 0 : index
    %c0_20 = arith.constant 0 : index
    %60 = vector.load %arg3[%c0_19, %c0_20] : memref<1x384xf32, #tpu.memory_space<vmem>>, vector<1x384xf32>
    %61 = arith.mulf %59, %60 : vector<1x384xf32>
    %62 = arith.truncf %61 : vector<1x384xf32> to vector<1x384xbf16>
    %c0_21 = arith.constant 0 : index
    %c0_22 = arith.constant 0 : index
    %63 = vector.load %arg4[%c0_21, %c0_22] : memref<9x384xbf16, #tpu.memory_space<vmem>>, vector<1x384xbf16>
    tpu.vector_store %arg4[%c0_21, %c0_22], %62 {strides = array<i32>} : memref<9x384xbf16, #tpu.memory_space<vmem>>, vector<1x384xbf16>,
    %64 = vector.broadcast %60 : vector<1x384xf32> to vector<8x384xf32>
    %65 = arith.mulf %53, %64 : vector<8x384xf32>
    %66 = arith.truncf %65 : vector<8x384xf32> to vector<8x384xbf16>
    %c1_23 = arith.constant 1 : index
    %c0_24 = arith.constant 0 : index
    %67 = vector.load %arg4[%c1_23, %c0_24] : memref<9x384xbf16, #tpu.memory_space<vmem>>, vector<8x384xbf16>
    tpu.vector_store %arg4[%c1_23, %c0_24], %66 {strides = array<i32>} : memref<9x384xbf16, #tpu.memory_space<vmem>>, vector<8x384xbf16>,
    return
  }
  func.func @transform_0(%arg0: i32) -> (i32, i32) {
    %c0_i32 = arith.constant 0 : i32
    %c0_i32_0 = arith.constant 0 : i32
    return %c0_i32, %arg0 : i32, i32
  }
  func.func @transform_1(%arg0: i32) -> (i32, i32) {
    %c0_i32 = arith.constant 0 : i32
    %c0_i32_0 = arith.constant 0 : i32
    %c0_i32_1 = arith.constant 0 : i32
    return %c0_i32, %c0_i32_0 : i32, i32
  }
  func.func @transform_2(%arg0: i32) -> (i32, i32) {
    %c0_i32 = arith.constant 0 : i32
    %c0_i32_0 = arith.constant 0 : i32
    %c0_i32_1 = arith.constant 0 : i32
    return %c0_i32, %c0_i32_0 : i32, i32
  }
  func.func @transform_3(%arg0: i32) -> (i32, i32) {
    %c0_i32 = arith.constant 0 : i32
    %c0_i32_0 = arith.constant 0 : i32
    return %c0_i32, %arg0 : i32, i32
  }
}

module attributes {stable_mosaic.version = 11 : i64} {
  func.func @_bn_residual_relu_kernel(%arg0: i32, %arg1: memref<8x384xf32, #tpu.memory_space<vmem>>, %arg2: memref<8x384xf32, #tpu.memory_space<vmem>>, %arg3: memref<8x2xf32, #tpu.memory_space<vmem>>, %arg4: memref<8x2xf32, #tpu.memory_space<vmem>>, %arg5: memref<1x384xf32, #tpu.memory_space<vmem>>, %arg6: memref<9x384xf32, #tpu.memory_space<vmem>>) attributes {dimension_semantics = [#tpu.dimension_semantics<parallel>], iteration_bounds = array<i64: 2>, scalar_prefetch = 0 : i64, scratch_operands = 0 : i64, tpu.core_type = #tpu.core_type<tc>, window_params = [{transform_indices = @transform_0, window_bounds = array<i64: 8, 384>}, {transform_indices = @transform_1, window_bounds = array<i64: 8, 384>}, {pipeline_mode = #tpu.pipeline_mode<synchronous>, transform_indices = @transform_2, window_bounds = array<i64: 8, 2>}, {pipeline_mode = #tpu.pipeline_mode<synchronous>, transform_indices = @transform_3, window_bounds = array<i64: 8, 2>}, {pipeline_mode = #tpu.pipeline_mode<synchronous>, transform_indices = @transform_4, window_bounds = array<i64: 1, 384>}, {transform_indices = @transform_5, window_bounds = array<i64: 9, 384>}]} {
    %c0 = arith.constant 0 : index
    %c0_0 = arith.constant 0 : index
    %0 = vector.load %arg1[%c0, %c0_0] : memref<8x384xf32, #tpu.memory_space<vmem>>, vector<8x384xf32>
    %c0_1 = arith.constant 0 : index
    %c0_2 = arith.constant 0 : index
    %1 = vector.load %arg3[%c0_1, %c0_2] : memref<8x2xf32, #tpu.memory_space<vmem>>, vector<8x1xf32>
    %c0_3 = arith.constant 0 : index
    %c1 = arith.constant 1 : index
    %2 = vector.load %arg3[%c0_3, %c1] : memref<8x2xf32, #tpu.memory_space<vmem>>, vector<8x1xf32>
    %3 = arith.mulf %0, %0 : vector<8x384xf32>
    %cst = arith.constant dense<0.000000e+00> : vector<384xf32>
    %4 = vector.multi_reduction <add>, %3, %cst [0] : vector<8x384xf32> to vector<384xf32>
    %5 = vector.shape_cast %4 : vector<384xf32> to vector<1x384xf32>
    %cst_4 = arith.constant 1.000000e-30 : f32
    %6 = vector.broadcast %cst_4 : f32 to vector<1x384xf32>
    %7 = arith.maximumf %5, %6 : vector<1x384xf32>
    %8 = math.sqrt %7 : vector<1x384xf32>
    %cst_5 = arith.constant 1.000000e+00 : f32
    %9 = vector.broadcast %cst_5 : f32 to vector<1x384xf32>
    %10 = arith.mulf %9, %8 : vector<1x384xf32>
    %11 = arith.mulf %10, %10 : vector<1x384xf32>
    %cst_6 = arith.constant 1.000000e+00 : f32
    %12 = vector.broadcast %cst_6 : f32 to vector<1x384xf32>
    %13 = arith.addf %11, %12 : vector<1x384xf32>
    %14 = math.sqrt %13 : vector<1x384xf32>
    %15 = arith.addf %10, %14 : vector<1x384xf32>
    %16 = math.log %15 : vector<1x384xf32>
    %cst_7 = arith.constant 1.000000e+00 : f32
    %17 = vector.broadcast %cst_7 : f32 to vector<1x384xf32>
    %18 = arith.mulf %16, %17 : vector<1x384xf32>
    %19 = math.rsqrt %7 : vector<1x384xf32>
    %20 = arith.mulf %18, %19 : vector<1x384xf32>
    %21 = vector.broadcast %20 : vector<1x384xf32> to vector<8x384xf32>
    %22 = arith.mulf %0, %21 : vector<8x384xf32>
    %23 = vector.broadcast %1 : vector<8x1xf32> to vector<8x384xf32>
    %24 = arith.mulf %22, %23 : vector<8x384xf32>
    %25 = vector.broadcast %2 : vector<8x1xf32> to vector<8x384xf32>
    %26 = arith.addf %24, %25 : vector<8x384xf32>
    %27 = arith.mulf %26, %26 : vector<8x384xf32>
    %cst_8 = arith.constant dense<0.000000e+00> : vector<384xf32>
    %28 = vector.multi_reduction <add>, %27, %cst_8 [0] : vector<8x384xf32> to vector<384xf32>
    %29 = vector.shape_cast %28 : vector<384xf32> to vector<1x384xf32>
    %cst_9 = arith.constant 1.000000e-30 : f32
    %30 = vector.broadcast %cst_9 : f32 to vector<1x384xf32>
    %31 = arith.maximumf %29, %30 : vector<1x384xf32>
    %32 = math.sqrt %31 : vector<1x384xf32>
    %cst_10 = arith.constant 1.000000e+00 : f32
    %33 = vector.broadcast %cst_10 : f32 to vector<1x384xf32>
    %34 = arith.mulf %33, %32 : vector<1x384xf32>
    %cst_11 = arith.constant 3.200000e+01 : f32
    %35 = vector.broadcast %cst_11 : f32 to vector<1x384xf32>
    %36 = arith.minimumf %34, %35 : vector<1x384xf32>
    %37 = math.exp %36 : vector<1x384xf32>
    %cst_12 = arith.constant 0.000000e+00 : f32
    %38 = vector.broadcast %cst_12 : f32 to vector<1x384xf32>
    %39 = arith.subf %38, %36 : vector<1x384xf32>
    %40 = math.exp %39 : vector<1x384xf32>
    %41 = arith.subf %37, %40 : vector<1x384xf32>
    %cst_13 = arith.constant 5.000000e-01 : f32
    %42 = vector.broadcast %cst_13 : f32 to vector<1x384xf32>
    %43 = arith.mulf %42, %41 : vector<1x384xf32>
    %cst_14 = arith.constant 9.99999974E-5 : f32
    %44 = vector.broadcast %cst_14 : f32 to vector<1x384xf32>
    %45 = arith.cmpf olt, %36, %44 : vector<1x384xf32>
    %46 = tpu.reciprocal %36 {approx = true} : vector<1x384xf32> -> vector<1x384xf32>
    %47 = arith.mulf %43, %46 : vector<1x384xf32>
    %cst_15 = arith.constant 1.000000e+00 : f32
    %48 = vector.broadcast %cst_15 : f32 to vector<1x384xf32>
    %49 = arith.select %45, %48, %47 : vector<1x384xi1>, vector<1x384xf32>
    %50 = vector.broadcast %49 : vector<1x384xf32> to vector<8x384xf32>
    %51 = arith.mulf %26, %50 : vector<8x384xf32>
    %c0_16 = arith.constant 0 : index
    %c0_17 = arith.constant 0 : index
    %52 = vector.load %arg2[%c0_16, %c0_17] : memref<8x384xf32, #tpu.memory_space<vmem>>, vector<8x384xf32>
    %c0_18 = arith.constant 0 : index
    %c0_19 = arith.constant 0 : index
    %53 = vector.load %arg4[%c0_18, %c0_19] : memref<8x2xf32, #tpu.memory_space<vmem>>, vector<8x1xf32>
    %c0_20 = arith.constant 0 : index
    %c1_21 = arith.constant 1 : index
    %54 = vector.load %arg4[%c0_20, %c1_21] : memref<8x2xf32, #tpu.memory_space<vmem>>, vector<8x1xf32>
    %55 = arith.mulf %52, %52 : vector<8x384xf32>
    %cst_22 = arith.constant dense<0.000000e+00> : vector<384xf32>
    %56 = vector.multi_reduction <add>, %55, %cst_22 [0] : vector<8x384xf32> to vector<384xf32>
    %57 = vector.shape_cast %56 : vector<384xf32> to vector<1x384xf32>
    %cst_23 = arith.constant 1.000000e-30 : f32
    %58 = vector.broadcast %cst_23 : f32 to vector<1x384xf32>
    %59 = arith.maximumf %57, %58 : vector<1x384xf32>
    %60 = math.sqrt %59 : vector<1x384xf32>
    %cst_24 = arith.constant 1.000000e+00 : f32
    %61 = vector.broadcast %cst_24 : f32 to vector<1x384xf32>
    %62 = arith.mulf %61, %60 : vector<1x384xf32>
    %63 = arith.mulf %62, %62 : vector<1x384xf32>
    %cst_25 = arith.constant 1.000000e+00 : f32
    %64 = vector.broadcast %cst_25 : f32 to vector<1x384xf32>
    %65 = arith.addf %63, %64 : vector<1x384xf32>
    %66 = math.sqrt %65 : vector<1x384xf32>
    %67 = arith.addf %62, %66 : vector<1x384xf32>
    %68 = math.log %67 : vector<1x384xf32>
    %cst_26 = arith.constant 1.000000e+00 : f32
    %69 = vector.broadcast %cst_26 : f32 to vector<1x384xf32>
    %70 = arith.mulf %68, %69 : vector<1x384xf32>
    %71 = math.rsqrt %59 : vector<1x384xf32>
    %72 = arith.mulf %70, %71 : vector<1x384xf32>
    %73 = vector.broadcast %72 : vector<1x384xf32> to vector<8x384xf32>
    %74 = arith.mulf %52, %73 : vector<8x384xf32>
    %75 = vector.broadcast %53 : vector<8x1xf32> to vector<8x384xf32>
    %76 = arith.mulf %74, %75 : vector<8x384xf32>
    %77 = vector.broadcast %54 : vector<8x1xf32> to vector<8x384xf32>
    %78 = arith.addf %76, %77 : vector<8x384xf32>
    %79 = arith.mulf %78, %78 : vector<8x384xf32>
    %cst_27 = arith.constant dense<0.000000e+00> : vector<384xf32>
    %80 = vector.multi_reduction <add>, %79, %cst_27 [0] : vector<8x384xf32> to vector<384xf32>
    %81 = vector.shape_cast %80 : vector<384xf32> to vector<1x384xf32>
    %cst_28 = arith.constant 1.000000e-30 : f32
    %82 = vector.broadcast %cst_28 : f32 to vector<1x384xf32>
    %83 = arith.maximumf %81, %82 : vector<1x384xf32>
    %84 = math.sqrt %83 : vector<1x384xf32>
    %cst_29 = arith.constant 1.000000e+00 : f32
    %85 = vector.broadcast %cst_29 : f32 to vector<1x384xf32>
    %86 = arith.mulf %85, %84 : vector<1x384xf32>
    %cst_30 = arith.constant 3.200000e+01 : f32
    %87 = vector.broadcast %cst_30 : f32 to vector<1x384xf32>
    %88 = arith.minimumf %86, %87 : vector<1x384xf32>
    %89 = math.exp %88 : vector<1x384xf32>
    %cst_31 = arith.constant 0.000000e+00 : f32
    %90 = vector.broadcast %cst_31 : f32 to vector<1x384xf32>
    %91 = arith.subf %90, %88 : vector<1x384xf32>
    %92 = math.exp %91 : vector<1x384xf32>
    %93 = arith.subf %89, %92 : vector<1x384xf32>
    %cst_32 = arith.constant 5.000000e-01 : f32
    %94 = vector.broadcast %cst_32 : f32 to vector<1x384xf32>
    %95 = arith.mulf %94, %93 : vector<1x384xf32>
    %cst_33 = arith.constant 9.99999974E-5 : f32
    %96 = vector.broadcast %cst_33 : f32 to vector<1x384xf32>
    %97 = arith.cmpf olt, %88, %96 : vector<1x384xf32>
    %98 = tpu.reciprocal %88 {approx = true} : vector<1x384xf32> -> vector<1x384xf32>
    %99 = arith.mulf %95, %98 : vector<1x384xf32>
    %cst_34 = arith.constant 1.000000e+00 : f32
    %100 = vector.broadcast %cst_34 : f32 to vector<1x384xf32>
    %101 = arith.select %97, %100, %99 : vector<1x384xi1>, vector<1x384xf32>
    %102 = vector.broadcast %101 : vector<1x384xf32> to vector<8x384xf32>
    %103 = arith.mulf %78, %102 : vector<8x384xf32>
    %104 = arith.mulf %51, %51 : vector<8x384xf32>
    %cst_35 = arith.constant dense<0.000000e+00> : vector<384xf32>
    %105 = vector.multi_reduction <add>, %104, %cst_35 [0] : vector<8x384xf32> to vector<384xf32>
    %106 = vector.shape_cast %105 : vector<384xf32> to vector<1x384xf32>
    %cst_36 = arith.constant 1.000000e+00 : f32
    %107 = vector.broadcast %cst_36 : f32 to vector<1x384xf32>
    %108 = arith.addf %107, %106 : vector<1x384xf32>
    %109 = math.sqrt %108 : vector<1x384xf32>
    %110 = arith.mulf %103, %103 : vector<8x384xf32>
    %cst_37 = arith.constant dense<0.000000e+00> : vector<384xf32>
    %111 = vector.multi_reduction <add>, %110, %cst_37 [0] : vector<8x384xf32> to vector<384xf32>
    %112 = vector.shape_cast %111 : vector<384xf32> to vector<1x384xf32>
    %cst_38 = arith.constant 1.000000e+00 : f32
    %113 = vector.broadcast %cst_38 : f32 to vector<1x384xf32>
    %114 = arith.addf %113, %112 : vector<1x384xf32>
    %115 = math.sqrt %114 : vector<1x384xf32>
    %c0_39 = arith.constant 0 : index
    %c0_40 = arith.constant 0 : index
    %116 = vector.load %arg5[%c0_39, %c0_40] : memref<1x384xf32, #tpu.memory_space<vmem>>, vector<1x384xf32>
    %cst_41 = arith.constant 1.000000e+00 : f32
    %117 = vector.broadcast %cst_41 : f32 to vector<1x384xf32>
    %118 = arith.mulf %117, %115 : vector<1x384xf32>
    %119 = arith.addf %109, %118 : vector<1x384xf32>
    %cst_42 = arith.constant 1.000000e+00 : f32
    %120 = vector.broadcast %cst_42 : f32 to vector<8x384xf32>
    %121 = arith.mulf %120, %103 : vector<8x384xf32>
    %122 = arith.addf %51, %121 : vector<8x384xf32>
    %123 = arith.mulf %122, %122 : vector<8x384xf32>
    %cst_43 = arith.constant dense<0.000000e+00> : vector<384xf32>
    %124 = vector.multi_reduction <add>, %123, %cst_43 [0] : vector<8x384xf32> to vector<384xf32>
    %125 = vector.shape_cast %124 : vector<384xf32> to vector<1x384xf32>
    %126 = arith.mulf %119, %119 : vector<1x384xf32>
    %127 = arith.subf %125, %126 : vector<1x384xf32>
    %cst_44 = arith.constant 0.000000e+00 : f32
    %128 = vector.broadcast %cst_44 : f32 to vector<1x384xf32>
    %129 = arith.subf %128, %127 : vector<1x384xf32>
    %cst_45 = arith.constant 1.000000e+00 : f32
    %130 = vector.broadcast %cst_45 : f32 to vector<1x384xf32>
    %131 = arith.mulf %130, %129 : vector<1x384xf32>
    %cst_46 = arith.constant 1.000000e-30 : f32
    %132 = vector.broadcast %cst_46 : f32 to vector<1x384xf32>
    %133 = arith.maximumf %131, %132 : vector<1x384xf32>
    %134 = math.rsqrt %133 : vector<1x384xf32>
    %135 = vector.broadcast %134 : vector<1x384xf32> to vector<8x384xf32>
    %136 = arith.mulf %122, %135 : vector<8x384xf32>
    %cst_47 = arith.constant 0.000000e+00 : f32
    %137 = vector.broadcast %cst_47 : f32 to vector<8x384xf32>
    %138 = arith.maximumf %136, %137 : vector<8x384xf32>
    %139 = arith.mulf %138, %138 : vector<8x384xf32>
    %cst_48 = arith.constant dense<0.000000e+00> : vector<384xf32>
    %140 = vector.multi_reduction <add>, %139, %cst_48 [0] : vector<8x384xf32> to vector<384xf32>
    %141 = vector.shape_cast %140 : vector<384xf32> to vector<1x384xf32>
    %cst_49 = arith.constant 1.000000e+00 : f32
    %142 = vector.broadcast %cst_49 : f32 to vector<1x384xf32>
    %143 = arith.addf %142, %141 : vector<1x384xf32>
    %144 = math.sqrt %143 : vector<1x384xf32>
    %145 = arith.mulf %144, %116 : vector<1x384xf32>
    %c0_50 = arith.constant 0 : index
    %c0_51 = arith.constant 0 : index
    %146 = vector.load %arg6[%c0_50, %c0_51] : memref<9x384xf32, #tpu.memory_space<vmem>>, vector<1x384xf32>
    tpu.vector_store %arg6[%c0_50, %c0_51], %145 {strides = array<i32>} : memref<9x384xf32, #tpu.memory_space<vmem>>, vector<1x384xf32>,
    %147 = vector.broadcast %116 : vector<1x384xf32> to vector<8x384xf32>
    %148 = arith.mulf %138, %147 : vector<8x384xf32>
    %c1_52 = arith.constant 1 : index
    %c0_53 = arith.constant 0 : index
    %149 = vector.load %arg6[%c1_52, %c0_53] : memref<9x384xf32, #tpu.memory_space<vmem>>, vector<8x384xf32>
    tpu.vector_store %arg6[%c1_52, %c0_53], %148 {strides = array<i32>} : memref<9x384xf32, #tpu.memory_space<vmem>>, vector<8x384xf32>,
    return
  }
  func.func @transform_0(%arg0: i32) -> (i32, i32) {
    %c0_i32 = arith.constant 0 : i32
    %c0_i32_0 = arith.constant 0 : i32
    return %c0_i32, %arg0 : i32, i32
  }
  func.func @transform_1(%arg0: i32) -> (i32, i32) {
    %c0_i32 = arith.constant 0 : i32
    %c0_i32_0 = arith.constant 0 : i32
    return %c0_i32, %arg0 : i32, i32
  }
  func.func @transform_2(%arg0: i32) -> (i32, i32) {
    %c0_i32 = arith.constant 0 : i32
    %c0_i32_0 = arith.constant 0 : i32
    %c0_i32_1 = arith.constant 0 : i32
    return %c0_i32, %c0_i32_0 : i32, i32
  }
  func.func @transform_3(%arg0: i32) -> (i32, i32) {
    %c0_i32 = arith.constant 0 : i32
    %c0_i32_0 = arith.constant 0 : i32
    %c0_i32_1 = arith.constant 0 : i32
    return %c0_i32, %c0_i32_0 : i32, i32
  }
  func.func @transform_4(%arg0: i32) -> (i32, i32) {
    %c0_i32 = arith.constant 0 : i32
    %c0_i32_0 = arith.constant 0 : i32
    %c0_i32_1 = arith.constant 0 : i32
    return %c0_i32, %c0_i32_0 : i32, i32
  }
  func.func @transform_5(%arg0: i32) -> (i32, i32) {
    %c0_i32 = arith.constant 0 : i32
    %c0_i32_0 = arith.constant 0 : i32
    return %c0_i32, %arg0 : i32, i32
  }
}

module attributes {stable_mosaic.version = 11 : i64} {
  func.func @_lorentz_conv_kernel(%arg0: i32, %arg1: memref<9x384xbf16, #tpu.memory_space<vmem>>, %arg2: memref<9x8x9xbf16, #tpu.memory_space<vmem>>, %arg3: memref<8x1xf32, #tpu.memory_space<vmem>>, %arg4: memref<1x384xf32, #tpu.memory_space<vmem>>, %arg5: memref<8x384xf32, #tpu.memory_space<vmem>>, %arg6: memref<9x640xbf16, #tpu.memory_space<vmem>>) attributes {dimension_semantics = [#tpu.dimension_semantics<parallel>], iteration_bounds = array<i64: 2>, scalar_prefetch = 0 : i64, scratch_operands = 1 : i64, tpu.core_type = #tpu.core_type<tc>, window_params = [{transform_indices = @transform_0, window_bounds = array<i64: 9, 384>}, {pipeline_mode = #tpu.pipeline_mode<synchronous>, transform_indices = @transform_1, window_bounds = array<i64: 9, 8, 9>}, {pipeline_mode = #tpu.pipeline_mode<synchronous>, transform_indices = @transform_2, window_bounds = array<i64: 8, 1>}, {pipeline_mode = #tpu.pipeline_mode<synchronous>, transform_indices = @transform_3, window_bounds = array<i64: 1, 384>}, {transform_indices = @transform_4, window_bounds = array<i64: 8, 384>}]} {
    %c0 = arith.constant 0 : index
    %c0_0 = arith.constant 0 : index
    %0 = vector.load %arg1[%c0, %c0_0] : memref<9x384xbf16, #tpu.memory_space<vmem>>, vector<9x384xbf16>
    %c0_1 = arith.constant 0 : index
    %c128 = arith.constant 128 : index
    %1 = vector.load %arg6[%c0_1, %c128] : memref<9x640xbf16, #tpu.memory_space<vmem>>, vector<9x384xbf16>
    tpu.vector_store %arg6[%c0_1, %c128], %0 {strides = array<i32>} : memref<9x640xbf16, #tpu.memory_space<vmem>>, vector<9x384xbf16>,
    %c0_2 = arith.constant 0 : index
    %c109 = arith.constant 109 : index
    %2 = vector.load %arg6[%c0_2, %c109] : memref<9x640xbf16, #tpu.memory_space<vmem>>, vector<9x384xbf16>
    %c0_3 = arith.constant 0 : index
    %c0_4 = arith.constant 0 : index
    %c0_5 = arith.constant 0 : index
    %3 = vector.load %arg2[%c0_3, %c0_4, %c0_5] : memref<9x8x9xbf16, #tpu.memory_space<vmem>>, vector<1x8x9xbf16>
    %4 = vector.shape_cast %3 : vector<1x8x9xbf16> to vector<8x9xbf16>
    %cst = arith.constant dense<0.000000e+00> : vector<8x384xf32>
    %5 = tpu.matmul %4, %2, %cst {dimension_numbers = #tpu.dot_dimension_numbers<[1], [0], [0], [1], [0, 0, 1, 1], [], []>} : vector<8x9xbf16>, vector<9x384xbf16>, vector<8x384xf32> -> vector<8x384xf32>
    %c0_6 = arith.constant 0 : index
    %c110 = arith.constant 110 : index
    %6 = vector.load %arg6[%c0_6, %c110] : memref<9x640xbf16, #tpu.memory_space<vmem>>, vector<9x384xbf16>
    %c1 = arith.constant 1 : index
    %c0_7 = arith.constant 0 : index
    %c0_8 = arith.constant 0 : index
    %7 = vector.load %arg2[%c1, %c0_7, %c0_8] : memref<9x8x9xbf16, #tpu.memory_space<vmem>>, vector<1x8x9xbf16>
    %8 = vector.shape_cast %7 : vector<1x8x9xbf16> to vector<8x9xbf16>
    %cst_9 = arith.constant dense<0.000000e+00> : vector<8x384xf32>
    %9 = tpu.matmul %8, %6, %cst_9 {dimension_numbers = #tpu.dot_dimension_numbers<[1], [0], [0], [1], [0, 0, 1, 1], [], []>} : vector<8x9xbf16>, vector<9x384xbf16>, vector<8x384xf32> -> vector<8x384xf32>
    %10 = arith.addf %5, %9 : vector<8x384xf32>
    %c0_10 = arith.constant 0 : index
    %c111 = arith.constant 111 : index
    %11 = vector.load %arg6[%c0_10, %c111] : memref<9x640xbf16, #tpu.memory_space<vmem>>, vector<9x384xbf16>
    %c2 = arith.constant 2 : index
    %c0_11 = arith.constant 0 : index
    %c0_12 = arith.constant 0 : index
    %12 = vector.load %arg2[%c2, %c0_11, %c0_12] : memref<9x8x9xbf16, #tpu.memory_space<vmem>>, vector<1x8x9xbf16>
    %13 = vector.shape_cast %12 : vector<1x8x9xbf16> to vector<8x9xbf16>
    %cst_13 = arith.constant dense<0.000000e+00> : vector<8x384xf32>
    %14 = tpu.matmul %13, %11, %cst_13 {dimension_numbers = #tpu.dot_dimension_numbers<[1], [0], [0], [1], [0, 0, 1, 1], [], []>} : vector<8x9xbf16>, vector<9x384xbf16>, vector<8x384xf32> -> vector<8x384xf32>
    %15 = arith.addf %10, %14 : vector<8x384xf32>
    %c0_14 = arith.constant 0 : index
    %c127 = arith.constant 127 : index
    %16 = vector.load %arg6[%c0_14, %c127] : memref<9x640xbf16, #tpu.memory_space<vmem>>, vector<9x384xbf16>
    %c3 = arith.constant 3 : index
    %c0_15 = arith.constant 0 : index
    %c0_16 = arith.constant 0 : index
    %17 = vector.load %arg2[%c3, %c0_15, %c0_16] : memref<9x8x9xbf16, #tpu.memory_space<vmem>>, vector<1x8x9xbf16>
    %18 = vector.shape_cast %17 : vector<1x8x9xbf16> to vector<8x9xbf16>
    %cst_17 = arith.constant dense<0.000000e+00> : vector<8x384xf32>
    %19 = tpu.matmul %18, %16, %cst_17 {dimension_numbers = #tpu.dot_dimension_numbers<[1], [0], [0], [1], [0, 0, 1, 1], [], []>} : vector<8x9xbf16>, vector<9x384xbf16>, vector<8x384xf32> -> vector<8x384xf32>
    %20 = arith.addf %15, %19 : vector<8x384xf32>
    %c0_18 = arith.constant 0 : index
    %c128_19 = arith.constant 128 : index
    %21 = vector.load %arg6[%c0_18, %c128_19] : memref<9x640xbf16, #tpu.memory_space<vmem>>, vector<9x384xbf16>
    %c4 = arith.constant 4 : index
    %c0_20 = arith.constant 0 : index
    %c0_21 = arith.constant 0 : index
    %22 = vector.load %arg2[%c4, %c0_20, %c0_21] : memref<9x8x9xbf16, #tpu.memory_space<vmem>>, vector<1x8x9xbf16>
    %23 = vector.shape_cast %22 : vector<1x8x9xbf16> to vector<8x9xbf16>
    %cst_22 = arith.constant dense<0.000000e+00> : vector<8x384xf32>
    %24 = tpu.matmul %23, %21, %cst_22 {dimension_numbers = #tpu.dot_dimension_numbers<[1], [0], [0], [1], [0, 0, 1, 1], [], []>} : vector<8x9xbf16>, vector<9x384xbf16>, vector<8x384xf32> -> vector<8x384xf32>
    %25 = arith.addf %20, %24 : vector<8x384xf32>
    %c0_23 = arith.constant 0 : index
    %c129 = arith.constant 129 : index
    %26 = vector.load %arg6[%c0_23, %c129] : memref<9x640xbf16, #tpu.memory_space<vmem>>, vector<9x384xbf16>
    %c5 = arith.constant 5 : index
    %c0_24 = arith.constant 0 : index
    %c0_25 = arith.constant 0 : index
    %27 = vector.load %arg2[%c5, %c0_24, %c0_25] : memref<9x8x9xbf16, #tpu.memory_space<vmem>>, vector<1x8x9xbf16>
    %28 = vector.shape_cast %27 : vector<1x8x9xbf16> to vector<8x9xbf16>
    %cst_26 = arith.constant dense<0.000000e+00> : vector<8x384xf32>
    %29 = tpu.matmul %28, %26, %cst_26 {dimension_numbers = #tpu.dot_dimension_numbers<[1], [0], [0], [1], [0, 0, 1, 1], [], []>} : vector<8x9xbf16>, vector<9x384xbf16>, vector<8x384xf32> -> vector<8x384xf32>
    %30 = arith.addf %25, %29 : vector<8x384xf32>
    %c0_27 = arith.constant 0 : index
    %c145 = arith.constant 145 : index
    %31 = vector.load %arg6[%c0_27, %c145] : memref<9x640xbf16, #tpu.memory_space<vmem>>, vector<9x384xbf16>
    %c6 = arith.constant 6 : index
    %c0_28 = arith.constant 0 : index
    %c0_29 = arith.constant 0 : index
    %32 = vector.load %arg2[%c6, %c0_28, %c0_29] : memref<9x8x9xbf16, #tpu.memory_space<vmem>>, vector<1x8x9xbf16>
    %33 = vector.shape_cast %32 : vector<1x8x9xbf16> to vector<8x9xbf16>
    %cst_30 = arith.constant dense<0.000000e+00> : vector<8x384xf32>
    %34 = tpu.matmul %33, %31, %cst_30 {dimension_numbers = #tpu.dot_dimension_numbers<[1], [0], [0], [1], [0, 0, 1, 1], [], []>} : vector<8x9xbf16>, vector<9x384xbf16>, vector<8x384xf32> -> vector<8x384xf32>
    %35 = arith.addf %30, %34 : vector<8x384xf32>
    %c0_31 = arith.constant 0 : index
    %c146 = arith.constant 146 : index
    %36 = vector.load %arg6[%c0_31, %c146] : memref<9x640xbf16, #tpu.memory_space<vmem>>, vector<9x384xbf16>
    %c7 = arith.constant 7 : index
    %c0_32 = arith.constant 0 : index
    %c0_33 = arith.constant 0 : index
    %37 = vector.load %arg2[%c7, %c0_32, %c0_33] : memref<9x8x9xbf16, #tpu.memory_space<vmem>>, vector<1x8x9xbf16>
    %38 = vector.shape_cast %37 : vector<1x8x9xbf16> to vector<8x9xbf16>
    %cst_34 = arith.constant dense<0.000000e+00> : vector<8x384xf32>
    %39 = tpu.matmul %38, %36, %cst_34 {dimension_numbers = #tpu.dot_dimension_numbers<[1], [0], [0], [1], [0, 0, 1, 1], [], []>} : vector<8x9xbf16>, vector<9x384xbf16>, vector<8x384xf32> -> vector<8x384xf32>
    %40 = arith.addf %35, %39 : vector<8x384xf32>
    %c0_35 = arith.constant 0 : index
    %c147 = arith.constant 147 : index
    %41 = vector.load %arg6[%c0_35, %c147] : memref<9x640xbf16, #tpu.memory_space<vmem>>, vector<9x384xbf16>
    %c8 = arith.constant 8 : index
    %c0_36 = arith.constant 0 : index
    %c0_37 = arith.constant 0 : index
    %42 = vector.load %arg2[%c8, %c0_36, %c0_37] : memref<9x8x9xbf16, #tpu.memory_space<vmem>>, vector<1x8x9xbf16>
    %43 = vector.shape_cast %42 : vector<1x8x9xbf16> to vector<8x9xbf16>
    %cst_38 = arith.constant dense<0.000000e+00> : vector<8x384xf32>
    %44 = tpu.matmul %43, %41, %cst_38 {dimension_numbers = #tpu.dot_dimension_numbers<[1], [0], [0], [1], [0, 0, 1, 1], [], []>} : vector<8x9xbf16>, vector<9x384xbf16>, vector<8x384xf32> -> vector<8x384xf32>
    %45 = arith.addf %40, %44 : vector<8x384xf32>
    %c0_39 = arith.constant 0 : index
    %c0_40 = arith.constant 0 : index
    %46 = vector.load %arg3[%c0_39, %c0_40] : memref<8x1xf32, #tpu.memory_space<vmem>>, vector<8x1xf32>
    %47 = vector.broadcast %46 : vector<8x1xf32> to vector<8x384xf32>
    %48 = arith.addf %45, %47 : vector<8x384xf32>
    %c0_41 = arith.constant 0 : index
    %c0_42 = arith.constant 0 : index
    %49 = vector.load %arg4[%c0_41, %c0_42] : memref<1x384xf32, #tpu.memory_space<vmem>>, vector<1x384xf32>
    %cst_43 = arith.constant 0.000000e+00 : f32
    %50 = vector.broadcast %cst_43 : f32 to vector<1x384xf32>
    %51 = arith.cmpf one, %49, %50 : vector<1x384xf32>
    %cst_44 = arith.constant 0.000000e+00 : f32
    %52 = vector.shape_cast %51 : vector<1x384xi1> to vector<1x384xi1>
    %53 = vector.broadcast %52 : vector<1x384xi1> to vector<8x384xi1>
    %54 = vector.broadcast %cst_44 : f32 to vector<8x384xf32>
    %55 = arith.select %53, %48, %54 : vector<8x384xi1>, vector<8x384xf32>
    %c0_45 = arith.constant 0 : index
    %c0_46 = arith.constant 0 : index
    %56 = vector.load %arg5[%c0_45, %c0_46] : memref<8x384xf32, #tpu.memory_space<vmem>>, vector<8x384xf32>
    tpu.vector_store %arg5[%c0_45, %c0_46], %55 {strides = array<i32>} : memref<8x384xf32, #tpu.memory_space<vmem>>, vector<8x384xf32>,
    return
  }
  func.func @transform_0(%arg0: i32) -> (i32, i32) {
    %c0_i32 = arith.constant 0 : i32
    %c0_i32_0 = arith.constant 0 : i32
    return %c0_i32, %arg0 : i32, i32
  }
  func.func @transform_1(%arg0: i32) -> (i32, i32, i32) {
    %c0_i32 = arith.constant 0 : i32
    %c0_i32_0 = arith.constant 0 : i32
    %c0_i32_1 = arith.constant 0 : i32
    %c0_i32_2 = arith.constant 0 : i32
    return %c0_i32, %c0_i32_0, %c0_i32_1 : i32, i32, i32
  }
  func.func @transform_2(%arg0: i32) -> (i32, i32) {
    %c0_i32 = arith.constant 0 : i32
    %c0_i32_0 = arith.constant 0 : i32
    %c0_i32_1 = arith.constant 0 : i32
    return %c0_i32, %c0_i32_0 : i32, i32
  }
  func.func @transform_3(%arg0: i32) -> (i32, i32) {
    %c0_i32 = arith.constant 0 : i32
    %c0_i32_0 = arith.constant 0 : i32
    %c0_i32_1 = arith.constant 0 : i32
    return %c0_i32, %c0_i32_0 : i32, i32
  }
  func.func @transform_4(%arg0: i32) -> (i32, i32) {
    %c0_i32 = arith.constant 0 : i32
    %c0_i32_0 = arith.constant 0 : i32
    return %c0_i32, %arg0 : i32, i32
  }
}

</mosaic_0001>

<bundles_post_ra>
// kernel: lorentz_basic_block.14
= control target key start
LH: loop header
LB: loop body
LE: loop exit
PB: predicated region body
PF: predicated region fallthrough
CT: control target
= control target key end

     0   :  { %s359_s6 = smov 0   ;;  %s469_s0 = inlined_call_operand.vmem [shape: f32[8,768], index: 0, kind: input, shape index: {}]   ;;  %s470_s1 = inlined_call_operand.vmem [shape: f32[16,128], index: 1, kind: output, shape index: {}]  }
   0x1 LB: > { %s305_s7 = sadd.s32 4294967295, %s346_s6   ;;  %p308_p0 = scmp.ge.s32.totalorder %s346_s6, 1  ;;  %s346_s6 = sphi %s359_s6, %s11_s6  }
   0x2   : > { %p83_p1 = scmp.lt.s32.totalorder %s346_s6, 3 }
   0x4   : > { %p84_p2 = pnand %p308_p0, %p83_p1 }
   0x5   : > { %s98_s8 = smul.u32 (!%p84_p2), 3, %s305_s7  ;;  %p310_p4 = scmp.ne.s32.totalorder (!%p84_p2), %s305_s7, 0 }
   0x6   : > { %87 = sbr.rel (%p84_p2) target bundleno = 229 (0xe5), region = 24 }
   0x7   : > { %p99_p3 = scmp.lt.s32.totalorder (!%p84_p2), %s98_s8, 5 }
   0xb   : > { %s472_s8 = smov (!%p99_p3, %s98_s8), 5  ;;  %107 = sbr.rel (%p310_p4) target bundleno = 19 (0x13), region = 28 }
   0xc   : > { %s309_s9 = sshll.u32 %s472_s8, 3 }
   0xd   : > { %s102_s12 = scalar_lea.vmem %s469_s0, %s309_s9 }
  0x10   : > { %v348_v0 = vmov 0.0  }
  0x11   : > { %108 = vst [vmem:[%s470_s1] sm:$0xff] %v348_v0 }
  0x12   : > { %109 = vst [vmem:[%s470_s1 + $0x8] sm:$0xff] %v348_v0 }
  0x13 PF: > { %v376_v1 = vld [vmem:[%s102_s12] sm:$0xff]  ;;  %v378_v2 = vld [vmem:[%s102_s12 + $0x8] sm:$0xff]  ;;  %v380_v3 = vld [vmem:[%s102_s12 + $0x10] sm:$0xff] }
  0x14   : > { %v113_v4 = vmul.f32 %v376_v1, %v376_v1  ;;  %v114_v5 = vmul.f32 %v378_v2, %v378_v2  ;;  %v115_v6 = vmul.f32 %v380_v3, %v380_v3 }
  0x16   : > { %v116_v7 = vrot.slane %v113_v4, 4  ;;  %v122_v8 = vrot.slane %v114_v5, 4  ;;  %v128_v9 = vrot.slane %v115_v6, 4 }
  0x18   : > { %v117_v10 = vadd.f32 %v116_v7, %v113_v4  ;;  %v123_v11 = vadd.f32 %v122_v8, %v114_v5  ;;  %v129_v12 = vadd.f32 %v128_v9, %v115_v6 }
  0x1a   : > { %v118_v13 = vrot.slane %v117_v10, 2  ;;  %v124_v14 = vrot.slane %v123_v11, 2  ;;  %v130_v15 = vrot.slane %v129_v12, 2 }
  0x1c   : > { %v119_v16 = vadd.f32 %v118_v13, %v117_v10  ;;  %v125_v17 = vadd.f32 %v124_v14, %v123_v11  ;;  %v131_v18 = vadd.f32 %v130_v15, %v129_v12 }
  0x1e   : > { %v120_v19 = vrot.slane %v119_v16, 1  ;;  %v126_v20 = vrot.slane %v125_v17, 1  ;;  %v132_v21 = vrot.slane %v131_v18, 1 }
  0x20   : > { %v121_v22 = vadd.f32 %v120_v19, %v119_v16  ;;  %v127_v23 = vadd.f32 %v126_v20, %v125_v17  ;;  %v133_v24 = vadd.f32 %v132_v21, %v131_v18 }
  0x22   : > { %v388_v25 = vmax.f32 %v121_v22, 1e-30  ;;  %v390_v26 = vmax.f32 %v127_v23, 1e-30  ;;  %v392_v27 = vmax.f32 %v133_v24, 1e-30 }
  0x24   : > { %322 = vrsqrt.f32 %v388_v25  ;;  %vm144_vm0 = vcmp.eq.f32.partialorder %v388_v25, inf  ;;  %vm146_vm1 = vcmp.eq.f32.partialorder %v388_v25, 0.0  ;;  %v147_v44 = vand.u32 2147483648, %v388_v25 }
  0x25   : > { %324 = vrsqrt.f32 %v390_v26  ;;  %vm156_vm2 = vcmp.eq.f32.partialorder %v390_v26, inf  ;;  %v159_v47 = vand.u32 2147483648, %v390_v26  ;;  %vm158_vm3 = vcmp.eq.f32.partialorder %v390_v26, 0.0 }
  0x26   : > { %326 = vrsqrt.f32 %v392_v27  ;;  %vm168_vm4 = vcmp.eq.f32.partialorder %v392_v27, inf  ;;  %v171_v50 = vand.u32 2147483648, %v392_v27  ;;  %vm170_vm5 = vcmp.eq.f32.partialorder %v392_v27, 0.0 }
  0x27   : > { %vm230_vm12 = vweird.f32 %v388_v25  ;;  %vm240_vm14 = vweird.f32 %v390_v26 }
  0x2a   : > { %v397_v28 = vpop.eup %322 }
  0x2b   : > { %v399_v29 = vpop.eup %324  ;;  %v138_v30 = vmul.f32 %v397_v28, %v388_v25  ;;  %vm231_vm13 = vweird.f32 %v397_v28 }
  0x2c   : > { %v403_v31 = vpop.eup %326  ;;  %v150_v32 = vmul.f32 %v399_v29, %v390_v26  ;;  %vm241_vm15 = vweird.f32 %v399_v29 }
  0x2d   : > { %v139_v33 = vmul.f32 %v397_v28, %v138_v30  ;;  %v162_v34 = vmul.f32 %v403_v31, %v392_v27 }
  0x2e   : > { %v151_v35 = vmul.f32 %v399_v29, %v150_v32 }
  0x2f   : > { %v140_v36 = vmul.f32 0.5, %v139_v33  ;;  %v163_v37 = vmul.f32 %v403_v31, %v162_v34 }
  0x30   : > { %v152_v38 = vmul.f32 0.5, %v151_v35 }
  0x31   : > { %v141_v39 = vsub.f32 1.5, %v140_v36  ;;  %v164_v40 = vmul.f32 0.5, %v163_v37 }
  0x32   : > { %v153_v41 = vsub.f32 1.5, %v152_v38 }
  0x33   : > { %v413_v42 = vmul.f32 %v397_v28, %v141_v39  ;;  %v165_v43 = vsub.f32 1.5, %v164_v40 }
  0x34   : > { %v419_v45 = vmul.f32 %v399_v29, %v153_v41 }
  0x35   : > { %v143_v46 = vmul.f32 %v413_v42, %v388_v25  ;;  %v426_v48 = vmul.f32 %v403_v31, %v165_v43 }
  0x36   : > { %v155_v49 = vmul.f32 %v419_v45, %v390_v26 }
  0x37   : > { %v145_v51 = vsel %vm144_vm0, %v388_v25, %v143_v46  ;;  %v167_v52 = vmul.f32 %v426_v48, %v392_v27  ;;  %vm250_vm0 = vweird.f32 %v392_v27 }
  0x38   : > { %v148_v53 = vsel %vm146_vm1, %v147_v44, %v145_v51  ;;  %v157_v54 = vsel %vm156_vm2, %v390_v26, %v155_v49  ;;  %vm251_vm1 = vweird.f32 %v403_v31  ;;  %vm232_vm2 = vmor %vm230_vm12, %vm231_vm13 }
  0x39   : > { %v160_v55 = vsel %vm158_vm3, %v159_v47, %v157_v54  ;;  %v169_v56 = vsel %vm168_vm4, %v392_v27, %v167_v52  ;;  %v173_v57 = vmul.f32 %v148_v53, %v148_v53  ;;  %vm242_vm3 = vmor %vm240_vm14, %vm241_vm15  ;;  %v233_v44 = vsel %vm232_vm2, %v397_v28, %v413_v42 }
  0x3a   : > { %v172_v58 = vsel %vm170_vm5, %v171_v50, %v169_v56  ;;  %v174_v59 = vmul.f32 %v160_v55, %v160_v55  ;;  %vm252_vm4 = vmor %vm250_vm0, %vm251_vm1  ;;  %v243_v47 = vsel %vm242_vm3, %v399_v29, %v419_v45 }
  0x3b   : > { %v175_v60 = vmul.f32 %v172_v58, %v172_v58  ;;  %v176_v61 = vadd.f32 1.0, %v173_v57  ;;  %v253_v50 = vsel %vm252_vm4, %v403_v31, %v426_v48  ;;  %v260_v31 = vld [vmem:[%s470_s1] sm:$0xff] }
  0x3c   : > { %v177_v62 = vadd.f32 1.0, %v174_v59 }
  0x3d   : > { %v178_v63 = vadd.f32 1.0, %v175_v60  ;;  %328 = vrsqrt.f32 %v176_v61  ;;  %vm186_vm6 = vcmp.eq.f32.partialorder %v176_v61, inf  ;;  %vm188_vm7 = vcmp.eq.f32.partialorder %v176_v61, 0.0 }
  0x3e   : > { %330 = vrsqrt.f32 %v177_v62  ;;  %v189_v19 = vand.u32 2147483648, %v176_v61  ;;  %vm198_vm8 = vcmp.eq.f32.partialorder %v177_v62, inf  ;;  %v201_v22 = vand.u32 2147483648, %v177_v62 }
  0x3f   : > { %332 = vrsqrt.f32 %v178_v63  ;;  %vm200_vm9 = vcmp.eq.f32.partialorder %v177_v62, 0.0  ;;  %vm210_vm10 = vcmp.eq.f32.partialorder %v178_v63, inf  ;;  %v213_v30 = vand.u32 2147483648, %v178_v63 }
  0x40   : > { %vm212_vm11 = vcmp.eq.f32.partialorder %v178_v63, 0.0 }
  0x43   : > { %v329_v0 = vpop.eup %328 }
  0x44   : > { %v331_v4 = vpop.eup %330  ;;  %v180_v5 = vmul.f32 %v329_v0, %v176_v61 }
  0x45   : > { %v333_v6 = vpop.eup %332  ;;  %v192_v7 = vmul.f32 %v331_v4, %v177_v62 }
  0x46   : > { %v181_v8 = vmul.f32 %v329_v0, %v180_v5  ;;  %v204_v9 = vmul.f32 %v333_v6, %v178_v63 }
  0x47   : > { %v193_v10 = vmul.f32 %v331_v4, %v192_v7 }
  0x48   : > { %v182_v11 = vmul.f32 0.5, %v181_v8  ;;  %v205_v12 = vmul.f32 %v333_v6, %v204_v9 }
  0x49   : > { %v194_v13 = vmul.f32 0.5, %v193_v10 }
  0x4a   : > { %v183_v14 = vsub.f32 1.5, %v182_v11  ;;  %v206_v15 = vmul.f32 0.5, %v205_v12 }
  0x4b   : > { %v195_v16 = vsub.f32 1.5, %v194_v13 }
  0x4c   : > { %v184_v17 = vmul.f32 %v329_v0, %v183_v14  ;;  %v207_v18 = vsub.f32 1.5, %v206_v15 }
  0x4d   : > { %v196_v20 = vmul.f32 %v331_v4, %v195_v16 }
  0x4e   : > { %v185_v21 = vmul.f32 %v184_v17, %v176_v61  ;;  %v208_v23 = vmul.f32 %v333_v6, %v207_v18 }
  0x4f   : > { %v197_v24 = vmul.f32 %v196_v20, %v177_v62 }
  0x50   : > { %v187_v32 = vsel %vm186_vm6, %v176_v61, %v185_v21  ;;  %v209_v33 = vmul.f32 %v208_v23, %v178_v63 }
  0x51   : > { %v190_v34 = vsel %vm188_vm7, %v189_v19, %v187_v32  ;;  %v199_v35 = vsel %vm198_vm8, %v177_v62, %v197_v24 }
  0x52   : > { %v202_v36 = vsel %vm200_vm9, %v201_v22, %v199_v35  ;;  %v211_v37 = vsel %vm210_vm10, %v178_v63, %v209_v33  ;;  %v215_v38 = vadd.f32 %v190_v34, %v148_v53 }
  0x53   : > { %v214_v39 = vsel %vm212_vm11, %v213_v30, %v211_v37  ;;  %v216_v40 = vadd.f32 %v202_v36, %v160_v55 }
  0x54   : > { %v217_v41 = vadd.f32 %v214_v39, %v172_v58  ;;  %334 = vlog2.f32 %v215_v38 }
  0x55   : > { %336 = vlog2.f32 %v216_v40 }
  0x56   : > { %338 = vlog2.f32 %v217_v41 }
  0x5a   : > { %v335_v43 = vpop.eup %334 }
  0x5b   : > { %v337_v25 = vpop.eup %336  ;;  %v219_v46 = vmul.f32 0.6931472, %v335_v43 }
  0x5c   : > { %v339_v26 = vpop.eup %338  ;;  %v221_v49 = vmul.f32 0.6931472, %v337_v25 }
  0x5d   : > { %v223_v27 = vmul.f32 0.6931472, %v339_v26  ;;  %v254_v51 = vmul.f32 %v233_v44, %v219_v46 }
  0x5e   : > { %v255_v52 = vmul.f32 %v243_v47, %v221_v49 }
  0x5f   : > { %v256_v53 = vmul.f32 %v253_v50, %v223_v27  ;;  %v257_v54 = vmul.f32 %v254_v51, %v376_v1  ;;  %v267_v1 = vld [vmem:[%s470_s1 + $0x8] sm:$0xff] }
  0x60   : > { %v258_v55 = vmul.f32 %v255_v52, %v378_v2 }
  0x61   : > { %v259_v28 = vmul.f32 %v256_v53, %v380_v3  ;;  %v268_v56 = vmul.f32 %v257_v54, %v257_v54 }
  0x62   : > { %v261_v42 = vadd.f32 %v258_v55, %v257_v54  ;;  %v269_v57 = vmul.f32 %v258_v55, %v258_v55 }
  0x63   : > { %v270_v29 = vmul.f32 %v259_v28, %v259_v28 }
  0x64   : > { %v262_v58 = vadd.f32 %v261_v42, %v259_v28  ;;  %v271_v45 = vadd.f32 %v269_v57, %v268_v56 }
  0x66   : > { %263 = vadd.xlane.f32.xlu0 %v262_v58  ;;  %v272_v59 = vadd.f32 %v271_v45, %v270_v29 }
  0x6e   : > { %273 = vadd.xlane.f32.xlu0 %v272_v59 }
  0xd9   : > { %v264_v48 = vpop.xlane.xlu0 %263 }
  0xda   : > { %v265_v60 = vadd.f32 %v264_v48, %v260_v31 }
  0xdc   : > { %266 = vst [vmem:[%s470_s1] sm:$0xff] %v265_v60 }
  0xe1   : > { %v274_v2 = vpop.xlane.xlu0 %273 }
  0xe2   : > { %v275_v3 = vadd.f32 %v274_v2, %v267_v1 }
  0xe4   : > { %276 = vst [vmem:[%s470_s1 + $0x8] sm:$0xff] %v275_v3 }
  0xe5 PF: > { %s11_s6 = sadd.s32 1, %s346_s6  }
  0xe6   : > { %p8_p5 = scmp.ge.s32.totalorder %s11_s6, 4  }
  0xe8   :  { %10 = sbr.rel (!%p8_p5) target bundleno = 1 (0x1), region = 54 }

// kernel: lorentz_basic_block.13
= control target key start
LH: loop header
LB: loop body
LE: loop exit
PB: predicated region body
PF: predicated region fallthrough
CT: control target
= control target key end

     0   :  { %s419_s15 = smov 0   ;;  %s459_s0 = inlined_call_operand.vmem [shape: bf16[5,768], index: 0, kind: input, shape index: {}]   ;;  %s460_s1 = inlined_call_operand.vmem [shape: bf16[1,8,5], index: 1, kind: input, shape index: {}]   ;;  %s461_s2 = inlined_call_operand.vmem [shape: f32[8,1], index: 2, kind: input, shape index: {}]   ;;  %s462_s3 = inlined_call_operand.vmem [shape: f32[1,384], index: 3, kind: input, shape index: {}]   ;;  %s463_s4 = inlined_call_operand.vmem [shape: f32[8,768], index: 4, kind: output, shape index: {}]  }
   0x1 LB: > { %s361_s16 = sadd.s32 4294967295, %s390_s15   ;;  %p365_p0 = scmp.ge.s32.totalorder %s390_s15, 1  ;;  %s390_s15 = sphi %s419_s15, %s14_s15  }
   0x2   : > { %p163_p1 = scmp.lt.s32.totalorder %s390_s15, 3 }
   0x4   : > { %p164_p2 = pnand %p365_p0, %p163_p1 }
   0x5   : > { %s189_s17 = smul.u32 (!%p164_p2), 3, %s361_s16 }
   0x6   : > { %167 = sbr.rel (%p164_p2) target bundleno = 175 (0xaf), region = 36 }
   0x7   : > { %p190_p3 = scmp.lt.s32.totalorder (!%p164_p2), %s189_s17, 5 }
   0xb   : > { %vm204_vm0 = vcmask 1042432   ;;  %vm205_vm1 = vsmask.f32 2304  ;;  %vm207_vm2 = vcmask 1046532   ;;  %vm208_vm3 = vsmask.f32 6400 }
   0xc   : > { %vm428_vm4 = vmand %vm204_vm0, %vm205_vm1  ;;  %v392_v1 = vmov 0   ;;  %v220_v2 = vld [vmem:[%s461_s2] sm:$0xff]  ;;  %s467_s17 = smov (!%p190_p3, %s189_s17), 5  ;;  %v214_v4 = vld [vmem:[#allocation2 + $0xc] sm:$0x7]  ;;  %vm238_vm7 = vcmask 1041408  }
   0xd   : > { %vm209_vm5 = vmand %vm207_vm2, %vm208_vm3  ;;  %383 = vset.pattern.permute.xlu0 %v392_v1  ;;  %s366_s20 = sshll.u32 %s467_s17, 2  ;;  %v211_v3 = vld [vmem:[#allocation2 + $0x4] sm:$0x77]  ;;  %v393_v9 = vmov 65535   ;;  %v219_v23 = vld [vmem:[%s460_s1] sm:$0xf] }
   0xe   : > { %223 = vperm.xlu0 %383, %v220_v2   ;;  %vm210_vm6 = vmor %vm209_vm5, %vm428_vm4  ;;  %s193_s23 = scalar_lea.vmem %s459_s0, %s366_s20  ;;  %v240_v10 = vsel %vm238_vm7, 4294967295, %v393_v9  ;;  %vm234_vm8 = vcmask 39936   ;;  %v290_v24 = vld [vmem:[%s462_s3] sm:$0x7]  ;;  %s367_s28 = sshll.u32 %s467_s17, 3 }
   0xf   : > { %v202_v5 = vld [vmem:[%s193_s23] sm:$0x77]  ;;  %v203_v6 = vld [vmem:[%s193_s23 + $0x8] sm:$0x7]  ;;  %v241_v15 = vsel %vm204_vm0, %v240_v10, 0  ;;  %vm291_vm9 = vcmp.ne.f32.partialorder %v290_v24, 0.0  ;;  %s199_s5 = scalar_lea.vmem %s463_s4, %s367_s28 }
  0x10   : > { %v212_v7 = vsel %vm210_vm6, %v202_v5, %v211_v3  ;;  %v215_v8 = vsel %vm428_vm4, %v203_v6, %v214_v4  ;;  %v292_v25 = vsel %vm291_vm9, 1, %v392_v1 }
  0x11   : > { %213 = vst [vmem:[#allocation2 + $0x4] sm:$0x77] %v212_v7  ;;  %v293_v26 = vperm.slane %v292_v25, 0  ;;  %v294_v27 = vperm.slane %v292_v25, 1  ;;  %v295_v33 = vperm.slane %v292_v25, 2 }
  0x12   : > { %216 = vst [vmem:[#allocation2 + $0xc] sm:$0x7] %v215_v8 }
  0x13   : > { %vm296_vm10 = vcmp.eq.s32.totalorder %v293_v26, 1  ;;  %vm297_vm11 = vcmp.eq.s32.totalorder %v294_v27, 1  ;;  %vm298_vm12 = vcmp.eq.s32.totalorder %v295_v33, 1 }
  0x18   : > { %v217_v11 = vld [vmem:[#allocation2 + $0x4] sm:$0x77] }
  0x19   : > { %v228_v12 = vunpack.c.l.b16 %v217_v11  ;;  %v229_v13 = vunpack.c.h.b16 %v217_v11  ;;  %v218_v14 = vld [vmem:[#allocation2 + $0xc] sm:$0x7] }
  0x1a   : > { %v230_v16 = vunpack.c.l.b16 %v218_v14 }
  0x1b   : > { %v231_v17 = vpack.c.b16 %v228_v12, %v228_v12  ;;  %v232_v18 = vpack.c.b16 %v229_v13, %v229_v13 }
  0x1c   : > { %v233_v19 = vpack.c.b16 %v230_v16, %v230_v16 }
  0x1d   : > { %v243_v20 = vand.u32 %v241_v15, %v231_v17  ;;  %v246_v21 = vand.u32 %v241_v15, %v232_v18 }
  0x1e   : > { %v249_v22 = vand.u32 %v241_v15, %v233_v19 }
  0x1f   : > { %258 = vmatpush.bf16.msra.mxu0 %v243_v20  ;;  %271 = vmatpush.bf16.msra.mxu1 %v246_v21 }
  0x20   : > { %284 = vmatpush.bf16.msra.mxu2 %v249_v22 }
  0x22   : > { %368 = vmatmul.msk.bf16.vlgmr.msra.gmra.mxu0 %vm234_vm8, %v219_v23  ;;  %369 = vmatmul.msk.bf16.vlgmr.msra.gmra.mxu1 %vm234_vm8, %v219_v23 }
  0x23   : > { %370 = vmatmul.msk.bf16.vlgmr.msra.gmra.mxu2 %vm234_vm8, %v219_v23 }
  0x80   : > { %v224_v28 = vpop.permute.xlu0 %223 }
  0x9f   : > { %v260_v29 = vpop.f32.mrf.mxu0  ;;  %v273_v30 = vpop.f32.mrf.mxu1 }
  0xa0   : > { %v261_v31 = vadd.f32 %v260_v29, %v224_v28  ;;  %v274_v32 = vadd.f32 %v273_v30, %v224_v28 }
  0xa2   : > { %v299_v34 = vsel %vm296_vm10, %v261_v31, 0.0  ;;  %v300_v35 = vsel %vm297_vm11, %v274_v32, 0.0 }
  0xa3   : > { %302 = vst [vmem:[%s199_s5] sm:$0xff] %v299_v34 }
  0xa4   : > { %303 = vst [vmem:[%s199_s5 + $0x8] sm:$0xff] %v300_v35 }
  0xa6   : > { %v286_v36 = vpop.f32.mrf.mxu2 }
  0xa7   : > { %v287_v37 = vadd.f32 %v286_v36, %v224_v28  ;;  %v262_v38 = vpop.f32.mrf.mxu0  ;;  %v275_v39 = vpop.f32.mrf.mxu1 }
  0xa9   : > { %v301_v40 = vsel %vm298_vm12, %v287_v37, 0.0 }
  0xaa   : > { %304 = vst [vmem:[%s199_s5 + $0x10] sm:$0xff] %v301_v40 }
  0xae   : > { %v288_v41 = vpop.f32.mrf.mxu2 }
  0xaf PF: > { %s14_s15 = sadd.s32 1, %s390_s15  }
  0xb0   : > { %p11_p4 = scmp.ge.s32.totalorder %s14_s15, 4  }
  0xb2   :  { %13 = sbr.rel (!%p11_p4) target bundleno = 1 (0x1), region = 66 }

// kernel: lorentz_basic_block.8
= control target key start
LH: loop header
LB: loop body
LE: loop exit
PB: predicated region body
PF: predicated region fallthrough
CT: control target
= control target key end

     0   :  { %s1036_s15 = smov 0   ;;  %s1169_s0 = inlined_call_operand.vmem [shape: bf16[5,768], index: 0, kind: input, shape index: {}]   ;;  %s1170_s1 = inlined_call_operand.vmem [shape: bf16[9,8,5], index: 1, kind: input, shape index: {}]   ;;  %s1171_s2 = inlined_call_operand.vmem [shape: f32[8,1], index: 2, kind: input, shape index: {}]   ;;  %s1172_s3 = inlined_call_operand.vmem [shape: f32[1,384], index: 3, kind: input, shape index: {}]   ;;  %s1173_s4 = inlined_call_operand.vmem [shape: f32[8,768], index: 4, kind: output, shape index: {}]  }
   0x1 LB: > { %s929_s16 = sadd.s32 4294967295, %s999_s15   ;;  %p933_p0 = scmp.ge.s32.totalorder %s999_s15, 1  ;;  %s999_s15 = sphi %s1036_s15, %s14_s15  }
   0x2   : > { %p163_p1 = scmp.lt.s32.totalorder %s999_s15, 3 }
   0x4   : > { %p164_p2 = pnand %p933_p0, %p163_p1 }
   0x5   : > { %s189_s17 = smul.u32 (!%p164_p2), 3, %s929_s16  ;;  %s1001_s22 = smov (!%p164_p2), 18  }
   0x6   : > { %167 = sbr.rel (%p164_p2) target bundleno = 395 (0x18b), region = 36  ;;  %s1002_s23 = smov (!%p164_p2), 19  }
   0x7   : > { %p190_p3 = scmp.lt.s32.totalorder (!%p164_p2), %s189_s17, 5  ;;  %s1003_s24 = smov (!%p164_p2), 17  }
   0x8   : > { %s1004_s25 = smov (!%p164_p2), 1   ;;  %s1005_s26 = smov (!%p164_p2), 127  }
   0x9   : > { %s1006_s27 = smov (!%p164_p2), 111   ;;  %s1007_s28 = smov (!%p164_p2), 110  }
   0xa   : > { %s1008_s29 = smov (!%p164_p2), 109  }
   0xb   : > { %vm204_vm0 = vcmask 1042432   ;;  %vm205_vm1 = vsmask.f32 2304  ;;  %vm207_vm2 = vcmask 1046532   ;;  %vm208_vm3 = vsmask.f32 6400 }
   0xc   : > { %vm206_vm4 = vmand %vm204_vm0, %vm205_vm1  ;;  %s1175_s17 = smov (!%p190_p3, %s189_s17), 5  ;;  %v211_v0 = vld [vmem:[#allocation2 + $0x4] sm:$0x77]  ;;  %v214_v1 = vld [vmem:[#allocation2 + $0xc] sm:$0x7]  ;;  %vm248_vm7 = vcmask 1041408  }
   0xd   : > { %vm209_vm5 = vmand %vm207_vm2, %vm208_vm3  ;;  %s934_s18 = sshll.u32 %s1175_s17, 2  ;;  %v1009_v27 = vmov 65535   ;;  %vm308_vm8 = vcmask 154624   ;;  %vm244_vm9 = vcmask 39936   ;;  %v219_v33 = vld [vmem:[%s1170_s1] sm:$0xf] }
   0xe   : > { %vm210_vm6 = vmor %vm209_vm5, %vm206_vm4  ;;  %s193_s21 = scalar_lea.vmem %s1169_s0, %s934_s18  ;;  %v250_v28 = vsel %vm248_vm7, 4294967295, %v1009_v27  ;;  %vm240_vm10 = vcmask 146432   ;;  %v936_v48 = vld [vmem:[%s1170_s1 + $0x4] sm:$0xf]  ;;  %vm373_vm11 = vcmask 138240   ;;  %vm441_vm12 = vcmask 7168  }
   0xf   : > { %v202_v2 = vld [vmem:[%s193_s21] sm:$0x77]  ;;  %v203_v3 = vld [vmem:[%s193_s21 + $0x8] sm:$0x7]  ;;  %v1052_v29 = vsel %vm204_vm0, %v250_v28, 0  ;;  %vm587_vm13 = vcmask 1039360  }
  0x10   : > { %v212_v4 = vsel %vm210_vm6, %v202_v2, %v211_v0  ;;  %v215_v5 = vsel %vm206_vm4, %v203_v3, %v214_v1  ;;  %vm655_vm14 = vcmask 908288   ;;  %vm723_vm15 = vcmask 900096  }
  0x11   : > { %213 = vst [vmem:[#allocation2 + $0x4] sm:$0x77] %v212_v4  ;;  %vm791_vm0 = vcmask 891904  }
  0x12   : > { %216 = vst [vmem:[#allocation2 + $0xc] sm:$0x7] %v215_v5  ;;  %v943_v5 = vld [vmem:[%s1170_s1 + $0x8] sm:$0xf] }
  0x18   : > { %v217_v6 = vld [vmem:[#allocation2] sm:$0x77] }
  0x19   : > { %v218_v7 = vld [vmem:[#allocation2 + $0x8] sm:$0x77]  ;;  %v224_v8 = vunpack.c.l.b16 %v217_v6  ;;  %v225_v12 = vunpack.c.h.b16 %v217_v6 }
  0x1a   : > { %v226_v9 = vunpack.c.l.b16 %v218_v7  ;;  %v227_v13 = vunpack.c.h.b16 %v218_v7  ;;  %v565_v16 = vld [vmem:[#allocation2 + $0x4] sm:$0x77]  ;;  %v566_v21 = vld [vmem:[#allocation2 + $0xc] sm:$0x77] }
  0x1b   : > { %v228_v10 = vpack.c.b16 %v224_v8, %v224_v8  ;;  %v229_v14 = vpack.c.b16 %v225_v12, %v225_v12  ;;  %v571_v17 = vunpack.c.l.b16 %v565_v16  ;;  %v572_v18 = vunpack.c.h.b16 %v565_v16  ;;  %v499_v54 = vld [vmem:[#allocation2 + $0x4] sm:$0x77]  ;;  %v500_v57 = vld [vmem:[#allocation2 + $0xc] sm:$0x7] }
  0x1c   : > { %v230_v11 = vpack.c.b16 %v226_v9, %v226_v9  ;;  %v231_v15 = vpack.c.b16 %v227_v13, %v227_v13  ;;  %v573_v22 = vunpack.c.l.b16 %v566_v21  ;;  %v574_v24 = vunpack.c.h.b16 %v566_v21 }
  0x1d   : > { %232 = vrot.lane.b32.xlu1 %v228_v10, %s1001_s22  ;;  %300 = vrot.lane.b32.xlu2 %v228_v10, %s1002_s23  ;;  %v575_v19 = vpack.c.b16 %v571_v17, %v571_v17  ;;  %v576_v20 = vpack.c.b16 %v572_v18, %v572_v18  ;;  %v506_v55 = vunpack.c.h.b16 %v499_v54  ;;  %v505_v61 = vunpack.c.l.b16 %v499_v54 }
  0x1e   : > { %236 = vrot.lane.b32.xlu0 %v230_v11, %s1001_s22  ;;  %v577_v23 = vpack.c.b16 %v573_v22, %v573_v22  ;;  %v578_v25 = vpack.c.b16 %v574_v24, %v574_v24  ;;  %v507_v2 = vunpack.c.l.b16 %v500_v57 }
  0x1f   : > { %v509_v62 = vpack.c.b16 %v506_v55, %v506_v55  ;;  %v508_v6 = vpack.c.b16 %v505_v61, %v505_v61 }
  0x20   : > { %v510_v8 = vpack.c.b16 %v507_v2, %v507_v2  ;;  %v1010_v2 = vmov 0  }
  0x21   : > { %v518_v7 = vand.u32 %v509_v62, %v1052_v29  ;;  %v515_v12 = vand.u32 %v508_v6, %v1052_v29  ;;  %991 = vset.pattern.permute.xlu2 %v1010_v2  ;;  %992 = vset.pattern.permute.xlu0 %v1010_v2 }
  0x25   : > { %234 = vrot.lane.b32.xlu1 %v229_v14, %s1001_s22  ;;  %302 = vrot.lane.b32.xlu2 %v229_v14, %s1002_s23 }
  0x26   : > { %238 = vrot.lane.b32.xlu0 %v231_v15, %s1001_s22 }
  0x2d   : > { %367 = vrot.lane.b32.xlu1 %v229_v14, %s1003_s24  ;;  %304 = vrot.lane.b32.xlu2 %v230_v11, %s1002_s23 }
  0x2e   : > { %365 = vrot.lane.b32.xlu0 %v228_v10, %s1003_s24 }
  0x35   : > { %369 = vrot.lane.b32.xlu1 %v230_v11, %s1003_s24  ;;  %435 = vrot.lane.b32.xlu2 %v229_v14, %s1004_s25 }
  0x36   : > { %306 = vrot.lane.b32.xlu0 %v231_v15, %s1002_s23 }
  0x3d   : > { %371 = vrot.lane.b32.xlu1 %v231_v15, %s1003_s24  ;;  %433 = vrot.lane.b32.xlu2 %v228_v10, %s1004_s25 }
  0x3e   : > { %437 = vrot.lane.b32.xlu0 %v230_v11, %s1004_s25 }
  0x45   : > { %579 = vrot.lane.b32.xlu1 %v575_v19, %s1005_s26  ;;  %581 = vrot.lane.b32.xlu2 %v576_v20, %s1005_s26 }
  0x46   : > { %439 = vrot.lane.b32.xlu0 %v231_v15, %s1004_s25  ;;  %v521_v15 = vand.u32 %v510_v8, %v1052_v29 }
  0x4d   : > { %649 = vrot.lane.b32.xlu1 %v576_v20, %s1006_s27  ;;  %583 = vrot.lane.b32.xlu2 %v577_v23, %s1005_s26 }
  0x4e   : > { %647 = vrot.lane.b32.xlu0 %v575_v19, %s1006_s27 }
  0x55   : > { %651 = vrot.lane.b32.xlu1 %v577_v23, %s1006_s27  ;;  %717 = vrot.lane.b32.xlu2 %v576_v20, %s1007_s28 }
  0x56   : > { %585 = vrot.lane.b32.xlu0 %v578_v25, %s1005_s26 }
  0x5d   : > { %653 = vrot.lane.b32.xlu1 %v578_v25, %s1006_s27  ;;  %715 = vrot.lane.b32.xlu2 %v575_v19, %s1007_s28 }
  0x5e   : > { %719 = vrot.lane.b32.xlu0 %v577_v23, %s1007_s28 }
  0x65   : > { %787 = vrot.lane.b32.xlu1 %v577_v23, %s1008_s29  ;;  %789 = vrot.lane.b32.xlu2 %v578_v25, %s1008_s29 }
  0x66   : > { %721 = vrot.lane.b32.xlu0 %v578_v25, %s1007_s28  ;;  %v947_v25 = vld [vmem:[%s1170_s1 + $0xc] sm:$0xf]  ;;  %s935_s28 = sshll.u32 %s1175_s17, 3 }
  0x67   : > { %s199_s5 = scalar_lea.vmem %s1173_s4, %s935_s28 }
  0x6d   : > { %785 = vrot.lane.b32.xlu1 %v576_v20, %s1008_s29 }
  0x6e   : > { %783 = vrot.lane.b32.xlu0 %v575_v19, %s1008_s29 }
  0x77   : > { %v301_v26 = vpop.permute.xlu2 %300 }
  0x7f   : > { %v303_v30 = vpop.permute.xlu2 %302 }
  0x80   : > { %v309_v31 = vsel %vm308_vm8, %v301_v26, %v303_v30 }
  0x81   : > { %v316_v32 = vand.u32 %v309_v31, %v1052_v29 }
  0x83   : > { %331 = vmatpush.bf16.msra.mxu3 %v316_v32 }
  0x86   : > { %940 = vmatmul.msk.bf16.vlgmr.msra.gmra.mxu3 %vm244_vm9, %v219_v33 }
  0x87   : > { %v305_v34 = vpop.permute.xlu2 %304 }
  0x88   : > { %v310_v37 = vsel %vm308_vm8, %v303_v30, %v305_v34 }
  0x89   : > { %v319_v42 = vand.u32 %v310_v37, %v1052_v29 }
  0x8f   : > { %v233_v35 = vpop.permute.xlu1 %232  ;;  %v436_v43 = vpop.permute.xlu2 %435 }
  0x90   : > { %v237_v36 = vpop.permute.xlu0 %236 }
  0x97   : > { %v235_v38 = vpop.permute.xlu1 %234  ;;  %v434_v53 = vpop.permute.xlu2 %433 }
  0x98   : > { %v239_v39 = vpop.permute.xlu0 %238  ;;  %v241_v40 = vsel %vm240_vm10, %v233_v35, %v235_v38  ;;  %v242_v41 = vsel %vm240_vm10, %v235_v38, %v237_v36  ;;  %v442_v56 = vsel %vm441_vm12, %v434_v53, %v436_v43 }
  0x99   : > { %v253_v44 = vand.u32 %v1052_v29, %v241_v40  ;;  %v256_v45 = vand.u32 %v1052_v29, %v242_v41  ;;  %v243_v46 = vsel %vm240_vm10, %v237_v36, %v239_v39  ;;  %v449_v1 = vand.u32 %v442_v56, %v1052_v29  ;;  %v951_v41 = vld [vmem:[%s1170_s1 + $0x10] sm:$0xf]  ;;  %v959_v56 = vld [vmem:[%s1170_s1 + $0x18] sm:$0xf] }
  0x9a   : > { %v259_v47 = vand.u32 %v1052_v29, %v243_v46 }
  0x9b   : > { %268 = vmatpush.bf16.msra.mxu0 %v253_v44  ;;  %281 = vmatpush.bf16.msra.mxu1 %v256_v45 }
  0x9c   : > { %294 = vmatpush.bf16.msra.mxu2 %v259_v47 }
  0x9e   : > { %937 = vmatmul.msk.bf16.vlgmr.msra.gmra.mxu0 %vm244_vm9, %v936_v48  ;;  %938 = vmatmul.msk.bf16.vlgmr.msra.gmra.mxu1 %vm244_vm9, %v936_v48 }
  0x9f   : > { %344 = vmatpush.bf16.msrb.mxu0 %v319_v42  ;;  %939 = vmatmul.msk.bf16.vlgmr.msra.gmra.mxu2 %vm244_vm9, %v936_v48  ;;  %v368_v49 = vpop.permute.xlu1 %367  ;;  %v582_v4 = vpop.permute.xlu2 %581 }
  0xa0   : > { %v366_v50 = vpop.permute.xlu0 %365 }
  0xa1   : > { %v374_v51 = vsel %vm373_vm11, %v366_v50, %v368_v49 }
  0xa2   : > { %v381_v52 = vand.u32 %v374_v51, %v1052_v29 }
  0xa4   : > { %396 = vmatpush.bf16.msrb.mxu2 %v381_v52 }
  0xa7   : > { %v370_v58 = vpop.permute.xlu1 %369  ;;  %v584_v17 = vpop.permute.xlu2 %583 }
  0xa8   : > { %v307_v59 = vpop.permute.xlu0 %306  ;;  %v375_v60 = vsel %vm373_vm11, %v368_v49, %v370_v58  ;;  %v589_v23 = vsel %vm587_vm13, %v582_v4, %v584_v17 }
  0xa9   : > { %v311_v63 = vsel %vm308_vm8, %v305_v34, %v307_v59  ;;  %v384_v0 = vand.u32 %v375_v60, %v1052_v29  ;;  %v598_v26 = vand.u32 %v589_v23, %v1052_v29 }
  0xaa   : > { %v322_v3 = vand.u32 %v311_v63, %v1052_v29 }
  0xab   : > { %409 = vmatpush.bf16.msrb.mxu3 %v384_v0  ;;  %v963_v0 = vld [vmem:[%s1170_s1 + $0x1c] sm:$0xf] }
  0xac   : > { %357 = vmatpush.bf16.msrb.mxu1 %v322_v3 }
  0xae   : > { %941 = vmatmul.msk.bf16.vlgmr.msrb.gmra.mxu0 %vm244_vm9, %v219_v33  ;;  %945 = vmatmul.msk.bf16.vlgmr.msrb.gmra.mxu3 %vm244_vm9, %v943_v5 }
  0xaf   : > { %942 = vmatmul.msk.bf16.vlgmr.msrb.gmra.mxu1 %vm244_vm9, %v219_v33  ;;  %944 = vmatmul.msk.bf16.vlgmr.msrb.gmra.mxu2 %vm244_vm9, %v943_v5  ;;  %v372_v9 = vpop.permute.xlu1 %371  ;;  %v718_v27 = vpop.permute.xlu2 %717 }
  0xb0   : > { %464 = vmatpush.bf16.msra.mxu1 %v449_v1  ;;  %v438_v10 = vpop.permute.xlu0 %437  ;;  %v376_v11 = vsel %vm373_vm11, %v370_v58, %v372_v9  ;;  %v967_v1 = vld [vmem:[%s1170_s1 + $0x20] sm:$0xf] }
  0xb1   : > { %v443_v13 = vsel %vm441_vm12, %v436_v43, %v438_v10  ;;  %v387_v14 = vand.u32 %v376_v11, %v1052_v29  ;;  %v955_v43 = vld [vmem:[%s1170_s1 + $0x14] sm:$0xf] }
  0xb2   : > { %v452_v16 = vand.u32 %v443_v13, %v1052_v29 }
  0xb3   : > { %422 = vmatpush.bf16.msra.mxu0 %v387_v14 }
  0xb4   : > { %543 = vmatpush.bf16.msrb.mxu1 %v518_v7  ;;  %477 = vmatpush.bf16.msra.mxu2 %v452_v16 }
  0xb7   : > { %530 = vmatpush.bf16.msrb.mxu0 %v515_v12  ;;  %v580_v18 = vpop.permute.xlu1 %579  ;;  %v716_v33 = vpop.permute.xlu2 %715 }
  0xb8   : > { %556 = vmatpush.bf16.msrb.mxu2 %v521_v15  ;;  %v440_v19 = vpop.permute.xlu0 %439  ;;  %v588_v20 = vsel %vm587_vm13, %v580_v18, %v582_v4  ;;  %v724_v39 = vsel %vm723_vm15, %v716_v33, %v718_v27 }
  0xb9   : > { %v444_v21 = vsel %vm441_vm12, %v438_v10, %v440_v19  ;;  %v595_v22 = vand.u32 %v588_v20, %v1052_v29  ;;  %v731_v42 = vand.u32 %v724_v39, %v1052_v29 }
  0xba   : > { %v455_v24 = vand.u32 %v444_v21, %v1052_v29 }
  0xbc   : > { %490 = vmatpush.bf16.msra.mxu3 %v455_v24 }
  0xbe   : > { %946 = vmatmul.msk.bf16.vlgmr.msra.gmra.mxu0 %vm244_vm9, %v943_v5 }
  0xbf   : > { %948 = vmatmul.msk.bf16.vlgmr.msra.gmra.mxu1 %vm244_vm9, %v947_v25  ;;  %949 = vmatmul.msk.bf16.vlgmr.msra.gmra.mxu2 %vm244_vm9, %v947_v25  ;;  %v650_v28 = vpop.permute.xlu1 %649  ;;  %v790_v50 = vpop.permute.xlu2 %789 }
  0xc0   : > { %610 = vmatpush.bf16.msrb.mxu3 %v595_v22  ;;  %v648_v30 = vpop.permute.xlu0 %647  ;;  %623 = vmatpush.bf16.msra.mxu0 %v598_v26 }
  0xc1   : > { %950 = vmatmul.msk.bf16.vlgmr.msra.gmra.mxu3 %vm244_vm9, %v947_v25  ;;  %v656_v31 = vsel %vm655_vm14, %v648_v30, %v650_v28 }
  0xc2   : > { %v663_v32 = vand.u32 %v656_v31, %v1052_v29 }
  0xc4   : > { %678 = vmatpush.bf16.msra.mxu2 %v663_v32 }
  0xc7   : > { %v652_v34 = vpop.permute.xlu1 %651 }
  0xc8   : > { %v586_v35 = vpop.permute.xlu0 %585  ;;  %v657_v36 = vsel %vm655_vm14, %v650_v28, %v652_v34 }
  0xc9   : > { %v590_v37 = vsel %vm587_vm13, %v584_v17, %v586_v35  ;;  %v666_v38 = vand.u32 %v657_v36, %v1052_v29 }
  0xca   : > { %v601_v40 = vand.u32 %v590_v37, %v1052_v29 }
  0xcb   : > { %691 = vmatpush.bf16.msra.mxu3 %v666_v38 }
  0xcc   : > { %636 = vmatpush.bf16.msra.mxu1 %v601_v40 }
  0xce   : > { %952 = vmatmul.msk.bf16.vlgmr.msrb.gmra.mxu0 %vm244_vm9, %v951_v41 }
  0xcf   : > { %953 = vmatmul.msk.bf16.vlgmr.msrb.gmra.mxu1 %vm244_vm9, %v951_v41  ;;  %954 = vmatmul.msk.bf16.vlgmr.msrb.gmra.mxu2 %vm244_vm9, %v951_v41  ;;  %v654_v44 = vpop.permute.xlu1 %653 }
  0xd0   : > { %v720_v45 = vpop.permute.xlu0 %719  ;;  %v658_v46 = vsel %vm655_vm14, %v652_v34, %v654_v44  ;;  %746 = vmatpush.bf16.msrb.mxu1 %v731_v42 }
  0xd1   : > { %956 = vmatmul.msk.bf16.vlgmr.msrb.gmra.mxu3 %vm244_vm9, %v955_v43  ;;  %v725_v47 = vsel %vm723_vm15, %v718_v27, %v720_v45  ;;  %v669_v48 = vand.u32 %v658_v46, %v1052_v29 }
  0xd2   : > { %v734_v49 = vand.u32 %v725_v47, %v1052_v29 }
  0xd3   : > { %704 = vmatpush.bf16.msrb.mxu0 %v669_v48 }
  0xd4   : > { %759 = vmatpush.bf16.msrb.mxu2 %v734_v49  ;;  %v858_v49 = vld [vmem:[%s1172_s3] sm:$0x7] }
  0xd5   : > { %vm859_vm1 = vcmp.ne.f32.partialorder %v858_v49, 0.0 }
  0xd7   : > { %v788_v51 = vpop.permute.xlu1 %787 }
  0xd8   : > { %v722_v52 = vpop.permute.xlu0 %721  ;;  %v794_v54 = vsel %vm791_vm0, %v788_v51, %v790_v50 }
  0xd9   : > { %v726_v53 = vsel %vm723_vm15, %v720_v45, %v722_v52  ;;  %v805_v57 = vand.u32 %v794_v54, %v1052_v29 }
  0xda   : > { %v737_v55 = vand.u32 %v726_v53, %v1052_v29 }
  0xdc   : > { %772 = vmatpush.bf16.msrb.mxu3 %v737_v55 }
  0xde   : > { %957 = vmatmul.msk.bf16.vlgmr.msra.gmra.mxu0 %vm244_vm9, %v955_v43 }
  0xdf   : > { %958 = vmatmul.msk.bf16.vlgmr.msra.gmra.mxu1 %vm244_vm9, %v955_v43  ;;  %960 = vmatmul.msk.bf16.vlgmr.msra.gmra.mxu2 %vm244_vm9, %v959_v56  ;;  %v786_v58 = vpop.permute.xlu1 %785 }
  0xe0   : > { %v793_v59 = vsel %vm791_vm0, %v786_v58, %v788_v51  ;;  %840 = vmatpush.bf16.msra.mxu2 %v805_v57  ;;  %v784_v60 = vpop.permute.xlu0 %783 }
  0xe1   : > { %961 = vmatmul.msk.bf16.vlgmr.msra.gmra.mxu3 %vm244_vm9, %v959_v56  ;;  %v802_v61 = vand.u32 %v793_v59, %v1052_v29  ;;  %v792_v62 = vsel %vm791_vm0, %v784_v60, %v786_v58  ;;  %v860_v60 = vsel %vm859_vm1, 1, %v1010_v2 }
  0xe2   : > { %v799_v63 = vand.u32 %v792_v62, %v1052_v29  ;;  %v849_v29 = vld [vmem:[%s1171_s2] sm:$0xff] }
  0xe3   : > { %827 = vmatpush.bf16.msra.mxu1 %v802_v61  ;;  %852 = vperm.xlu2 %991, %v849_v29  }
  0xe4   : > { %814 = vmatpush.bf16.msra.mxu0 %v799_v63 }
  0xee   : > { %962 = vmatmul.msk.bf16.vlgmr.msrb.gmra.mxu0 %vm244_vm9, %v959_v56 }
  0xef   : > { %964 = vmatmul.msk.bf16.vlgmr.msrb.gmra.mxu1 %vm244_vm9, %v963_v0  ;;  %965 = vmatmul.msk.bf16.vlgmr.msrb.gmra.mxu2 %vm244_vm9, %v963_v0 }
  0xf1   : > { %966 = vmatmul.msk.bf16.vlgmr.msrb.gmra.mxu3 %vm244_vm9, %v963_v0 }
  0xfe   : > { %968 = vmatmul.msk.bf16.vlgmr.msra.gmra.mxu0 %vm244_vm9, %v967_v1 }
  0xff   : > { %969 = vmatmul.msk.bf16.vlgmr.msra.gmra.mxu1 %vm244_vm9, %v967_v1  ;;  %970 = vmatmul.msk.bf16.vlgmr.msra.gmra.mxu2 %vm244_vm9, %v967_v1 }
 0x109   : > { %v333_v3 = vpop.f32.mrf.mxu3 }
 0x111   : > { %v335_v4 = vpop.f32.mrf.mxu3 }
 0x11b   : > { %v270_v5 = vpop.f32.mrf.mxu0  ;;  %v283_v6 = vpop.f32.mrf.mxu1 }
 0x11c   : > { %v334_v7 = vadd.f32 %v333_v3, %v270_v5  ;;  %v861_v3 = vperm.slane %v860_v60, 0 }
 0x11e   : > { %vm864_vm2 = vcmp.eq.s32.totalorder %v861_v3, 1 }
 0x122   : > { %v296_v8 = vpop.f32.mrf.mxu2 }
 0x123   : > { %v272_v9 = vpop.f32.mrf.mxu0  ;;  %v285_v10 = vpop.f32.mrf.mxu1 }
 0x12a   : > { %v298_v11 = vpop.f32.mrf.mxu2 }
 0x12b   : > { %v346_v12 = vpop.f32.mrf.mxu0 }
 0x12c   : > { %v347_v13 = vadd.f32 %v346_v12, %v283_v6  ;;  %v359_v14 = vpop.f32.mrf.mxu1  ;;  %v862_v6 = vperm.slane %v860_v60, 1 }
 0x12d   : > { %v360_v15 = vadd.f32 %v359_v14, %v296_v8 }
 0x12e   : > { %vm865_vm3 = vcmp.eq.s32.totalorder %v862_v6, 1 }
 0x131   : > { %v411_v16 = vpop.f32.mrf.mxu3 }
 0x132   : > { %v398_v17 = vpop.f32.mrf.mxu2  ;;  %v429_v51 = vadd.f32 %v411_v16, %v347_v13 }
 0x133   : > { %v348_v18 = vpop.f32.mrf.mxu0  ;;  %v428_v50 = vadd.f32 %v398_v17, %v334_v7 }
 0x134   : > { %v361_v19 = vpop.f32.mrf.mxu1 }
 0x135   : > { %v863_v19 = vperm.slane %v860_v60, 2 }
 0x137   : > { %vm866_vm4 = vcmp.eq.s32.totalorder %v863_v19, 1 }
 0x139   : > { %v413_v20 = vpop.f32.mrf.mxu3 }
 0x13a   : > { %v400_v21 = vpop.f32.mrf.mxu2 }
 0x13b   : > { %v424_v22 = vpop.f32.mrf.mxu0 }
 0x13c   : > { %v466_v23 = vpop.f32.mrf.mxu1  ;;  %v430_v62 = vadd.f32 %v424_v22, %v360_v15 }
 0x13d   : > { %v496_v52 = vadd.f32 %v466_v23, %v428_v50  ;;  %v853_v7 = vpop.permute.xlu2 %852 }
 0x142   : > { %v479_v24 = vpop.f32.mrf.mxu2 }
 0x143   : > { %v426_v26 = vpop.f32.mrf.mxu0  ;;  %v497_v54 = vadd.f32 %v479_v24, %v429_v51 }
 0x144   : > { %v492_v25 = vpop.f32.mrf.mxu3  ;;  %v468_v27 = vpop.f32.mrf.mxu1 }
 0x145   : > { %v498_v1 = vadd.f32 %v492_v25, %v430_v62 }
 0x14a   : > { %v481_v28 = vpop.f32.mrf.mxu2 }
 0x14b   : > { %v532_v31 = vpop.f32.mrf.mxu0 }
 0x14c   : > { %v494_v30 = vpop.f32.mrf.mxu3  ;;  %v545_v32 = vpop.f32.mrf.mxu1  ;;  %v562_v57 = vadd.f32 %v532_v31, %v496_v52 }
 0x14d   : > { %v563_v59 = vadd.f32 %v545_v32, %v497_v54 }
 0x152   : > { %v558_v33 = vpop.f32.mrf.mxu2 }
 0x153   : > { %v534_v35 = vpop.f32.mrf.mxu0  ;;  %v564_v8 = vadd.f32 %v558_v33, %v498_v1 }
 0x154   : > { %v612_v34 = vpop.f32.mrf.mxu3  ;;  %v547_v36 = vpop.f32.mrf.mxu1 }
 0x155   : > { %v642_v61 = vadd.f32 %v612_v34, %v562_v57 }
 0x15a   : > { %v560_v37 = vpop.f32.mrf.mxu2 }
 0x15b   : > { %v625_v39 = vpop.f32.mrf.mxu0 }
 0x15c   : > { %v614_v38 = vpop.f32.mrf.mxu3  ;;  %v638_v40 = vpop.f32.mrf.mxu1  ;;  %v643_v63 = vadd.f32 %v625_v39, %v563_v59 }
 0x15d   : > { %v644_v14 = vadd.f32 %v638_v40, %v564_v8 }
 0x162   : > { %v680_v41 = vpop.f32.mrf.mxu2 }
 0x163   : > { %v627_v43 = vpop.f32.mrf.mxu0  ;;  %v710_v0 = vadd.f32 %v680_v41, %v642_v61 }
 0x164   : > { %v693_v42 = vpop.f32.mrf.mxu3  ;;  %v640_v44 = vpop.f32.mrf.mxu1 }
 0x165   : > { %v711_v29 = vadd.f32 %v693_v42, %v643_v63 }
 0x16a   : > { %v682_v45 = vpop.f32.mrf.mxu2 }
 0x16b   : > { %v706_v47 = vpop.f32.mrf.mxu0 }
 0x16c   : > { %v695_v46 = vpop.f32.mrf.mxu3  ;;  %v748_v48 = vpop.f32.mrf.mxu1  ;;  %v712_v16 = vadd.f32 %v706_v47, %v644_v14 }
 0x16d   : > { %v778_v4 = vadd.f32 %v748_v48, %v710_v0 }
 0x172   : > { %v761_v53 = vpop.f32.mrf.mxu2 }
 0x173   : > { %v708_v56 = vpop.f32.mrf.mxu0  ;;  %v779_v9 = vadd.f32 %v761_v53, %v711_v29 }
 0x174   : > { %v774_v55 = vpop.f32.mrf.mxu3  ;;  %v750_v58 = vpop.f32.mrf.mxu1 }
 0x175   : > { %v780_v20 = vadd.f32 %v774_v55, %v712_v16 }
 0x17a   : > { %v763_v5 = vpop.f32.mrf.mxu2 }
 0x17b   : > { %v816_v10 = vpop.f32.mrf.mxu0 }
 0x17c   : > { %v776_v11 = vpop.f32.mrf.mxu3  ;;  %v846_v12 = vadd.f32 %v816_v10, %v778_v4  ;;  %v829_v13 = vpop.f32.mrf.mxu1 }
 0x17d   : > { %v847_v2 = vadd.f32 %v829_v13, %v779_v9 }
 0x17e   : > { %v855_v15 = vadd.f32 %v853_v7, %v846_v12 }
 0x17f   : > { %v856_v17 = vadd.f32 %v853_v7, %v847_v2 }
 0x180   : > { %v867_v18 = vsel %vm864_vm2, %v855_v15, 0.0 }
 0x181   : > { %v868_v21 = vsel %vm865_vm3, %v856_v17, 0.0  ;;  %870 = vst [vmem:[%s199_s5] sm:$0xff] %v867_v18 }
 0x182   : > { %871 = vst [vmem:[%s199_s5 + $0x8] sm:$0xff] %v868_v21  ;;  %v842_v22 = vpop.f32.mrf.mxu2 }
 0x183   : > { %v848_v23 = vadd.f32 %v842_v22, %v780_v20  ;;  %v818_v24 = vpop.f32.mrf.mxu0 }
 0x184   : > { %v831_v25 = vpop.f32.mrf.mxu1 }
 0x185   : > { %v857_v26 = vadd.f32 %v853_v7, %v848_v23 }
 0x187   : > { %v869_v27 = vsel %vm866_vm4, %v857_v26, 0.0 }
 0x188   : > { %872 = vst [vmem:[%s199_s5 + $0x10] sm:$0xff] %v869_v27 }
 0x18a   : > { %v844_v28 = vpop.f32.mrf.mxu2 }
 0x18b PF: > { %s14_s15 = sadd.s32 1, %s999_s15  }
 0x18c   : > { %p11_p4 = scmp.ge.s32.totalorder %s14_s15, 4  }
 0x18e   :  { %13 = sbr.rel (!%p11_p4) target bundleno = 1 (0x1), region = 74 }

// kernel: lorentz_basic_block.10
= control target key start
LH: loop header
LB: loop body
LE: loop exit
PB: predicated region body
PF: predicated region fallthrough
CT: control target
= control target key end

     0   :  { %s800_s12 = smov 0   ;;  %s802_s13 = smov 0   ;;  %s1027_s0 = inlined_call_operand.vmem [shape: f32[8,768], index: 0, kind: input, shape index: {}]   ;;  %s1028_s1 = inlined_call_operand.vmem [shape: f32[8,2], index: 1, kind: input, shape index: {}]   ;;  %s1029_s2 = inlined_call_operand.vmem [shape: f32[1,384], index: 2, kind: input, shape index: {}]   ;;  %s1030_s3 = inlined_call_operand.vmem [shape: bf16[9,768], index: 3, kind: output, shape index: {}]  }
   0x1   :  { %s804_s14 = smov 0  }
   0x2 LB: > { %s813_s15 = sadd.s32 4294967295, %s776_s14   ;;  %s815_s16 = sadd.s32 1, %s776_s14   ;;  %s776_s14 = sphi %s804_s14, %s1038_s14   ;;  %s772_s13 = sphi %s802_s13, %s1037_s13   ;;  %s768_s12 = sphi %s800_s12, %s1036_s12  }
   0x3   : > { %s85_s17 = ssub.s32 %s776_s14, %s815_s16  ;;  %s88_s18 = sadd.s32 1, %s772_s13 }
   0x4   : > { %p86_p0 = scmp.eq.s32.totalorder %s85_s17, 0  ;;  %p98_p1 = scmp.ne.s32.totalorder %s772_s13, %s768_s12 }
   0x5   : > { %p99_p2 = scmp.eq.s32.totalorder %s813_s15, 1  ;;  %p667_p3 = scmp.ge.s32.totalorder %s776_s14, 1 }
   0x6   : > { %s823_s19 = scalar_select %p86_p0, %s772_s13, %s88_s18  }
   0x7   : > { %p825_p4 = por %p99_p2, %p98_p1  ;;  %p138_p5 = scmp.lt.s32.totalorder %s776_s14, 3 }
   0x9   : > { %p139_p6 = pnand %p667_p3, %p138_p5 }
   0xa   : > { %s161_s23 = smul.u32 (!%p139_p6), 3, %s813_s15  ;;  %s158_s30 = sand.u32 (!%p139_p6), 1, %s768_s12  }
   0xb   : > { %142 = sbr.rel (%p139_p6) target bundleno = 268 (0x10c), region = 32 }
   0xc   : > { %p162_p7 = scmp.lt.s32.totalorder (!%p139_p6), %s161_s23, 5  ;;  %s677_s4 = smul.u32 (!%p139_p6), 24, %s158_s30 }
   0xe   : > { %s967_s5 = scalar_lea.vmem (!%p139_p6), [#allocation2], %s677_s4 }
  0x10   : > { %v171_v0 = vld [vmem:[%s1028_s1] sm:$0xff]  ;;  %v778_v1 = vmov 0   ;;  %s1040_s23 = smov (!%p162_p7, %s161_s23), 5  ;;  %v779_v8 = vmov 1   ;;  %s676_s6 = smul.u32 (%p825_p4), 12, %s813_s15 }
  0x11   : > { %704 = vset.pattern.permute.xlu0 %v778_v1  ;;  %s668_s24 = sshll.u32 %s1040_s23, 3 }
  0x12   : > { %321 = vperm.xlu0 %704, %v171_v0   ;;  %s165_s27 = scalar_lea.vmem %s1027_s0, %s668_s24  ;;  %s575_s9 = scalar_lea.vmem (%p825_p4), %s1030_s3, %s676_s6 }
  0x13   : > { %v836_v2 = vld [vmem:[%s165_s27] sm:$0xff]  ;;  %v838_v3 = vld [vmem:[%s165_s27 + $0x8] sm:$0xff]  ;;  %v840_v4 = vld [vmem:[%s165_s27 + $0x10] sm:$0xff] }
  0x14   : > { %v172_v5 = vmul.f32 %v836_v2, %v836_v2  ;;  %v173_v6 = vmul.f32 %v838_v3, %v838_v3  ;;  %v174_v7 = vmul.f32 %v840_v4, %v840_v4 }
  0x16   : > { %v175_v9 = vrot.slane %v172_v5, 4  ;;  %v181_v10 = vrot.slane %v173_v6, 4  ;;  %v187_v11 = vrot.slane %v174_v7, 4 }
  0x18   : > { %v176_v12 = vadd.f32 %v175_v9, %v172_v5  ;;  %v182_v13 = vadd.f32 %v181_v10, %v173_v6  ;;  %v188_v14 = vadd.f32 %v187_v11, %v174_v7 }
  0x1a   : > { %705 = vset.pattern.permute.xlu0 %v779_v8  ;;  %v177_v15 = vrot.slane %v176_v12, 2  ;;  %v183_v16 = vrot.slane %v182_v13, 2  ;;  %v189_v17 = vrot.slane %v188_v14, 2 }
  0x1b   : > { %328 = vperm.xlu0 %705, %v171_v0  }
  0x1c   : > { %v178_v18 = vadd.f32 %v177_v15, %v176_v12  ;;  %v184_v19 = vadd.f32 %v183_v16, %v182_v13  ;;  %v190_v20 = vadd.f32 %v189_v17, %v188_v14 }
  0x1e   : > { %v179_v21 = vrot.slane %v178_v18, 1  ;;  %v185_v22 = vrot.slane %v184_v19, 1  ;;  %v191_v23 = vrot.slane %v190_v20, 1 }
  0x20   : > { %v180_v24 = vadd.f32 %v179_v21, %v178_v18  ;;  %v186_v25 = vadd.f32 %v185_v22, %v184_v19  ;;  %v192_v26 = vadd.f32 %v191_v23, %v190_v20 }
  0x22   : > { %v848_v27 = vmax.f32 %v180_v24, 1e-30  ;;  %v850_v28 = vmax.f32 %v186_v25, 1e-30  ;;  %v852_v29 = vmax.f32 %v192_v26, 1e-30 }
  0x24   : > { %706 = vrsqrt.f32 %v848_v27  ;;  %vm203_vm0 = vcmp.eq.f32.partialorder %v848_v27, inf  ;;  %vm215_vm1 = vcmp.eq.f32.partialorder %v850_v28, inf  ;;  %v206_v48 = vand.u32 2147483648, %v848_v27 }
  0x25   : > { %708 = vrsqrt.f32 %v850_v28  ;;  %vm205_vm2 = vcmp.eq.f32.partialorder %v848_v27, 0.0  ;;  %v218_v51 = vand.u32 2147483648, %v850_v28  ;;  %vm217_vm3 = vcmp.eq.f32.partialorder %v850_v28, 0.0 }
  0x26   : > { %710 = vrsqrt.f32 %v852_v29  ;;  %vm227_vm4 = vcmp.eq.f32.partialorder %v852_v29, inf  ;;  %v230_v54 = vand.u32 2147483648, %v852_v29  ;;  %vm229_vm5 = vcmp.eq.f32.partialorder %v852_v29, 0.0 }
  0x27   : > { %vm289_vm12 = vweird.f32 %v848_v27  ;;  %vm299_vm14 = vweird.f32 %v850_v28 }
  0x2a   : > { %v857_v30 = vpop.eup %706 }
  0x2b   : > { %v859_v31 = vpop.eup %708  ;;  %v197_v32 = vmul.f32 %v857_v30, %v848_v27  ;;  %vm290_vm13 = vweird.f32 %v857_v30 }
  0x2c   : > { %v863_v33 = vpop.eup %710  ;;  %v209_v34 = vmul.f32 %v859_v31, %v850_v28  ;;  %vm300_vm15 = vweird.f32 %v859_v31 }
  0x2d   : > { %v198_v35 = vmul.f32 %v857_v30, %v197_v32  ;;  %v221_v36 = vmul.f32 %v863_v33, %v852_v29 }
  0x2e   : > { %v210_v37 = vmul.f32 %v859_v31, %v209_v34 }
  0x2f   : > { %v199_v38 = vmul.f32 0.5, %v198_v35  ;;  %v222_v39 = vmul.f32 %v863_v33, %v221_v36 }
  0x30   : > { %v211_v40 = vmul.f32 0.5, %v210_v37 }
  0x31   : > { %v200_v41 = vsub.f32 1.5, %v199_v38  ;;  %v223_v42 = vmul.f32 0.5, %v222_v39 }
  0x32   : > { %v212_v43 = vsub.f32 1.5, %v211_v40 }
  0x33   : > { %v873_v44 = vmul.f32 %v857_v30, %v200_v41  ;;  %v224_v45 = vsub.f32 1.5, %v223_v42 }
  0x34   : > { %v876_v46 = vmul.f32 %v859_v31, %v212_v43 }
  0x35   : > { %v202_v47 = vmul.f32 %v873_v44, %v848_v27  ;;  %v889_v52 = vmul.f32 %v863_v33, %v224_v45 }
  0x36   : > { %v214_v49 = vmul.f32 %v876_v46, %v850_v28 }
  0x37   : > { %v204_v50 = vsel %vm203_vm0, %v848_v27, %v202_v47  ;;  %v226_v55 = vmul.f32 %v889_v52, %v852_v29  ;;  %vm309_vm0 = vweird.f32 %v852_v29 }
  0x38   : > { %v216_v53 = vsel %vm215_vm1, %v850_v28, %v214_v49  ;;  %v207_v56 = vsel %vm205_vm2, %v206_v48, %v204_v50  ;;  %vm310_vm1 = vweird.f32 %v863_v33  ;;  %vm291_vm2 = vmor %vm289_vm12, %vm290_vm13 }
  0x39   : > { %v219_v57 = vsel %vm217_vm3, %v218_v51, %v216_v53  ;;  %v228_v58 = vsel %vm227_vm4, %v852_v29, %v226_v55  ;;  %v232_v60 = vmul.f32 %v207_v56, %v207_v56  ;;  %vm301_vm3 = vmor %vm299_vm14, %vm300_vm15  ;;  %v292_v27 = vsel %vm291_vm2, %v857_v30, %v873_v44 }
  0x3a   : > { %v231_v59 = vsel %vm229_vm5, %v230_v54, %v228_v58  ;;  %v233_v61 = vmul.f32 %v219_v57, %v219_v57  ;;  %vm311_vm4 = vmor %vm309_vm0, %vm310_vm1  ;;  %v302_v28 = vsel %vm301_vm3, %v859_v31, %v876_v46  ;;  %vm509_vm14 = vcmask 1040384  }
  0x3b   : > { %v234_v62 = vmul.f32 %v231_v59, %v231_v59  ;;  %v235_v63 = vadd.f32 1.0, %v232_v60  ;;  %v312_v53 = vsel %vm311_vm4, %v863_v33, %v889_v52  ;;  %vm510_vm15 = vsmask.f32 256 }
  0x3c   : > { %v236_v0 = vadd.f32 1.0, %v233_v61  ;;  %vm512_vm0 = vcmask 1044484   ;;  %vm513_vm1 = vsmask.f32 4352  ;;  %vm947_vm2 = vmand %vm509_vm14, %vm510_vm15  ;;  %vm551_vm14 = vsmask.f32 7954 }
  0x3d   : > { %v237_v1 = vadd.f32 1.0, %v234_v62  ;;  %712 = vrsqrt.f32 %v235_v63  ;;  %vm245_vm6 = vcmp.eq.f32.partialorder %v235_v63, inf  ;;  %v248_v26 = vand.u32 2147483648, %v235_v63  ;;  %vm953_vm3 = vmand %vm512_vm0, %vm513_vm1 }
  0x3e   : > { %714 = vrsqrt.f32 %v236_v0  ;;  %vm257_vm7 = vcmp.eq.f32.partialorder %v236_v0, inf  ;;  %vm247_vm9 = vcmp.eq.f32.partialorder %v235_v63, 0.0  ;;  %v260_v34 = vand.u32 2147483648, %v236_v0  ;;  %vm515_vm4 = vmor %vm953_vm3, %vm947_vm2 }
  0x3f   : > { %716 = vrsqrt.f32 %v237_v1  ;;  %vm269_vm8 = vcmp.eq.f32.partialorder %v237_v1, inf  ;;  %vm259_vm10 = vcmp.eq.f32.partialorder %v236_v0, 0.0  ;;  %v272_v36 = vand.u32 2147483648, %v237_v1 }
  0x40   : > { %vm271_vm11 = vcmp.eq.f32.partialorder %v237_v1, 0.0 }
  0x43   : > { %v713_v5 = vpop.eup %712 }
  0x44   : > { %v715_v6 = vpop.eup %714  ;;  %v239_v8 = vmul.f32 %v713_v5, %v235_v63 }
  0x45   : > { %v717_v7 = vpop.eup %716  ;;  %v251_v9 = vmul.f32 %v715_v6, %v236_v0 }
  0x46   : > { %v263_v10 = vmul.f32 %v717_v7, %v237_v1  ;;  %v240_v11 = vmul.f32 %v713_v5, %v239_v8 }
  0x47   : > { %v252_v12 = vmul.f32 %v715_v6, %v251_v9 }
  0x48   : > { %v264_v13 = vmul.f32 %v717_v7, %v263_v10  ;;  %v241_v14 = vmul.f32 0.5, %v240_v11 }
  0x49   : > { %v253_v15 = vmul.f32 0.5, %v252_v12 }
  0x4a   : > { %v265_v16 = vmul.f32 0.5, %v264_v13  ;;  %v242_v17 = vsub.f32 1.5, %v241_v14 }
  0x4b   : > { %v254_v18 = vsub.f32 1.5, %v253_v15 }
  0x4c   : > { %v266_v19 = vsub.f32 1.5, %v265_v16  ;;  %v243_v20 = vmul.f32 %v713_v5, %v242_v17 }
  0x4d   : > { %v255_v21 = vmul.f32 %v715_v6, %v254_v18 }
  0x4e   : > { %v267_v22 = vmul.f32 %v717_v7, %v266_v19  ;;  %v244_v23 = vmul.f32 %v243_v20, %v235_v63 }
  0x4f   : > { %v256_v24 = vmul.f32 %v255_v21, %v236_v0 }
  0x50   : > { %v268_v25 = vmul.f32 %v267_v22, %v237_v1  ;;  %v246_v32 = vsel %vm245_vm6, %v235_v63, %v244_v23 }
  0x51   : > { %v258_v35 = vsel %vm257_vm7, %v236_v0, %v256_v24  ;;  %v249_v38 = vsel %vm247_vm9, %v248_v26, %v246_v32 }
  0x52   : > { %v270_v37 = vsel %vm269_vm8, %v237_v1, %v268_v25  ;;  %v261_v39 = vsel %vm259_vm10, %v260_v34, %v258_v35  ;;  %v274_v41 = vadd.f32 %v249_v38, %v207_v56 }
  0x53   : > { %v273_v40 = vsel %vm271_vm11, %v272_v36, %v270_v37  ;;  %v275_v42 = vadd.f32 %v261_v39, %v219_v57 }
  0x54   : > { %v276_v43 = vadd.f32 %v273_v40, %v231_v59  ;;  %718 = vlog2.f32 %v274_v41 }
  0x55   : > { %720 = vlog2.f32 %v275_v42 }
  0x56   : > { %722 = vlog2.f32 %v276_v43 }
  0x5a   : > { %v719_v45 = vpop.eup %718 }
  0x5b   : > { %v721_v47 = vpop.eup %720  ;;  %v278_v49 = vmul.f32 0.6931472, %v719_v45 }
  0x5c   : > { %v723_v48 = vpop.eup %722  ;;  %v280_v50 = vmul.f32 0.6931472, %v721_v47 }
  0x5d   : > { %v282_v51 = vmul.f32 0.6931472, %v723_v48  ;;  %v313_v54 = vmul.f32 %v292_v27, %v278_v49 }
  0x5e   : > { %v314_v55 = vmul.f32 %v302_v28, %v280_v50 }
  0x5f   : > { %v315_v56 = vmul.f32 %v312_v53, %v282_v51  ;;  %v316_v57 = vmul.f32 %v313_v54, %v836_v2 }
  0x60   : > { %v317_v58 = vmul.f32 %v314_v55, %v838_v3 }
  0x61   : > { %v318_v59 = vmul.f32 %v315_v56, %v840_v4 }
  0x84   : > { %v322_v29 = vpop.permute.xlu0 %321 }
  0x85   : > { %v324_v60 = vmul.f32 %v322_v29, %v316_v57  ;;  %v325_v61 = vmul.f32 %v322_v29, %v317_v58  ;;  %v326_v62 = vmul.f32 %v322_v29, %v318_v59 }
  0x8d   : > { %v329_v30 = vpop.permute.xlu0 %328 }
  0x8e   : > { %v914_v44 = vadd.f32 %v329_v30, %v324_v60  ;;  %v916_v31 = vadd.f32 %v329_v30, %v325_v61  ;;  %v918_v46 = vadd.f32 %v329_v30, %v326_v62 }
  0x90   : > { %v334_v33 = vmul.f32 %v914_v44, %v914_v44  ;;  %v335_v2 = vmul.f32 %v916_v31, %v916_v31  ;;  %v336_v3 = vmul.f32 %v918_v46, %v918_v46 }
  0x92   : > { %v337_v4 = vrot.slane %v334_v33, 4  ;;  %v343_v52 = vrot.slane %v335_v2, 4  ;;  %v349_v63 = vrot.slane %v336_v3, 4 }
  0x94   : > { %v338_v0 = vadd.f32 %v337_v4, %v334_v33  ;;  %v344_v1 = vadd.f32 %v343_v52, %v335_v2  ;;  %v350_v5 = vadd.f32 %v349_v63, %v336_v3 }
  0x96   : > { %v339_v6 = vrot.slane %v338_v0, 2  ;;  %v345_v7 = vrot.slane %v344_v1, 2  ;;  %v351_v8 = vrot.slane %v350_v5, 2 }
  0x98   : > { %v340_v9 = vadd.f32 %v339_v6, %v338_v0  ;;  %v346_v10 = vadd.f32 %v345_v7, %v344_v1  ;;  %v352_v11 = vadd.f32 %v351_v8, %v350_v5 }
  0x9a   : > { %v341_v12 = vrot.slane %v340_v9, 1  ;;  %v347_v13 = vrot.slane %v346_v10, 1  ;;  %v353_v14 = vrot.slane %v352_v11, 1 }
  0x9c   : > { %v342_v15 = vadd.f32 %v341_v12, %v340_v9  ;;  %v348_v16 = vadd.f32 %v347_v13, %v346_v10  ;;  %v354_v17 = vadd.f32 %v353_v14, %v352_v11 }
  0x9e   : > { %v355_v18 = vmax.f32 %v342_v15, 1e-30  ;;  %v356_v19 = vmax.f32 %v348_v16, 1e-30  ;;  %v357_v20 = vmax.f32 %v354_v17, 1e-30 }
  0x9f   : > { %v929_v15 = vld [vmem:[%s1029_s2] sm:$0x7] }
  0xa0   : > { %724 = vrsqrt.f32 %v355_v18  ;;  %vm365_vm5 = vcmp.eq.f32.partialorder %v355_v18, inf  ;;  %vm367_vm6 = vcmp.eq.f32.partialorder %v355_v18, 0.0  ;;  %v368_v48 = vand.u32 2147483648, %v355_v18 }
  0xa1   : > { %726 = vrsqrt.f32 %v356_v19  ;;  %vm377_vm7 = vcmp.eq.f32.partialorder %v356_v19, inf  ;;  %vm379_vm8 = vcmp.eq.f32.partialorder %v356_v19, 0.0  ;;  %v380_v51 = vand.u32 2147483648, %v356_v19 }
  0xa2   : > { %728 = vrsqrt.f32 %v357_v20  ;;  %vm389_vm9 = vcmp.eq.f32.partialorder %v357_v20, inf  ;;  %v392_v29 = vand.u32 2147483648, %v357_v20  ;;  %vm391_vm10 = vcmp.eq.f32.partialorder %v357_v20, 0.0 }
  0xa6   : > { %v725_v21 = vpop.eup %724 }
  0xa7   : > { %v727_v22 = vpop.eup %726  ;;  %v359_v23 = vmul.f32 %v725_v21, %v355_v18 }
  0xa8   : > { %v729_v24 = vpop.eup %728  ;;  %v371_v25 = vmul.f32 %v727_v22, %v356_v19 }
  0xa9   : > { %v360_v26 = vmul.f32 %v725_v21, %v359_v23  ;;  %v383_v32 = vmul.f32 %v729_v24, %v357_v20 }
  0xaa   : > { %v372_v34 = vmul.f32 %v727_v22, %v371_v25  ;;  %v499_v25 = vperm.slane %v929_v15, 1 }
  0xab   : > { %v361_v35 = vmul.f32 0.5, %v360_v26  ;;  %v384_v36 = vmul.f32 %v729_v24, %v383_v32 }
  0xac   : > { %v373_v37 = vmul.f32 0.5, %v372_v34  ;;  %v500_v34 = vperm.slane %v929_v15, 2 }
  0xad   : > { %v362_v38 = vsub.f32 1.5, %v361_v35  ;;  %v385_v39 = vmul.f32 0.5, %v384_v36 }
  0xae   : > { %v374_v40 = vsub.f32 1.5, %v373_v37 }
  0xaf   : > { %v363_v41 = vmul.f32 %v725_v21, %v362_v38  ;;  %v386_v42 = vsub.f32 1.5, %v385_v39 }
  0xb0   : > { %v375_v43 = vmul.f32 %v727_v22, %v374_v40  ;;  %v498_v22 = vperm.slane %v929_v15, 0 }
  0xb1   : > { %v364_v45 = vmul.f32 %v363_v41, %v355_v18  ;;  %v387_v47 = vmul.f32 %v729_v24, %v386_v42 }
  0xb2   : > { %v376_v49 = vmul.f32 %v375_v43, %v356_v19 }
  0xb3   : > { %v366_v50 = vsel %vm365_vm5, %v355_v18, %v364_v45  ;;  %v388_v27 = vmul.f32 %v387_v47, %v357_v20 }
  0xb4   : > { %v369_v28 = vsel %vm367_vm6, %v368_v48, %v366_v50  ;;  %v378_v53 = vsel %vm377_vm7, %v356_v19, %v376_v49 }
  0xb5   : > { %v381_v54 = vsel %vm379_vm8, %v380_v51, %v378_v53  ;;  %v390_v55 = vsel %vm389_vm9, %v357_v20, %v388_v27  ;;  %v394_v56 = vmin.f32 %v369_v28, 32.0 }
  0xb6   : > { %v393_v57 = vsel %vm391_vm10, %v392_v29, %v390_v55  ;;  %v395_v58 = vmin.f32 %v381_v54, 32.0 }
  0xb7   : > { %v396_v59 = vmin.f32 %v393_v57, 32.0  ;;  %v397_v60 = vmul.f32 1.442695, %v394_v56  ;;  %v403_v61 = vsub.f32 0.0, %v394_v56  ;;  %vm418_vm11 = vcmp.lt.f32.partialorder %v394_v56, 0.0001 }
  0xb8   : > { %v399_v62 = vmul.f32 1.442695, %v395_v58  ;;  %v404_v30 = vsub.f32 0.0, %v395_v58  ;;  %vm419_vm12 = vcmp.lt.f32.partialorder %v395_v58, 0.0001 }
  0xb9   : > { %730 = vpow2.f32 %v397_v60  ;;  %v401_v33 = vmul.f32 1.442695, %v396_v59  ;;  %v405_v2 = vsub.f32 0.0, %v396_v59  ;;  %v406_v3 = vmul.f32 1.442695, %v403_v61 }
  0xba   : > { %732 = vpow2.f32 %v399_v62  ;;  %v408_v4 = vmul.f32 1.442695, %v404_v30  ;;  %vm420_vm13 = vcmp.lt.f32.partialorder %v396_v59, 0.0001  ;;  %v560_v60 = vld [vmem:[%s967_s5 + $0xc] sm:$0x11] }
  0xbb   : > { %734 = vpow2.f32 %v401_v33  ;;  %v410_v52 = vmul.f32 1.442695, %v405_v2  ;;  %v563_v30 = vld [vmem:[%s967_s5 + $0x14] sm:$0x1] }
  0xbc   : > { %736 = vpow2.f32 %v406_v3 }
  0xbd   : > { %738 = vpow2.f32 %v408_v4 }
  0xbe   : > { %740 = vpow2.f32 %v410_v52 }
  0xbf   : > { %v731_v63 = vpop.eup %730  ;;  %742 = vrcp.f32 %v394_v56 }
  0xc0   : > { %v733_v0 = vpop.eup %732  ;;  %744 = vrcp.f32 %v395_v58 }
  0xc1   : > { %v735_v1 = vpop.eup %734  ;;  %746 = vrcp.f32 %v396_v59 }
  0xc2   : > { %v737_v5 = vpop.eup %736 }
  0xc3   : > { %v739_v6 = vpop.eup %738  ;;  %v412_v7 = vsub.f32 %v731_v63, %v737_v5 }
  0xc4   : > { %v741_v8 = vpop.eup %740  ;;  %v413_v9 = vsub.f32 %v733_v0, %v739_v6 }
  0xc5   : > { %v414_v10 = vsub.f32 %v735_v1, %v741_v8  ;;  %v415_v11 = vmul.f32 0.5, %v412_v7  ;;  %v743_v12 = vpop.eup %742 }
  0xc6   : > { %v416_v13 = vmul.f32 0.5, %v413_v9  ;;  %v745_v14 = vpop.eup %744 }
  0xc7   : > { %v417_v16 = vmul.f32 0.5, %v414_v10  ;;  %v424_v17 = vmul.f32 %v743_v12, %v415_v11  ;;  %v747_v18 = vpop.eup %746 }
  0xc8   : > { %v425_v19 = vmul.f32 %v745_v14, %v416_v13 }
  0xc9   : > { %v426_v20 = vmul.f32 %v747_v18, %v417_v16  ;;  %v427_v21 = vsel %vm418_vm11, 1.0, %v424_v17  ;;  %vm547_vm11 = vcmask 1043456  }
  0xca   : > { %v428_v23 = vsel %vm419_vm12, 1.0, %v425_v19  ;;  %v430_v24 = vmul.f32 %v427_v21, %v914_v44  ;;  %vm548_vm12 = vsmask.f32 7938 }
  0xcb   : > { %v429_v26 = vsel %vm420_vm13, 1.0, %v426_v20  ;;  %v431_v32 = vmul.f32 %v428_v23, %v916_v31  ;;  %vm550_vm13 = vcmask 1047556   ;;  %vm549_vm15 = vmand %vm547_vm11, %vm548_vm12 }
  0xcc   : > { %v432_v35 = vmul.f32 %v429_v26, %v918_v46  ;;  %v433_v36 = vmax.f32 %v430_v24, 0.0  ;;  %vm552_vm0 = vmand %vm550_vm13, %vm551_vm14 }
  0xcd   : > { %v434_v37 = vmax.f32 %v431_v32, 0.0  ;;  %vm553_vm1 = vmor %vm552_vm0, %vm549_vm15 }
  0xce   : > { %v435_v38 = vmax.f32 %v432_v35, 0.0  ;;  %v436_v39 = vmul.f32 %v433_v36, %v433_v36  ;;  %v522_v40 = vmul.f32 %v498_v22, %v433_v36 }
  0xcf   : > { %v437_v44 = vmul.f32 %v434_v37, %v434_v37  ;;  %v523_v31 = vmul.f32 %v499_v25, %v434_v37 }
  0xd0   : > { %v438_v41 = vmul.f32 %v435_v38, %v435_v38  ;;  %v439_v42 = vrot.slane %v436_v39, 4  ;;  %v524_v46 = vmul.f32 %v500_v34, %v435_v38 }
  0xd1   : > { %v445_v43 = vrot.slane %v437_v44, 4  ;;  %v944_v45 = vpack.c.bf16 %v523_v31, %v522_v40 }
  0xd2   : > { %v440_v48 = vadd.f32 %v439_v42, %v436_v39  ;;  %v451_v49 = vrot.slane %v438_v41, 4  ;;  %v951_v50 = vpack.c.bf16 %v524_v46, %v524_v46 }
  0xd3   : > { %v446_v27 = vadd.f32 %v445_v43, %v437_v44  ;;  %v528_v28 = vshrl.u32 %v944_v45, 16 }
  0xd4   : > { %v441_v53 = vrot.slane %v440_v48, 2  ;;  %v452_v29 = vadd.f32 %v451_v49, %v438_v41  ;;  %v535_v54 = vshrl.u32 %v951_v50, 16 }
  0xd5   : > { %v447_v55 = vrot.slane %v446_v27, 2  ;;  %v959_v56 = vrot.slane %v528_v28, 7 }
  0xd6   : > { %v442_v57 = vadd.f32 %v441_v53, %v440_v48  ;;  %v453_v58 = vrot.slane %v452_v29, 2  ;;  %v965_v59 = vrot.slane %v535_v54, 7  ;;  %v516_v54 = vld [vmem:[%s967_s5] sm:$0x11] }
  0xd7   : > { %v448_v61 = vadd.f32 %v447_v55, %v446_v27  ;;  %v541_v62 = vrot.slane %v959_v56, 4 }
  0xd8   : > { %v443_v33 = vrot.slane %v442_v57, 1  ;;  %v454_v2 = vadd.f32 %v453_v58, %v452_v29  ;;  %v542_v3 = vrot.slane %v965_v59, 4 }
  0xd9   : > { %v449_v4 = vrot.slane %v448_v61, 1  ;;  %v561_v52 = vsel %vm515_vm4, %v541_v62, %v560_v60 }
  0xda   : > { %v444_v63 = vadd.f32 %v443_v33, %v442_v57  ;;  %v455_v0 = vrot.slane %v454_v2, 1  ;;  %562 = vst [vmem:[%s967_s5 + $0xc] sm:$0x11] %v561_v52  ;;  %v564_v1 = vsel %vm947_vm2, %v542_v3, %v563_v30  ;;  %v519_v57 = vld [vmem:[%s967_s5 + $0x8] sm:$0x1] }
  0xdb   : > { %v450_v5 = vadd.f32 %v449_v4, %v448_v61  ;;  %565 = vst [vmem:[%s967_s5 + $0x14] sm:$0x1] %v564_v1 }
  0xdc   : > { %v456_v6 = vadd.f32 %v455_v0, %v454_v2  ;;  %v457_v7 = vadd.f32 1.0, %v444_v63 }
  0xdd   : > { %v458_v8 = vadd.f32 1.0, %v450_v5 }
  0xde   : > { %v459_v9 = vadd.f32 1.0, %v456_v6  ;;  %748 = vrsqrt.f32 %v457_v7  ;;  %vm467_vm5 = vcmp.eq.f32.partialorder %v457_v7, inf  ;;  %vm469_vm6 = vcmp.eq.f32.partialorder %v457_v7, 0.0 }
  0xdf   : > { %750 = vrsqrt.f32 %v458_v8  ;;  %v470_v39 = vand.u32 2147483648, %v457_v7  ;;  %vm479_vm7 = vcmp.eq.f32.partialorder %v458_v8, inf  ;;  %vm481_vm8 = vcmp.eq.f32.partialorder %v458_v8, 0.0 }
  0xe0   : > { %752 = vrsqrt.f32 %v459_v9  ;;  %v482_v31 = vand.u32 2147483648, %v458_v8  ;;  %vm491_vm9 = vcmp.eq.f32.partialorder %v459_v9, inf  ;;  %v494_v43 = vand.u32 2147483648, %v459_v9 }
  0xe1   : > { %vm493_vm10 = vcmp.eq.f32.partialorder %v459_v9, 0.0  ;;  %v592_v47 = vld [vmem:[%s967_s5 + $0xc] sm:$0xff] (%p825_p4) }
  0xe2   : > { %593 = vst [vmem:[%s575_s9 + $0x18] sm:$0xff] (%p825_p4), %v592_v47 }
  0xe4   : > { %v749_v10 = vpop.eup %748 }
  0xe5   : > { %v751_v11 = vpop.eup %750  ;;  %v461_v12 = vmul.f32 %v749_v10, %v457_v7 }
  0xe6   : > { %v753_v13 = vpop.eup %752  ;;  %v473_v14 = vmul.f32 %v751_v11, %v458_v8 }
  0xe7   : > { %v462_v16 = vmul.f32 %v749_v10, %v461_v12  ;;  %v485_v17 = vmul.f32 %v753_v13, %v459_v9 }
  0xe8   : > { %v474_v18 = vmul.f32 %v751_v11, %v473_v14 }
  0xe9   : > { %v463_v19 = vmul.f32 0.5, %v462_v16  ;;  %v486_v20 = vmul.f32 %v753_v13, %v485_v17 }
  0xea   : > { %v475_v21 = vmul.f32 0.5, %v474_v18 }
  0xeb   : > { %v464_v23 = vsub.f32 1.5, %v463_v19  ;;  %v487_v24 = vmul.f32 0.5, %v486_v20 }
  0xec   : > { %v476_v26 = vsub.f32 1.5, %v475_v21 }
  0xed   : > { %v465_v32 = vmul.f32 %v749_v10, %v464_v23  ;;  %v488_v35 = vsub.f32 1.5, %v487_v24 }
  0xee   : > { %v477_v36 = vmul.f32 %v751_v11, %v476_v26 }
  0xef   : > { %v466_v37 = vmul.f32 %v465_v32, %v457_v7  ;;  %v489_v38 = vmul.f32 %v753_v13, %v488_v35 }
  0xf0   : > { %v478_v40 = vmul.f32 %v477_v36, %v458_v8 }
  0xf1   : > { %v468_v44 = vsel %vm467_vm5, %v457_v7, %v466_v37  ;;  %v490_v41 = vmul.f32 %v489_v38, %v459_v9 }
  0xf2   : > { %v471_v42 = vsel %vm469_vm6, %v470_v39, %v468_v44  ;;  %v480_v46 = vsel %vm479_vm7, %v458_v8, %v478_v40 }
  0xf3   : > { %v483_v48 = vsel %vm481_vm8, %v482_v31, %v480_v46  ;;  %v492_v49 = vsel %vm491_vm9, %v459_v9, %v490_v41  ;;  %v504_v27 = vmul.f32 %v498_v22, %v471_v42 }
  0xf4   : > { %v495_v28 = vsel %vm493_vm10, %v494_v43, %v492_v49  ;;  %v505_v53 = vmul.f32 %v499_v25, %v483_v48  ;;  %v531_v25 = vshll.u32 %v944_v45, 16 }
  0xf5   : > { %v506_v29 = vmul.f32 %v500_v34, %v495_v28  ;;  %v538_v34 = vshll.u32 %v951_v50, 16 }
  0xf6   : > { %v507_v55 = vpack.c.bf16 %v505_v53, %v504_v27  ;;  %v533_v60 = vor.u32 %v531_v25, %v959_v56  ;;  %v672_v56 = vld [vmem:[%s967_s5 + $0x14] sm:$0xf] (%p825_p4) }
  0xf7   : > { %v508_v58 = vpack.c.bf16 %v506_v29, %v506_v29  ;;  %v540_v51 = vor.u32 %v538_v34, %v965_v59  ;;  %673 = vst [vmem:[%s575_s9 + $0x20] sm:$0xf] (%p825_p4), %v672_v56 }
  0xf8   : > { %v517_v22 = vsel %vm515_vm4, %v507_v55, %v516_v54 }
  0xf9   : > { %518 = vst [vmem:[%s967_s5] sm:$0x11] %v517_v22  ;;  %v520_v15 = vsel %vm947_vm2, %v508_v58, %v519_v57 }
  0xfa   : > { %521 = vst [vmem:[%s967_s5 + $0x8] sm:$0x1] %v520_v15 }
  0xff   : > { %572 = sbr.rel (!%p825_p4) target bundleno = 268 (0x10c), region = 36 }
 0x100   : > { %v554_v61 = vld [vmem:[%s967_s5] sm:$0xff] }
 0x101   : > { %v555_v62 = vsel %vm553_vm1, %v533_v60, %v554_v61  ;;  %v557_v30 = vld [vmem:[%s967_s5 + $0x8] sm:$0xf] }
 0x102   : > { %556 = vst [vmem:[%s967_s5] sm:$0xff] %v555_v62  ;;  %v558_v33 = vsel %vm549_vm15, %v540_v51, %v557_v30 }
 0x103   : > { %559 = vst [vmem:[%s967_s5 + $0x8] sm:$0xf] %v558_v33 }
 0x109   : > { %v590_v45 = vld [vmem:[%s967_s5] sm:$0xff] }
 0x10a   : > { %v670_v50 = vld [vmem:[%s967_s5 + $0x8] sm:$0xf]  ;;  %591 = vst [vmem:[%s575_s9] sm:$0xff] %v590_v45 }
 0x10b   : > { %671 = vst [vmem:[%s575_s9 + $0x8] sm:$0xf] %v670_v50 }
 0x10c PF: > { %p10_p8 = scmp.ge.s32.totalorder %s815_s16, 4   ;;  %s1036_s12 = smov %s772_s13 }
 0x10d   : > { %s1037_s13 = smov %s823_s19  ;;  %s1038_s14 = smov %s815_s16 }
 0x10e   :  { %12 = sbr.rel (!%p10_p8) target bundleno = 2 (0x2), region = 94 }

// kernel: lorentz_basic_block.15
= control target key start
LH: loop header
LB: loop body
LE: loop exit
PB: predicated region body
PF: predicated region fallthrough
CT: control target
= control target key end

     0   :  { %s1378_s18 = smov 0   ;;  %s1380_s19 = smov 0   ;;  %s1977_s0 = inlined_call_operand.vmem [shape: f32[8,768], index: 0, kind: input, shape index: {}]   ;;  %s1978_s1 = inlined_call_operand.vmem [shape: f32[8,768], index: 1, kind: input, shape index: {}]   ;;  %s1979_s2 = inlined_call_operand.vmem [shape: f32[8,2], index: 2, kind: input, shape index: {}]   ;;  %s1980_s3 = inlined_call_operand.vmem [shape: f32[8,2], index: 3, kind: input, shape index: {}]   ;;  %s1981_s4 = inlined_call_operand.vmem [shape: f32[1,384], index: 4, kind: input, shape index: {}]   ;;  %s1982_s5 = inlined_call_operand.vmem [shape: f32[9,768], index: 5, kind: output, shape index: {}]  }
   0x1   :  { %s1382_s20 = smov 0  }
   0x2 LB: > { %s1391_s21 = sadd.s32 4294967295, %s1344_s20   ;;  %s1393_s22 = sadd.s32 1, %s1344_s20   ;;  %s1344_s20 = sphi %s1382_s20, %s1998_s20   ;;  %s1340_s19 = sphi %s1380_s19, %s1997_s19   ;;  %s1336_s18 = sphi %s1378_s18, %s1996_s18  }
   0x3   : > { %s134_s23 = ssub.s32 %s1344_s20, %s1393_s22  ;;  %s137_s24 = sadd.s32 1, %s1340_s19 }
   0x4   : > { %p135_p0 = scmp.eq.s32.totalorder %s134_s23, 0  ;;  %p147_p1 = scmp.ne.s32.totalorder %s1340_s19, %s1336_s18 }
   0x5   : > { %p148_p2 = scmp.eq.s32.totalorder %s1391_s21, 1  ;;  %p1177_p3 = scmp.ge.s32.totalorder %s1344_s20, 1 }
   0x6   : > { %s1401_s25 = scalar_select %p135_p0, %s1340_s19, %s137_s24  }
   0x7   : > { %p1403_p4 = por %p148_p2, %p147_p1  ;;  %p199_p5 = scmp.lt.s32.totalorder %s1344_s20, 3 }
   0x9   : > { %p200_p6 = pnand %p1177_p3, %p199_p5 }
   0xa   : > { %s231_s29 = smul.u32 (!%p200_p6), 3, %s1391_s21  ;;  %s228_s16 = sand.u32 (!%p200_p6), 1, %s1336_s18  }
   0xb   : > { %203 = sbr.rel (%p200_p6) target bundleno = 333 (0x14d), region = 40 }
   0xc   : > { %p232_p7 = scmp.lt.s32.totalorder (!%p200_p6), %s231_s29, 5  ;;  %s1184_s17 = smul.u32 (!%p200_p6), 48, %s228_s16 }
   0xe   : > { %s1938_s18 = scalar_lea.vmem (!%p200_p6), [#allocation2], %s1184_s17 }
  0x10   : > { %v247_v0 = vld [vmem:[%s1979_s2] sm:$0xff]  ;;  %v1346_v1 = vmov 1   ;;  %v1347_v2 = vmov 0   ;;  %s2000_s29 = smov (!%p232_p7, %s231_s29), 5  ;;  %s1183_s20 = smul.u32 (%p1403_p4), 24, %s1391_s21 }
  0x11   : > { %1212 = vset.pattern.permute.xlu1 %v1346_v1  ;;  %1211 = vset.pattern.permute.xlu0 %v1347_v2  ;;  %s1178_s30 = sshll.u32 %s2000_s29, 3  ;;  %v512_v3 = vld [vmem:[%s1980_s3] sm:$0xff] }
  0x12   : > { %404 = vperm.xlu1 %1212, %v247_v0   ;;  %397 = vperm.xlu0 %1211, %v247_v0   ;;  %s235_s10 = scalar_lea.vmem %s1977_s0, %s1178_s30  ;;  %s241_s13 = scalar_lea.vmem %s1978_s1, %s1178_s30 }
  0x13   : > { %v1420_v4 = vld [vmem:[%s235_s10] sm:$0xff]  ;;  %v1422_v5 = vld [vmem:[%s235_s10 + $0x8] sm:$0xff]  ;;  %v1424_v6 = vld [vmem:[%s235_s10 + $0x10] sm:$0xff]  ;;  %s1083_s27 = scalar_lea.vmem (%p1403_p4), %s1982_s5, %s1183_s20 }
  0x14   : > { %v248_v7 = vmul.f32 %v1420_v4, %v1420_v4  ;;  %v249_v8 = vmul.f32 %v1422_v5, %v1422_v5  ;;  %v250_v9 = vmul.f32 %v1424_v6, %v1424_v6  ;;  %v1441_v31 = vld [vmem:[%s241_s13] sm:$0xff]  ;;  %v1443_v32 = vld [vmem:[%s241_s13 + $0x8] sm:$0xff]  ;;  %v1445_v33 = vld [vmem:[%s241_s13 + $0x10] sm:$0xff] }
  0x15   : > { %v513_v34 = vmul.f32 %v1441_v31, %v1441_v31  ;;  %v514_v35 = vmul.f32 %v1443_v32, %v1443_v32  ;;  %v515_v36 = vmul.f32 %v1445_v33, %v1445_v33 }
  0x16   : > { %v251_v10 = vrot.slane %v248_v7, 4  ;;  %v257_v11 = vrot.slane %v249_v8, 4  ;;  %v263_v12 = vrot.slane %v250_v9, 4 }
  0x17   : > { %v516_v37 = vrot.slane %v513_v34, 4  ;;  %v522_v38 = vrot.slane %v514_v35, 4  ;;  %v528_v39 = vrot.slane %v515_v36, 4 }
  0x18   : > { %v252_v13 = vadd.f32 %v251_v10, %v248_v7  ;;  %v258_v14 = vadd.f32 %v257_v11, %v249_v8  ;;  %v264_v15 = vadd.f32 %v263_v12, %v250_v9 }
  0x19   : > { %v517_v40 = vadd.f32 %v516_v37, %v513_v34  ;;  %v523_v41 = vadd.f32 %v522_v38, %v514_v35  ;;  %v529_v42 = vadd.f32 %v528_v39, %v515_v36 }
  0x1a   : > { %669 = vperm.xlu1 %1212, %v512_v3   ;;  %662 = vperm.xlu0 %1211, %v512_v3   ;;  %v253_v16 = vrot.slane %v252_v13, 2  ;;  %v259_v17 = vrot.slane %v258_v14, 2  ;;  %v265_v18 = vrot.slane %v264_v15, 2 }
  0x1b   : > { %v518_v44 = vrot.slane %v517_v40, 2  ;;  %v524_v45 = vrot.slane %v523_v41, 2  ;;  %v530_v46 = vrot.slane %v529_v42, 2 }
  0x1c   : > { %v254_v19 = vadd.f32 %v253_v16, %v252_v13  ;;  %v260_v20 = vadd.f32 %v259_v17, %v258_v14  ;;  %v266_v21 = vadd.f32 %v265_v18, %v264_v15 }
  0x1d   : > { %v519_v51 = vadd.f32 %v518_v44, %v517_v40  ;;  %v525_v52 = vadd.f32 %v524_v45, %v523_v41  ;;  %v531_v53 = vadd.f32 %v530_v46, %v529_v42 }
  0x1e   : > { %v255_v22 = vrot.slane %v254_v19, 1  ;;  %v261_v23 = vrot.slane %v260_v20, 1  ;;  %v267_v24 = vrot.slane %v266_v21, 1 }
  0x1f   : > { %v520_v57 = vrot.slane %v519_v51, 1  ;;  %v526_v58 = vrot.slane %v525_v52, 1  ;;  %v532_v59 = vrot.slane %v531_v53, 1 }
  0x20   : > { %v256_v25 = vadd.f32 %v255_v22, %v254_v19  ;;  %v262_v26 = vadd.f32 %v261_v23, %v260_v20  ;;  %v268_v27 = vadd.f32 %v267_v24, %v266_v21 }
  0x21   : > { %v521_v63 = vadd.f32 %v520_v57, %v519_v51  ;;  %v527_v0 = vadd.f32 %v526_v58, %v525_v52 }
  0x22   : > { %1213 = vset.pattern.permute.xlu0 %v1346_v1  ;;  %v1435_v28 = vmax.f32 %v256_v25, 1e-30  ;;  %v1437_v29 = vmax.f32 %v262_v26, 1e-30  ;;  %v1439_v30 = vmax.f32 %v268_v27, 1e-30  ;;  %v533_v1 = vadd.f32 %v532_v59, %v531_v53 }
  0x23   : > { %v1471_v8 = vmax.f32 %v521_v63, 1e-30  ;;  %v1479_v12 = vmax.f32 %v527_v0, 1e-30 }
  0x24   : > { %1214 = vrsqrt.f32 %v1435_v28  ;;  %v1481_v13 = vmax.f32 %v533_v1, 1e-30  ;;  %vm279_vm0 = vcmp.eq.f32.partialorder %v1435_v28, inf  ;;  %v282_v15 = vand.u32 2147483648, %v1435_v28 }
  0x25   : > { %1216 = vrsqrt.f32 %v1437_v29  ;;  %vm291_vm1 = vcmp.eq.f32.partialorder %v1437_v29, inf  ;;  %vm281_vm2 = vcmp.eq.f32.partialorder %v1435_v28, 0.0  ;;  %vm293_vm3 = vcmp.eq.f32.partialorder %v1437_v29, 0.0 }
  0x26   : > { %1218 = vrsqrt.f32 %v1439_v30  ;;  %v294_v17 = vand.u32 2147483648, %v1437_v29  ;;  %vm303_vm4 = vcmp.eq.f32.partialorder %v1439_v30, inf  ;;  %vm305_vm5 = vcmp.eq.f32.partialorder %v1439_v30, 0.0 }
  0x27   : > { %1220 = vrsqrt.f32 %v1471_v8  ;;  %v306_v22 = vand.u32 2147483648, %v1439_v30  ;;  %vm544_vm6 = vcmp.eq.f32.partialorder %v1471_v8, inf  ;;  %v547_v63 = vand.u32 2147483648, %v1471_v8 }
  0x28   : > { %1222 = vrsqrt.f32 %v1479_v12  ;;  %vm546_vm7 = vcmp.eq.f32.partialorder %v1471_v8, 0.0  ;;  %vm556_vm8 = vcmp.eq.f32.partialorder %v1479_v12, inf  ;;  %vm558_vm9 = vcmp.eq.f32.partialorder %v1479_v12, 0.0 }
  0x29   : > { %1224 = vrsqrt.f32 %v1481_v13  ;;  %vm568_vm10 = vcmp.eq.f32.partialorder %v1481_v13, inf  ;;  %vm570_vm11 = vcmp.eq.f32.partialorder %v1481_v13, 0.0 }
  0x2a   : > { %v1456_v43 = vpop.eup %1214 }
  0x2b   : > { %v1458_v47 = vpop.eup %1216  ;;  %v273_v48 = vmul.f32 %v1456_v43, %v1435_v28 }
  0x2c   : > { %v1462_v49 = vpop.eup %1218  ;;  %v285_v50 = vmul.f32 %v1458_v47, %v1437_v29 }
  0x2d   : > { %v274_v54 = vmul.f32 %v1456_v43, %v273_v48  ;;  %v297_v55 = vmul.f32 %v1462_v49, %v1439_v30  ;;  %v1512_v26 = vpop.eup %1220 }
  0x2e   : > { %v286_v56 = vmul.f32 %v1458_v47, %v285_v50  ;;  %v538_v36 = vmul.f32 %v1512_v26, %v1471_v8  ;;  %v1529_v41 = vpop.eup %1222 }
  0x2f   : > { %v275_v60 = vmul.f32 0.5, %v274_v54  ;;  %v298_v61 = vmul.f32 %v1462_v49, %v297_v55  ;;  %v1532_v42 = vpop.eup %1224  ;;  %v550_v46 = vmul.f32 %v1529_v41, %v1479_v12 }
  0x30   : > { %v287_v62 = vmul.f32 0.5, %v286_v56  ;;  %v539_v40 = vmul.f32 %v1512_v26, %v538_v36  ;;  %v562_v48 = vmul.f32 %v1532_v42, %v1481_v13 }
  0x31   : > { %v276_v2 = vsub.f32 1.5, %v275_v60  ;;  %v299_v3 = vmul.f32 0.5, %v298_v61  ;;  %v551_v51 = vmul.f32 %v1529_v41, %v550_v46 }
  0x32   : > { %v288_v7 = vsub.f32 1.5, %v287_v62  ;;  %v540_v45 = vmul.f32 0.5, %v539_v40  ;;  %v563_v52 = vmul.f32 %v1532_v42, %v562_v48 }
  0x33   : > { %v1474_v9 = vmul.f32 %v1456_v43, %v276_v2  ;;  %v300_v10 = vsub.f32 1.5, %v299_v3  ;;  %v552_v55 = vmul.f32 0.5, %v551_v51 }
  0x34   : > { %v1477_v11 = vmul.f32 %v1458_v47, %v288_v7  ;;  %v541_v50 = vsub.f32 1.5, %v540_v45  ;;  %v564_v59 = vmul.f32 0.5, %v563_v52  ;;  %v559_v7 = vand.u32 2147483648, %v1479_v12 }
  0x35   : > { %v278_v14 = vmul.f32 %v1474_v9, %v1435_v28  ;;  %v1496_v19 = vmul.f32 %v1462_v49, %v300_v10  ;;  %v553_v58 = vsub.f32 1.5, %v552_v55 }
  0x36   : > { %v290_v16 = vmul.f32 %v1477_v11, %v1437_v29  ;;  %v1544_v54 = vmul.f32 %v1512_v26, %v541_v50  ;;  %v565_v10 = vsub.f32 1.5, %v564_v59 }
  0x37   : > { %v280_v18 = vsel %vm279_vm0, %v1435_v28, %v278_v14  ;;  %v302_v24 = vmul.f32 %v1496_v19, %v1439_v30  ;;  %v1553_v0 = vmul.f32 %v1529_v41, %v553_v58 }
  0x38   : > { %v1500_v20 = vsel %vm281_vm2, %v282_v15, %v280_v18  ;;  %v292_v21 = vsel %vm291_vm1, %v1437_v29, %v290_v16  ;;  %v543_v57 = vmul.f32 %v1544_v54, %v1471_v8  ;;  %v1565_v16 = vmul.f32 %v1532_v42, %v565_v10 }
  0x39   : > { %v1505_v23 = vsel %vm293_vm3, %v294_v17, %v292_v21  ;;  %v308_v25 = vmul.f32 %v1500_v20, %v1500_v20  ;;  %v304_v34 = vsel %vm303_vm4, %v1439_v30, %v302_v24  ;;  %v555_v3 = vmul.f32 %v1553_v0, %v1479_v12 }
  0x3a   : > { %v309_v27 = vmul.f32 %v1505_v23, %v1505_v23  ;;  %v1521_v37 = vsel %vm305_vm5, %v306_v22, %v304_v34  ;;  %v545_v2 = vsel %vm544_vm6, %v1471_v8, %v543_v57  ;;  %v567_v24 = vmul.f32 %v1565_v16, %v1481_v13 }
  0x3b   : > { %v1517_v35 = vadd.f32 1.0, %v308_v25  ;;  %v310_v39 = vmul.f32 %v1521_v37, %v1521_v37  ;;  %v557_v15 = vsel %vm556_vm8, %v1479_v12, %v555_v3  ;;  %v1567_v18 = vsel %vm546_vm7, %v547_v63, %v545_v2 }
  0x3c   : > { %v1523_v38 = vadd.f32 1.0, %v309_v27  ;;  %v1569_v21 = vsel %vm558_vm9, %v559_v7, %v557_v15  ;;  %v571_v25 = vand.u32 2147483648, %v1481_v13  ;;  %v573_v34 = vmul.f32 %v1567_v18, %v1567_v18 }
  0x3d   : > { %1226 = vrsqrt.f32 %v1517_v35  ;;  %v1534_v44 = vadd.f32 1.0, %v310_v39  ;;  %v574_v36 = vmul.f32 %v1569_v21, %v1569_v21  ;;  %v569_v45 = vsel %vm568_vm10, %v1481_v13, %v567_v24 }
  0x3e   : > { %1228 = vrsqrt.f32 %v1523_v38  ;;  %v1581_v46 = vsel %vm570_vm11, %v571_v25, %v569_v45  ;;  %v1585_v51 = vadd.f32 1.0, %v573_v34  ;;  %vm321_vm12 = vcmp.eq.f32.partialorder %v1517_v35, inf }
  0x3f   : > { %1230 = vrsqrt.f32 %v1534_v44  ;;  %v575_v50 = vmul.f32 %v1581_v46, %v1581_v46  ;;  %v1587_v52 = vadd.f32 1.0, %v574_v36  ;;  %vm333_vm13 = vcmp.eq.f32.partialorder %v1523_v38, inf }
  0x40   : > { %1232 = vrsqrt.f32 %v1585_v51  ;;  %v324_v10 = vand.u32 2147483648, %v1517_v35  ;;  %vm345_vm14 = vcmp.eq.f32.partialorder %v1534_v44, inf  ;;  %vm323_vm15 = vcmp.eq.f32.partialorder %v1517_v35, 0.0 }
  0x41   : > { %v1589_v58 = vadd.f32 1.0, %v575_v50  ;;  %1234 = vrsqrt.f32 %v1587_v52  ;;  %v336_v15 = vand.u32 2147483648, %v1523_v38  ;;  %vm335_vm0 = vcmp.eq.f32.partialorder %v1523_v38, 0.0 }
  0x42   : > { %v348_v24 = vand.u32 2147483648, %v1534_v44  ;;  %vm347_vm1 = vcmp.eq.f32.partialorder %v1534_v44, 0.0  ;;  %vm586_vm2 = vcmp.eq.f32.partialorder %v1585_v51, inf  ;;  %vm598_vm3 = vcmp.eq.f32.partialorder %v1587_v52, inf }
  0x43   : > { %v1227_v53 = vpop.eup %1226  ;;  %1236 = vrsqrt.f32 %v1589_v58  ;;  %vm588_vm4 = vcmp.eq.f32.partialorder %v1585_v51, 0.0  ;;  %vm600_vm5 = vcmp.eq.f32.partialorder %v1587_v52, 0.0  ;;  %vm610_vm6 = vcmp.eq.f32.partialorder %v1589_v58, inf }
  0x44   : > { %v1229_v56 = vpop.eup %1228  ;;  %v315_v61 = vmul.f32 %v1227_v53, %v1517_v35  ;;  %vm612_vm7 = vcmp.eq.f32.partialorder %v1589_v58, 0.0  ;;  %vm365_vm8 = vweird.f32 %v1435_v28  ;;  %vm366_vm9 = vweird.f32 %v1456_v43 }
  0x45   : > { %v1231_v60 = vpop.eup %1230  ;;  %v327_v62 = vmul.f32 %v1229_v56, %v1523_v38  ;;  %vm375_vm10 = vweird.f32 %v1437_v29  ;;  %vm376_vm11 = vweird.f32 %v1458_v47 }
  0x46   : > { %v339_v1 = vmul.f32 %v1231_v60, %v1534_v44  ;;  %v316_v14 = vmul.f32 %v1227_v53, %v315_v61 }
  0x47   : > { %v328_v17 = vmul.f32 %v1229_v56, %v327_v62 }
  0x48   : > { %v340_v22 = vmul.f32 %v1231_v60, %v339_v1  ;;  %v317_v27 = vmul.f32 0.5, %v316_v14  ;;  %v1233_v1 = vpop.eup %1232 }
  0x49   : > { %v329_v39 = vmul.f32 0.5, %v328_v17  ;;  %v1235_v3 = vpop.eup %1234 }
  0x4a   : > { %v341_v40 = vmul.f32 0.5, %v340_v22  ;;  %v318_v48 = vsub.f32 1.5, %v317_v27 }
  0x4b   : > { %v330_v55 = vsub.f32 1.5, %v329_v39 }
  0x4c   : > { %v342_v57 = vsub.f32 1.5, %v341_v40  ;;  %v319_v59 = vmul.f32 %v1227_v53, %v318_v48  ;;  %v580_v53 = vmul.f32 %v1233_v1, %v1585_v51 }
  0x4d   : > { %v331_v61 = vmul.f32 %v1229_v56, %v330_v55  ;;  %v592_v56 = vmul.f32 %v1235_v3, %v1587_v52 }
  0x4e   : > { %v343_v62 = vmul.f32 %v1231_v60, %v342_v57  ;;  %v320_v63 = vmul.f32 %v319_v59, %v1517_v35  ;;  %v1237_v60 = vpop.eup %1236  ;;  %v581_v17 = vmul.f32 %v1233_v1, %v580_v53 }
  0x4f   : > { %v332_v2 = vmul.f32 %v331_v61, %v1523_v38  ;;  %v593_v25 = vmul.f32 %v1235_v3, %v592_v56  ;;  %v604_v40 = vmul.f32 %v1237_v60, %v1589_v58 }
  0x50   : > { %v344_v7 = vmul.f32 %v343_v62, %v1534_v44  ;;  %v322_v14 = vsel %vm321_vm12, %v1517_v35, %v320_v63  ;;  %v582_v34 = vmul.f32 0.5, %v581_v17  ;;  %vm385_vm12 = vweird.f32 %v1439_v30 }
  0x51   : > { %v334_v22 = vsel %vm333_vm13, %v1523_v38, %v332_v2  ;;  %v325_v36 = vsel %vm323_vm15, %v324_v10, %v322_v14  ;;  %v594_v39 = vmul.f32 0.5, %v593_v25  ;;  %v605_v55 = vmul.f32 %v1237_v60, %v604_v40  ;;  %vm1643_vm15 = vmor %vm375_vm10, %vm376_vm11 }
  0x52   : > { %v346_v27 = vsel %vm345_vm14, %v1534_v44, %v344_v7  ;;  %v337_v35 = vsel %vm335_vm0, %v336_v15, %v334_v22  ;;  %v583_v45 = vsub.f32 1.5, %v582_v34  ;;  %v350_v57 = vadd.f32 %v325_v36, %v1500_v20  ;;  %vm1638_vm14 = vmor %vm365_vm8, %vm366_vm9 }
  0x53   : > { %v349_v48 = vsel %vm347_vm1, %v348_v24, %v346_v27  ;;  %v595_v50 = vsub.f32 1.5, %v594_v39  ;;  %v351_v59 = vadd.f32 %v337_v35, %v1505_v23  ;;  %v606_v62 = vmul.f32 0.5, %v605_v55 }
  0x54   : > { %v584_v38 = vmul.f32 %v1233_v1, %v583_v45  ;;  %v352_v44 = vadd.f32 %v349_v48, %v1521_v37  ;;  %v589_v2 = vand.u32 2147483648, %v1585_v51  ;;  %v601_v20 = vand.u32 2147483648, %v1587_v52 }
  0x55   : > { %v596_v61 = vmul.f32 %v1235_v3, %v595_v50  ;;  %v607_v1 = vsub.f32 1.5, %v606_v62  ;;  %1238 = vlog2.f32 %v350_v57  ;;  %v613_v10 = vand.u32 2147483648, %v1589_v58 }
  0x56   : > { %v585_v63 = vmul.f32 %v584_v38, %v1585_v51  ;;  %1240 = vlog2.f32 %v351_v59  ;;  %vm386_vm13 = vweird.f32 %v1462_v49  ;;  %v368_v27 = vsel %vm1638_vm14, %v1456_v43, %v1474_v9 }
  0x57   : > { %v597_v7 = vmul.f32 %v596_v61, %v1587_v52  ;;  %v608_v3 = vmul.f32 %v1237_v60, %v607_v1  ;;  %1242 = vlog2.f32 %v352_v44  ;;  %vm1647_vm0 = vmor %vm385_vm12, %vm386_vm13  ;;  %vm630_vm1 = vweird.f32 %v1471_v8 }
  0x58   : > { %v587_v23 = vsel %vm586_vm2, %v1585_v51, %v585_v63  ;;  %v388_v34 = vsel %vm1647_vm0, %v1462_v49, %v1496_v19  ;;  %vm631_vm2 = vweird.f32 %v1512_v26 }
  0x59   : > { %v599_v37 = vsel %vm598_vm3, %v1587_v52, %v597_v7  ;;  %v590_v53 = vsel %vm588_vm4, %v589_v2, %v587_v23  ;;  %v609_v14 = vmul.f32 %v608_v3, %v1589_v58  ;;  %vm640_vm3 = vweird.f32 %v1479_v12 }
  0x5a   : > { %v602_v56 = vsel %vm600_vm5, %v601_v20, %v599_v37  ;;  %v615_v52 = vadd.f32 %v590_v53, %v1567_v18  ;;  %vm641_vm4 = vweird.f32 %v1529_v41  ;;  %vm650_vm5 = vweird.f32 %v1481_v13 }
  0x5b   : > { %v611_v51 = vsel %vm610_vm6, %v1589_v58, %v609_v14  ;;  %v1239_v60 = vpop.eup %1238  ;;  %v616_v17 = vadd.f32 %v602_v56, %v1569_v21  ;;  %vm651_vm6 = vweird.f32 %v1532_v42  ;;  %vm1673_vm8 = vmor %vm640_vm3, %vm641_vm4 }
  0x5c   : > { %v614_v15 = vsel %vm612_vm7, %v613_v10, %v611_v51  ;;  %v1241_v22 = vpop.eup %1240  ;;  %1244 = vlog2.f32 %v615_v52  ;;  %v354_v30 = vmul.f32 0.6931472, %v1239_v60  ;;  %vm1669_vm7 = vmor %vm630_vm1, %vm631_vm2  ;;  %v643_v55 = vsel %vm1673_vm8, %v1529_v41, %v1553_v0 }
  0x5d   : > { %v617_v29 = vadd.f32 %v614_v15, %v1581_v46  ;;  %v1243_v24 = vpop.eup %1242  ;;  %1246 = vlog2.f32 %v616_v17  ;;  %v356_v21 = vmul.f32 0.6931472, %v1241_v22  ;;  %v378_v46 = vsel %vm1643_vm15, %v1458_v47, %v1477_v11  ;;  %vm1677_vm9 = vmor %vm650_vm5, %vm651_vm6 }
  0x5e   : > { %v358_v25 = vmul.f32 0.6931472, %v1243_v24  ;;  %v389_v36 = vmul.f32 %v368_v27, %v354_v30  ;;  %v633_v50 = vsel %vm1669_vm7, %v1512_v26, %v1544_v54 }
  0x5f   : > { %1248 = vlog2.f32 %v617_v29  ;;  %v390_v9 = vmul.f32 %v378_v46, %v356_v21 }
  0x60   : > { %v391_v39 = vmul.f32 %v388_v34, %v358_v25  ;;  %v392_v19 = vmul.f32 %v389_v36, %v1420_v4  ;;  %v653_v4 = vsel %vm1677_vm9, %v1532_v42, %v1565_v16 }
  0x61   : > { %v393_v13 = vmul.f32 %v390_v9, %v1422_v5 }
  0x62   : > { %v1245_v43 = vpop.eup %1244  ;;  %v394_v40 = vmul.f32 %v391_v39, %v1424_v6 }
  0x63   : > { %v1247_v47 = vpop.eup %1246  ;;  %v619_v35 = vmul.f32 0.6931472, %v1245_v43 }
  0x64   : > { %v621_v45 = vmul.f32 0.6931472, %v1247_v47 }
  0x65   : > { %v1249_v49 = vpop.eup %1248  ;;  %v654_v61 = vmul.f32 %v633_v50, %v619_v35 }
  0x66   : > { %v623_v48 = vmul.f32 0.6931472, %v1249_v49  ;;  %v655_v62 = vmul.f32 %v643_v55, %v621_v45 }
  0x67   : > { %v657_v16 = vmul.f32 %v654_v61, %v1441_v31 }
  0x68   : > { %v656_v44 = vmul.f32 %v653_v4, %v623_v48  ;;  %v658_v2 = vmul.f32 %v655_v62, %v1443_v32 }
  0x6a   : > { %v659_v7 = vmul.f32 %v656_v44, %v1445_v33 }
  0x84   : > { %v405_v5 = vpop.permute.xlu1 %404  ;;  %v398_v6 = vpop.permute.xlu0 %397 }
  0x85   : > { %v400_v57 = vmul.f32 %v398_v6, %v392_v19  ;;  %v401_v38 = vmul.f32 %v398_v6, %v393_v13  ;;  %v402_v59 = vmul.f32 %v398_v6, %v394_v40 }
  0x87   : > { %v1696_v63 = vadd.f32 %v405_v5, %v400_v57  ;;  %v1698_v26 = vadd.f32 %v405_v5, %v401_v38  ;;  %v1700_v54 = vadd.f32 %v405_v5, %v402_v59 }
  0x89   : > { %v410_v41 = vmul.f32 %v1696_v63, %v1696_v63  ;;  %v411_v42 = vmul.f32 %v1698_v26, %v1698_v26  ;;  %v412_v0 = vmul.f32 %v1700_v54, %v1700_v54 }
  0x8b   : > { %v413_v20 = vrot.slane %v410_v41, 4  ;;  %v419_v1 = vrot.slane %v411_v42, 4  ;;  %v425_v23 = vrot.slane %v412_v0, 4 }
  0x8c   : > { %v663_v37 = vpop.permute.xlu0 %662  ;;  %v670_v14 = vpop.permute.xlu1 %669 }
  0x8d   : > { %v414_v3 = vadd.f32 %v413_v20, %v410_v41  ;;  %v420_v53 = vadd.f32 %v419_v1, %v411_v42  ;;  %v426_v10 = vadd.f32 %v425_v23, %v412_v0  ;;  %v665_v56 = vmul.f32 %v663_v37, %v657_v16 }
  0x8e   : > { %v666_v51 = vmul.f32 %v663_v37, %v658_v2  ;;  %v667_v52 = vmul.f32 %v663_v37, %v659_v7 }
  0x8f   : > { %v415_v60 = vrot.slane %v414_v3, 2  ;;  %v421_v15 = vrot.slane %v420_v53, 2  ;;  %v427_v17 = vrot.slane %v426_v10, 2  ;;  %v1711_v22 = vadd.f32 %v670_v14, %v665_v56 }
  0x90   : > { %v1713_v31 = vadd.f32 %v670_v14, %v666_v51  ;;  %v1715_v32 = vadd.f32 %v670_v14, %v667_v52 }
  0x91   : > { %v416_v33 = vadd.f32 %v415_v60, %v414_v3  ;;  %v422_v28 = vadd.f32 %v421_v15, %v420_v53  ;;  %v428_v29 = vadd.f32 %v427_v17, %v426_v10  ;;  %v675_v24 = vmul.f32 %v1711_v22, %v1711_v22 }
  0x92   : > { %v676_v58 = vmul.f32 %v1713_v31, %v1713_v31  ;;  %v677_v18 = vmul.f32 %v1715_v32, %v1715_v32 }
  0x93   : > { %v417_v30 = vrot.slane %v416_v33, 1  ;;  %v423_v21 = vrot.slane %v422_v28, 1  ;;  %v429_v25 = vrot.slane %v428_v29, 1  ;;  %v678_v27 = vrot.slane %v675_v24, 4 }
  0x94   : > { %v684_v46 = vrot.slane %v676_v58, 4  ;;  %v690_v34 = vrot.slane %v677_v18, 4 }
  0x95   : > { %v418_v36 = vadd.f32 %v417_v30, %v416_v33  ;;  %v424_v43 = vadd.f32 %v423_v21, %v422_v28  ;;  %v430_v9 = vadd.f32 %v429_v25, %v428_v29  ;;  %v679_v39 = vadd.f32 %v678_v27, %v675_v24 }
  0x96   : > { %v685_v47 = vadd.f32 %v684_v46, %v676_v58  ;;  %v691_v11 = vadd.f32 %v690_v34, %v677_v18 }
  0x97   : > { %v431_v49 = vmax.f32 %v418_v36, 1e-30  ;;  %v1723_v8 = vmax.f32 %v424_v43, 1e-30  ;;  %v1725_v12 = vmax.f32 %v430_v9, 1e-30 }
  0x98   : > { %v680_v19 = vrot.slane %v679_v39, 2  ;;  %v686_v13 = vrot.slane %v685_v47, 2  ;;  %v692_v40 = vrot.slane %v691_v11, 2 }
  0x99   : > { %1250 = vrsqrt.f32 %v431_v49  ;;  %vm441_vm10 = vcmp.eq.f32.partialorder %v431_v49, inf  ;;  %vm443_vm11 = vcmp.eq.f32.partialorder %v431_v49, 0.0  ;;  %v444_v60 = vand.u32 2147483648, %v431_v49 }
  0x9a   : > { %1252 = vrsqrt.f32 %v1723_v8  ;;  %v681_v35 = vadd.f32 %v680_v19, %v679_v39  ;;  %v687_v45 = vadd.f32 %v686_v13, %v685_v47  ;;  %v693_v48 = vadd.f32 %v692_v40, %v691_v11 }
  0x9b   : > { %1254 = vrsqrt.f32 %v1725_v12  ;;  %vm453_vm12 = vcmp.eq.f32.partialorder %v1723_v8, inf  ;;  %vm455_vm13 = vcmp.eq.f32.partialorder %v1723_v8, 0.0  ;;  %v456_v28 = vand.u32 2147483648, %v1723_v8 }
  0x9c   : > { %v682_v50 = vrot.slane %v681_v35, 1  ;;  %v688_v55 = vrot.slane %v687_v45, 1  ;;  %v694_v4 = vrot.slane %v693_v48, 1  ;;  %vm465_vm14 = vcmp.eq.f32.partialorder %v1725_v12, inf }
  0x9d   : > { %v468_v27 = vand.u32 2147483648, %v1725_v12  ;;  %vm467_vm15 = vcmp.eq.f32.partialorder %v1725_v12, 0.0 }
  0x9e   : > { %v683_v38 = vadd.f32 %v682_v50, %v681_v35  ;;  %v689_v59 = vadd.f32 %v688_v55, %v687_v45  ;;  %v695_v61 = vadd.f32 %v694_v4, %v693_v48 }
  0x9f   : > { %v1251_v5 = vpop.eup %1250 }
  0xa0   : > { %v1253_v6 = vpop.eup %1252  ;;  %v435_v57 = vmul.f32 %v1251_v5, %v431_v49  ;;  %v1731_v0 = vmax.f32 %v683_v38, 1e-30  ;;  %v1733_v16 = vmax.f32 %v689_v59, 1e-30  ;;  %v1735_v7 = vmax.f32 %v695_v61, 1e-30 }
  0xa1   : > { %v1255_v62 = vpop.eup %1254  ;;  %v447_v44 = vmul.f32 %v1253_v6, %v1723_v8 }
  0xa2   : > { %v436_v41 = vmul.f32 %v1251_v5, %v435_v57  ;;  %v459_v42 = vmul.f32 %v1255_v62, %v1725_v12  ;;  %1256 = vrsqrt.f32 %v1731_v0  ;;  %vm706_vm0 = vcmp.eq.f32.partialorder %v1731_v0, inf }
  0xa3   : > { %v448_v2 = vmul.f32 %v1253_v6, %v447_v44  ;;  %1258 = vrsqrt.f32 %v1733_v16  ;;  %vm708_vm1 = vcmp.eq.f32.partialorder %v1731_v0, 0.0  ;;  %vm718_vm2 = vcmp.eq.f32.partialorder %v1733_v16, inf }
  0xa4   : > { %v437_v20 = vmul.f32 0.5, %v436_v41  ;;  %v460_v1 = vmul.f32 %v1255_v62, %v459_v42  ;;  %1260 = vrsqrt.f32 %v1735_v7  ;;  %vm720_vm3 = vcmp.eq.f32.partialorder %v1733_v16, 0.0 }
  0xa5   : > { %v449_v23 = vmul.f32 0.5, %v448_v2  ;;  %v721_v42 = vand.u32 2147483648, %v1733_v16  ;;  %vm730_vm4 = vcmp.eq.f32.partialorder %v1735_v7, inf  ;;  %vm732_vm5 = vcmp.eq.f32.partialorder %v1735_v7, 0.0 }
  0xa6   : > { %v438_v37 = vsub.f32 1.5, %v437_v20  ;;  %v461_v3 = vmul.f32 0.5, %v460_v1 }
  0xa7   : > { %v450_v53 = vsub.f32 1.5, %v449_v23 }
  0xa8   : > { %v439_v10 = vmul.f32 %v1251_v5, %v438_v37  ;;  %v462_v56 = vsub.f32 1.5, %v461_v3  ;;  %v1257_v51 = vpop.eup %1256 }
  0xa9   : > { %v451_v14 = vmul.f32 %v1253_v6, %v450_v53  ;;  %v1259_v17 = vpop.eup %1258  ;;  %v700_v29 = vmul.f32 %v1257_v51, %v1731_v0 }
  0xaa   : > { %v440_v52 = vmul.f32 %v439_v10, %v431_v49  ;;  %v463_v15 = vmul.f32 %v1255_v62, %v462_v56  ;;  %v712_v18 = vmul.f32 %v1259_v17, %v1733_v16  ;;  %v1261_v30 = vpop.eup %1260  ;;  %v709_v62 = vand.u32 2147483648, %v1731_v0 }
  0xab   : > { %v452_v33 = vmul.f32 %v451_v14, %v1723_v8  ;;  %v701_v46 = vmul.f32 %v1257_v51, %v700_v29  ;;  %v724_v13 = vmul.f32 %v1261_v30, %v1735_v7  ;;  %v733_v56 = vand.u32 2147483648, %v1735_v7 }
  0xac   : > { %v442_v24 = vsel %vm441_vm10, %v431_v49, %v440_v52  ;;  %v464_v58 = vmul.f32 %v463_v15, %v1725_v12  ;;  %v713_v11 = vmul.f32 %v1259_v17, %v712_v18 }
  0xad   : > { %v445_v21 = vsel %vm443_vm11, %v444_v60, %v442_v24  ;;  %v454_v25 = vsel %vm453_vm12, %v1723_v8, %v452_v33  ;;  %v702_v47 = vmul.f32 0.5, %v701_v46  ;;  %v725_v6 = vmul.f32 %v1261_v30, %v724_v13 }
  0xae   : > { %v457_v34 = vsel %vm455_vm13, %v456_v28, %v454_v25  ;;  %v466_v36 = vsel %vm465_vm14, %v1725_v12, %v464_v58  ;;  %v1753_v43 = vmin.f32 %v445_v21, 32.0  ;;  %v714_v5 = vmul.f32 0.5, %v713_v11 }
  0xaf   : > { %v469_v9 = vsel %vm467_vm15, %v468_v27, %v466_v36  ;;  %v1755_v39 = vmin.f32 %v457_v34, 32.0  ;;  %v703_v55 = vsub.f32 1.5, %v702_v47  ;;  %v726_v59 = vmul.f32 0.5, %v725_v6 }
  0xb0   : > { %v1757_v19 = vmin.f32 %v469_v9, 32.0  ;;  %v473_v49 = vmul.f32 1.442695, %v1753_v43  ;;  %v479_v8 = vsub.f32 0.0, %v1753_v43  ;;  %v715_v38 = vsub.f32 1.5, %v714_v5 }
  0xb1   : > { %v475_v40 = vmul.f32 1.442695, %v1755_v39  ;;  %v480_v35 = vsub.f32 0.0, %v1755_v39  ;;  %v704_v57 = vmul.f32 %v1257_v51, %v703_v55  ;;  %v727_v2 = vsub.f32 1.5, %v726_v59 }
  0xb2   : > { %1262 = vpow2.f32 %v473_v49  ;;  %v477_v12 = vmul.f32 1.442695, %v1757_v19  ;;  %v481_v45 = vsub.f32 0.0, %v1757_v19  ;;  %v482_v48 = vmul.f32 1.442695, %v479_v8 }
  0xb3   : > { %1264 = vpow2.f32 %v475_v40  ;;  %v484_v50 = vmul.f32 1.442695, %v480_v35  ;;  %v705_v61 = vmul.f32 %v704_v57, %v1731_v0  ;;  %v716_v41 = vmul.f32 %v1259_v17, %v715_v38 }
  0xb4   : > { %1266 = vpow2.f32 %v477_v12  ;;  %v486_v4 = vmul.f32 1.442695, %v481_v45  ;;  %v728_v53 = vmul.f32 %v1261_v30, %v727_v2  ;;  %vm494_vm6 = vcmp.lt.f32.partialorder %v1753_v43, 0.0001 }
  0xb5   : > { %1268 = vpow2.f32 %v482_v48  ;;  %v707_v1 = vsel %vm706_vm0, %v1731_v0, %v705_v61  ;;  %v717_v3 = vmul.f32 %v716_v41, %v1733_v16  ;;  %vm495_vm7 = vcmp.lt.f32.partialorder %v1755_v39, 0.0001 }
  0xb6   : > { %1270 = vpow2.f32 %v484_v50  ;;  %v710_v37 = vsel %vm708_vm1, %v709_v62, %v707_v1  ;;  %v729_v60 = vmul.f32 %v728_v53, %v1735_v7  ;;  %vm496_vm8 = vcmp.lt.f32.partialorder %v1757_v19, 0.0001 }
  0xb7   : > { %1272 = vpow2.f32 %v486_v4  ;;  %v1786_v14 = vmin.f32 %v710_v37, 32.0  ;;  %v719_v0 = vsel %vm718_vm2, %v1733_v16, %v717_v3 }
  0xb8   : > { %v1263_v44 = vpop.eup %1262  ;;  %1274 = vrcp.f32 %v1753_v43  ;;  %v722_v33 = vsel %vm720_vm3, %v721_v42, %v719_v0  ;;  %v731_v18 = vsel %vm730_vm4, %v1735_v7, %v729_v60 }
  0xb9   : > { %v1265_v20 = vpop.eup %1264  ;;  %1276 = vrcp.f32 %v1755_v39  ;;  %v738_v28 = vmul.f32 1.442695, %v1786_v14  ;;  %v744_v29 = vsub.f32 0.0, %v1786_v14  ;;  %v1800_v30 = vmin.f32 %v722_v33, 32.0 }
  0xba   : > { %v1267_v23 = vpop.eup %1266  ;;  %1278 = vrcp.f32 %v1757_v19  ;;  %v734_v27 = vsel %vm732_vm5, %v733_v56, %v731_v18  ;;  %vm759_vm9 = vcmp.lt.f32.partialorder %v1786_v14, 0.0001 }
  0xbb   : > { %v1269_v10 = vpop.eup %1268  ;;  %1280 = vpow2.f32 %v738_v28  ;;  %v747_v16 = vmul.f32 1.442695, %v744_v29  ;;  %v1804_v9 = vmin.f32 %v734_v27, 32.0  ;;  %v740_v47 = vmul.f32 1.442695, %v1800_v30 }
  0xbc   : > { %v1271_v51 = vpop.eup %1270  ;;  %v488_v52 = vsub.f32 %v1263_v44, %v1269_v10  ;;  %v745_v8 = vsub.f32 0.0, %v1800_v30  ;;  %vm760_vm10 = vcmp.lt.f32.partialorder %v1800_v30, 0.0001 }
  0xbd   : > { %v1273_v15 = vpop.eup %1272  ;;  %v489_v17 = vsub.f32 %v1265_v20, %v1271_v51  ;;  %1282 = vpow2.f32 %v747_v16  ;;  %v742_v40 = vmul.f32 1.442695, %v1804_v9  ;;  %v746_v45 = vsub.f32 0.0, %v1804_v9 }
  0xbe   : > { %v490_v24 = vsub.f32 %v1267_v23, %v1273_v15  ;;  %v491_v58 = vmul.f32 0.5, %v488_v52  ;;  %v1275_v21 = vpop.eup %1274  ;;  %1284 = vpow2.f32 %v740_v47  ;;  %v749_v19 = vmul.f32 1.442695, %v745_v8 }
  0xbf   : > { %v492_v25 = vmul.f32 0.5, %v489_v17  ;;  %v1277_v46 = vpop.eup %1276  ;;  %1286 = vpow2.f32 %v742_v40  ;;  %v751_v4 = vmul.f32 1.442695, %v746_v45  ;;  %vm761_vm11 = vcmp.lt.f32.partialorder %v1804_v9, 0.0001 }
  0xc0   : > { %v493_v34 = vmul.f32 0.5, %v490_v24  ;;  %v500_v36 = vmul.f32 %v1275_v21, %v491_v58  ;;  %v1279_v11 = vpop.eup %1278  ;;  %1288 = vpow2.f32 %v749_v19 }
  0xc1   : > { %v501_v49 = vmul.f32 %v1277_v46, %v492_v25  ;;  %v1281_v55 = vpop.eup %1280  ;;  %1290 = vrcp.f32 %v1786_v14 }
  0xc2   : > { %v502_v13 = vmul.f32 %v1279_v11, %v493_v34  ;;  %v503_v7 = vsel %vm494_vm6, 1.0, %v500_v36  ;;  %1292 = vpow2.f32 %v751_v4 }
  0xc3   : > { %v504_v35 = vsel %vm495_vm7, 1.0, %v501_v49  ;;  %v1815_v12 = vmul.f32 %v503_v7, %v1696_v63  ;;  %v1283_v5 = vpop.eup %1282  ;;  %1294 = vrcp.f32 %v1800_v30 }
  0xc4   : > { %v505_v48 = vsel %vm496_vm8, 1.0, %v502_v13  ;;  %v1819_v50 = vmul.f32 %v504_v35, %v1698_v26  ;;  %v1285_v6 = vpop.eup %1284  ;;  %v753_v57 = vsub.f32 %v1281_v55, %v1283_v5  ;;  %1296 = vrcp.f32 %v1804_v9 }
  0xc5   : > { %v1822_v43 = vmul.f32 %v505_v48, %v1700_v54  ;;  %v774_v63 = vmul.f32 %v1815_v12, %v1815_v12  ;;  %v1287_v61 = vpop.eup %1286 }
  0xc6   : > { %v775_v39 = vmul.f32 %v1819_v50, %v1819_v50  ;;  %v756_v62 = vmul.f32 0.5, %v753_v57  ;;  %v1289_v42 = vpop.eup %1288 }
  0xc7   : > { %v776_v26 = vmul.f32 %v1822_v43, %v1822_v43  ;;  %v777_v38 = vrot.slane %v774_v63, 4  ;;  %v1291_v20 = vpop.eup %1290  ;;  %v754_v1 = vsub.f32 %v1285_v6, %v1289_v42 }
  0xc8   : > { %v783_v54 = vrot.slane %v775_v39, 4  ;;  %v1293_v3 = vpop.eup %1292  ;;  %v765_v53 = vmul.f32 %v1291_v20, %v756_v62 }
  0xc9   : > { %v789_v59 = vrot.slane %v776_v26, 4  ;;  %v778_v44 = vadd.f32 %v777_v38, %v774_v63  ;;  %v755_v56 = vsub.f32 %v1287_v61, %v1293_v3  ;;  %v757_v51 = vmul.f32 0.5, %v754_v1  ;;  %v1295_v60 = vpop.eup %1294 }
  0xca   : > { %v784_v41 = vadd.f32 %v783_v54, %v775_v39  ;;  %v768_v15 = vsel %vm759_vm9, 1.0, %v765_v53  ;;  %v1297_v58 = vpop.eup %1296 }
  0xcb   : > { %v790_v2 = vadd.f32 %v789_v59, %v776_v26  ;;  %v779_v23 = vrot.slane %v778_v44, 2  ;;  %v758_v33 = vmul.f32 0.5, %v755_v56  ;;  %v766_v28 = vmul.f32 %v1295_v60, %v757_v51 }
  0xcc   : > { %v785_v37 = vrot.slane %v784_v41, 2  ;;  %v771_v29 = vmul.f32 %v768_v15, %v1711_v22 }
  0xcd   : > { %v791_v10 = vrot.slane %v790_v2, 2  ;;  %v780_v52 = vadd.f32 %v779_v23, %v778_v44  ;;  %v767_v14 = vmul.f32 %v1297_v58, %v758_v33  ;;  %v769_v25 = vsel %vm760_vm10, 1.0, %v766_v28 }
  0xce   : > { %v786_v0 = vadd.f32 %v785_v37, %v784_v41  ;;  %v834_v16 = vmul.f32 %v771_v29, %v771_v29  ;;  %v772_v46 = vmul.f32 %v769_v25, %v1713_v31  ;;  %v1849_v19 = vadd.f32 %v771_v29, %v1815_v12 }
  0xcf   : > { %v792_v17 = vadd.f32 %v791_v10, %v790_v2  ;;  %v781_v24 = vrot.slane %v780_v52, 1  ;;  %v770_v47 = vsel %vm761_vm11, 1.0, %v767_v14 }
  0xd0   : > { %v787_v18 = vrot.slane %v786_v0, 1  ;;  %v837_v22 = vrot.slane %v834_v16, 4  ;;  %v773_v49 = vmul.f32 %v770_v47, %v1715_v32  ;;  %v835_v13 = vmul.f32 %v772_v46, %v772_v46 }
  0xd1   : > { %v793_v21 = vrot.slane %v792_v17, 1  ;;  %v782_v27 = vadd.f32 %v781_v24, %v780_v52  ;;  %v901_v57 = vmul.f32 %v1849_v19, %v1849_v19  ;;  %v1856_v59 = vadd.f32 %v772_v46, %v1819_v50 }
  0xd2   : > { %v788_v34 = vadd.f32 %v787_v18, %v786_v0  ;;  %v836_v31 = vmul.f32 %v773_v49, %v773_v49  ;;  %v838_v9 = vadd.f32 %v837_v22, %v834_v16  ;;  %v843_v7 = vrot.slane %v835_v13, 4 }
  0xd3   : > { %v794_v36 = vadd.f32 %v793_v21, %v792_v17  ;;  %v1838_v11 = vadd.f32 1.0, %v782_v27  ;;  %v904_v20 = vrot.slane %v901_v57, 4  ;;  %v902_v37 = vmul.f32 %v1856_v59, %v1856_v59 }
  0xd4   : > { %v1841_v8 = vadd.f32 1.0, %v788_v34  ;;  %v839_v40 = vrot.slane %v838_v9, 2  ;;  %v844_v35 = vadd.f32 %v843_v7, %v835_v13  ;;  %v849_v45 = vrot.slane %v836_v31, 4 }
  0xd5   : > { %v1843_v30 = vadd.f32 1.0, %v794_v36  ;;  %1298 = vrsqrt.f32 %v1838_v11  ;;  %v1867_v50 = vadd.f32 %v773_v49, %v1822_v43  ;;  %v905_v51 = vadd.f32 %v904_v20, %v901_v57 }
  0xd6   : > { %1300 = vrsqrt.f32 %v1841_v8  ;;  %v840_v55 = vadd.f32 %v839_v40, %v838_v9  ;;  %v845_v4 = vrot.slane %v844_v35, 2  ;;  %v850_v63 = vadd.f32 %v849_v45, %v836_v31 }
  0xd7   : > { %1302 = vrsqrt.f32 %v1843_v30  ;;  %v910_v60 = vrot.slane %v902_v37, 4  ;;  %v903_v15 = vmul.f32 %v1867_v50, %v1867_v50  ;;  %v906_v43 = vrot.slane %v905_v51, 2 }
  0xd8   : > { %v841_v26 = vrot.slane %v840_v55, 1  ;;  %v846_v6 = vadd.f32 %v845_v4, %v844_v35  ;;  %v851_v54 = vrot.slane %v850_v63, 2  ;;  %vm805_vm12 = vcmp.eq.f32.partialorder %v1838_v11, inf }
  0xd9   : > { %v911_v58 = vadd.f32 %v910_v60, %v902_v37  ;;  %v916_v21 = vrot.slane %v903_v15, 4  ;;  %v808_v46 = vand.u32 2147483648, %v1838_v11  ;;  %v907_v34 = vadd.f32 %v906_v43, %v905_v51 }
  0xda   : > { %v842_v12 = vadd.f32 %v841_v26, %v840_v55  ;;  %v847_v61 = vrot.slane %v846_v6, 1  ;;  %v852_v41 = vadd.f32 %v851_v54, %v850_v63  ;;  %vm807_vm13 = vcmp.eq.f32.partialorder %v1838_v11, 0.0 }
  0xdb   : > { %v1299_v32 = vpop.eup %1298  ;;  %v912_v13 = vrot.slane %v911_v58, 2  ;;  %vm817_vm14 = vcmp.eq.f32.partialorder %v1841_v8, inf  ;;  %v820_v31 = vand.u32 2147483648, %v1841_v8  ;;  %v917_v7 = vadd.f32 %v916_v21, %v903_v15 }
  0xdc   : > { %v1301_v48 = vpop.eup %1300  ;;  %v799_v39 = vmul.f32 %v1299_v32, %v1838_v11  ;;  %v848_v42 = vadd.f32 %v847_v61, %v846_v6  ;;  %v1859_v2 = vadd.f32 1.0, %v842_v12  ;;  %v853_v23 = vrot.slane %v852_v41, 1 }
  0xdd   : > { %v1303_v5 = vpop.eup %1302  ;;  %v811_v38 = vmul.f32 %v1301_v48, %v1841_v8  ;;  %vm819_vm15 = vcmp.eq.f32.partialorder %v1841_v8, 0.0  ;;  %vm829_vm0 = vcmp.eq.f32.partialorder %v1843_v30, inf  ;;  %v908_v4 = vrot.slane %v907_v34, 1 }
  0xde   : > { %v800_v62 = vmul.f32 %v1299_v32, %v799_v39  ;;  %v823_v44 = vmul.f32 %v1303_v5, %v1843_v30  ;;  %v1863_v3 = vadd.f32 1.0, %v848_v42  ;;  %1304 = vrsqrt.f32 %v1859_v2 }
  0xdf   : > { %v812_v1 = vmul.f32 %v1301_v48, %v811_v38  ;;  %v854_v56 = vadd.f32 %v853_v23, %v852_v41  ;;  %vm831_vm1 = vcmp.eq.f32.partialorder %v1843_v30, 0.0  ;;  %v913_v6 = vadd.f32 %v912_v13, %v911_v58 }
  0xe0   : > { %v801_v53 = vmul.f32 0.5, %v800_v62  ;;  %v824_v10 = vmul.f32 %v1303_v5, %v823_v44  ;;  %1306 = vrsqrt.f32 %v1863_v3  ;;  %vm865_vm2 = vcmp.eq.f32.partialorder %v1859_v2, inf }
  0xe1   : > { %v813_v52 = vmul.f32 0.5, %v812_v1  ;;  %v1870_v0 = vadd.f32 1.0, %v854_v56  ;;  %vm867_vm3 = vcmp.eq.f32.partialorder %v1859_v2, 0.0  ;;  %v918_v57 = vrot.slane %v917_v7, 2 }
  0xe2   : > { %v802_v17 = vsub.f32 1.5, %v801_v53  ;;  %v825_v33 = vmul.f32 0.5, %v824_v10  ;;  %v868_v62 = vand.u32 2147483648, %v1859_v2  ;;  %vm877_vm4 = vcmp.eq.f32.partialorder %v1863_v3, inf }
  0xe3   : > { %1308 = vrsqrt.f32 %v1870_v0  ;;  %v814_v29 = vsub.f32 1.5, %v813_v52  ;;  %vm879_vm5 = vcmp.eq.f32.partialorder %v1863_v3, 0.0  ;;  %v880_v1 = vand.u32 2147483648, %v1863_v3 }
  0xe4   : > { %v1305_v28 = vpop.eup %1304  ;;  %v803_v14 = vmul.f32 %v1299_v32, %v802_v17  ;;  %v826_v25 = vsub.f32 1.5, %v825_v33  ;;  %v919_v10 = vadd.f32 %v918_v57, %v917_v7  ;;  %v914_v60 = vrot.slane %v913_v6, 1 }
  0xe5   : > { %v859_v24 = vmul.f32 %v1305_v28, %v1859_v2  ;;  %v815_v47 = vmul.f32 %v1301_v48, %v814_v29  ;;  %v832_v48 = vand.u32 2147483648, %v1843_v30  ;;  %v909_v33 = vadd.f32 %v908_v4, %v907_v34 }
  0xe6   : > { %v1307_v18 = vpop.eup %1306  ;;  %v804_v40 = vmul.f32 %v803_v14, %v1838_v11  ;;  %v827_v35 = vmul.f32 %v1303_v5, %v826_v25  ;;  %vm889_vm6 = vcmp.eq.f32.partialorder %v1870_v0, inf  ;;  %vm891_vm7 = vcmp.eq.f32.partialorder %v1870_v0, 0.0 }
  0xe7   : > { %v860_v27 = vmul.f32 %v1305_v28, %v859_v24  ;;  %v871_v16 = vmul.f32 %v1307_v18, %v1863_v3  ;;  %v816_v63 = vmul.f32 %v815_v47, %v1841_v8  ;;  %v920_v24 = vrot.slane %v919_v10, 1 }
  0xe8   : > { %v806_v38 = vsel %vm805_vm12, %v1838_v11, %v804_v40  ;;  %v828_v54 = vmul.f32 %v827_v35, %v1843_v30  ;;  %v915_v58 = vadd.f32 %v914_v60, %v913_v6 }
  0xe9   : > { %v1309_v36 = vpop.eup %1308  ;;  %v861_v22 = vmul.f32 0.5, %v860_v27  ;;  %v872_v49 = vmul.f32 %v1307_v18, %v871_v16  ;;  %v818_v41 = vsel %vm817_vm14, %v1841_v8, %v816_v63  ;;  %v809_v23 = vsel %vm807_vm13, %v808_v46, %v806_v38  ;;  %v1925_v63 = vld [vmem:[%s1981_s4] sm:$0x7] }
  0xea   : > { %v883_v9 = vmul.f32 %v1309_v36, %v1870_v0  ;;  %v830_v56 = vsel %vm829_vm0, %v1843_v30, %v828_v54  ;;  %v821_v15 = vsel %vm819_vm15, %v820_v31, %v818_v41  ;;  %v921_v16 = vadd.f32 %v920_v24, %v919_v10 }
  0xeb   : > { %v862_v45 = vsub.f32 1.5, %v861_v22  ;;  %v873_v32 = vmul.f32 0.5, %v872_v49  ;;  %v833_v29 = vsel %vm831_vm1, %v832_v48, %v830_v56 }
  0xec   : > { %v884_v55 = vmul.f32 %v1309_v36, %v883_v9 }
  0xed   : > { %v863_v39 = vmul.f32 %v1305_v28, %v862_v45  ;;  %v874_v26 = vsub.f32 1.5, %v873_v32 }
  0xee   : > { %v885_v5 = vmul.f32 0.5, %v884_v55 }
  0xef   : > { %v864_v12 = vmul.f32 %v863_v39, %v1859_v2  ;;  %v875_v61 = vmul.f32 %v1307_v18, %v874_v26 }
  0xf0   : > { %v886_v44 = vsub.f32 1.5, %v885_v5 }
  0xf1   : > { %v866_v42 = vsel %vm865_vm2, %v1859_v2, %v864_v12  ;;  %v876_v20 = vmul.f32 %v875_v61, %v1863_v3  ;;  %v892_v2 = vand.u32 2147483648, %v1870_v0  ;;  %v1031_v12 = vperm.slane %v1925_v63, 0 }
  0xf2   : > { %v869_v37 = vsel %vm867_vm3, %v868_v62, %v866_v42  ;;  %v887_v53 = vmul.f32 %v1309_v36, %v886_v44  ;;  %v1032_v42 = vperm.slane %v1925_v63, 1 }
  0xf3   : > { %v878_v51 = vsel %vm877_vm4, %v1863_v3, %v876_v20  ;;  %v895_v52 = vadd.f32 %v869_v37, %v809_v23 }
  0xf4   : > { %v881_v17 = vsel %vm879_vm5, %v880_v1, %v878_v51  ;;  %v888_v11 = vmul.f32 %v887_v53, %v1870_v0  ;;  %v1033_v53 = vperm.slane %v1925_v63, 2 }
  0xf5   : > { %v896_v28 = vadd.f32 %v881_v17, %v821_v15  ;;  %v922_v43 = vmul.f32 %v895_v52, %v895_v52 }
  0xf6   : > { %v890_v3 = vsel %vm889_vm6, %v1870_v0, %v888_v11 }
  0xf7   : > { %v893_v8 = vsel %vm891_vm7, %v892_v2, %v890_v3  ;;  %v923_v18 = vmul.f32 %v896_v28, %v896_v28  ;;  %v925_v21 = vsub.f32 %v909_v33, %v922_v43  ;;  %vm1045_vm7 = vcmask 1040384  }
  0xf8   : > { %v897_v14 = vadd.f32 %v893_v8, %v833_v29 }
  0xf9   : > { %v926_v25 = vsub.f32 %v915_v58, %v923_v18  ;;  %v928_v27 = vsub.f32 0.0, %v925_v21 }
  0xfa   : > { %v924_v46 = vmul.f32 %v897_v14, %v897_v14 }
  0xfb   : > { %v929_v34 = vsub.f32 0.0, %v926_v25  ;;  %v931_v36 = vmax.f32 %v928_v27, 1e-30 }
  0xfc   : > { %v927_v47 = vsub.f32 %v921_v16, %v924_v46 }
  0xfd   : > { %v932_v22 = vmax.f32 %v929_v34, 1e-30  ;;  %1310 = vrsqrt.f32 %v931_v36  ;;  %vm940_vm9 = vweird.f32 %v931_v36 }
  0xfe   : > { %v930_v30 = vsub.f32 0.0, %v927_v47 }
  0xff   : > { %1312 = vrsqrt.f32 %v932_v22  ;;  %vm950_vm12 = vweird.f32 %v932_v22 }
 0x100   : > { %v933_v49 = vmax.f32 %v930_v30, 1e-30 }
 0x102   : > { %1314 = vrsqrt.f32 %v933_v49  ;;  %vm960_vm15 = vweird.f32 %v933_v49 }
 0x103   : > { %v1311_v0 = vpop.eup %1310 }
 0x104   : > { %v935_v13 = vmul.f32 %v1311_v0, %v931_v36  ;;  %vm941_vm8 = vweird.f32 %v1311_v0 }
 0x105   : > { %v1313_v31 = vpop.eup %1312  ;;  %vm942_vm11 = vmor %vm940_vm9, %vm941_vm8  ;;  %vm1047_vm8 = vcmask 1041408  }
 0x106   : > { %v936_v9 = vmul.f32 %v1311_v0, %v935_v13  ;;  %v945_v7 = vmul.f32 %v1313_v31, %v932_v22  ;;  %vm951_vm10 = vweird.f32 %v1313_v31 }
 0x107   : > { %vm952_vm13 = vmor %vm950_vm12, %vm951_vm10 }
 0x108   : > { %v1315_v40 = vpop.eup %1314  ;;  %v937_v35 = vmul.f32 0.5, %v936_v9  ;;  %v946_v45 = vmul.f32 %v1313_v31, %v945_v7 }
 0x109   : > { %v955_v32 = vmul.f32 %v1315_v40, %v933_v49  ;;  %vm961_vm14 = vweird.f32 %v1315_v40 }
 0x10a   : > { %v938_v48 = vsub.f32 1.5, %v937_v35  ;;  %v947_v55 = vmul.f32 0.5, %v946_v45  ;;  %vm962_vm0 = vmor %vm960_vm15, %vm961_vm14 }
 0x10b   : > { %v956_v4 = vmul.f32 %v1315_v40, %v955_v32 }
 0x10c   : > { %v939_v39 = vmul.f32 %v1311_v0, %v938_v48  ;;  %v948_v26 = vsub.f32 1.5, %v947_v55 }
 0x10d   : > { %v957_v6 = vmul.f32 0.5, %v956_v4 }
 0x10e   : > { %v943_v5 = vsel %vm942_vm11, %v1311_v0, %v939_v39  ;;  %v949_v57 = vmul.f32 %v1313_v31, %v948_v26 }
 0x10f   : > { %v958_v38 = vsub.f32 1.5, %v957_v6  ;;  %v964_v54 = vmul.f32 %v943_v5, %v1849_v19 }
 0x110   : > { %v953_v61 = vsel %vm952_vm13, %v1313_v31, %v949_v57 }
 0x111   : > { %v959_v62 = vmul.f32 %v1315_v40, %v958_v38  ;;  %v965_v44 = vmul.f32 %v953_v61, %v1856_v59  ;;  %v967_v41 = vmax.f32 %v964_v54, 0.0 }
 0x113   : > { %v963_v20 = vsel %vm962_vm0, %v1315_v40, %v959_v62  ;;  %v968_v1 = vmax.f32 %v965_v44, 0.0  ;;  %v970_v23 = vmul.f32 %v967_v41, %v967_v41  ;;  %v1056_v37 = vmul.f32 %v1031_v12, %v967_v41 }
 0x114   : > { %v966_v19 = vmul.f32 %v963_v20, %v1867_v50 }
 0x115   : > { %v971_v10 = vmul.f32 %v968_v1, %v968_v1  ;;  %v973_v56 = vrot.slane %v970_v23, 4  ;;  %v1057_v51 = vmul.f32 %v1032_v42, %v968_v1  ;;  %v1062_v59 = vrot.slane %v1056_v37, 7 }
 0x116   : > { %v969_v52 = vmax.f32 %v966_v19, 0.0  ;;  %v1050_v19 = vlaneseq }
 0x117   : > { %v974_v60 = vadd.f32 %v973_v56, %v970_v23  ;;  %v979_v15 = vrot.slane %v971_v10, 4  ;;  %v1063_v17 = vrot.slane %v1057_v51, 7  ;;  %1068 = vst [vmem:[%s1938_s18] sm:$0xfe] %v1062_v59 }
 0x118   : > { %v972_v50 = vmul.f32 %v969_v52, %v969_v52  ;;  %v1058_v11 = vmul.f32 %v1033_v53, %v969_v52  ;;  %1071 = vst [vmem:[%s1938_s18 + $0x18] sm:$0x1] %v1062_v59  ;;  %vm1052_vm9 = vcmp.lt.s32.totalorder %v1050_v19, 384 }
 0x119   : > { %v975_v33 = vrot.slane %v974_v60, 2  ;;  %v980_v2 = vadd.f32 %v979_v15, %v971_v10  ;;  %1069 = vst [vmem:[%s1938_s18 + $0x8] sm:$0xfe] %v1063_v17 }
 0x11a   : > { %v985_v28 = vrot.slane %v972_v50, 4  ;;  %v1064_v43 = vrot.slane %v1058_v11, 7  ;;  %1072 = vst [vmem:[%s1938_s18 + $0x20] sm:$0x1] %v1063_v17 }
 0x11b   : > { %v976_v29 = vadd.f32 %v975_v33, %v974_v60  ;;  %v981_v3 = vrot.slane %v980_v2, 2 }
 0x11c   : > { %v986_v24 = vadd.f32 %v985_v28, %v972_v50  ;;  %1070 = vst [vmem:[%s1938_s18 + $0x10] sm:$0xfe] %v1064_v43 }
 0x11d   : > { %v977_v8 = vrot.slane %v976_v29, 1  ;;  %v982_v58 = vadd.f32 %v981_v3, %v980_v2  ;;  %1073 = vst [vmem:[%s1938_s18 + $0x28] sm:$0x1] %v1064_v43 }
 0x11e   : > { %v987_v18 = vrot.slane %v986_v24, 2 }
 0x11f   : > { %v978_v21 = vadd.f32 %v977_v8, %v976_v29  ;;  %v983_v14 = vrot.slane %v982_v58, 1 }
 0x120   : > { %v988_v25 = vadd.f32 %v987_v18, %v986_v24 }
 0x121   : > { %v984_v27 = vadd.f32 %v983_v14, %v982_v58  ;;  %v991_v16 = vadd.f32 1.0, %v978_v21  ;;  %v1104_v17 = vld [vmem:[%s1938_s18 + $0x20] sm:$0xff] (%p1403_p4) }
 0x122   : > { %v989_v46 = vrot.slane %v988_v25, 1  ;;  %1105 = vst [vmem:[%s1083_s27 + $0x38] sm:$0xff] (%p1403_p4), %v1104_v17 }
 0x123   : > { %v992_v34 = vadd.f32 1.0, %v984_v27  ;;  %1316 = vrsqrt.f32 %v991_v16  ;;  %vm1001_vm1 = vcmp.eq.f32.partialorder %v991_v16, inf  ;;  %v1004_v38 = vand.u32 2147483648, %v991_v16 }
 0x124   : > { %v990_v36 = vadd.f32 %v989_v46, %v988_v25  ;;  %vm1003_vm3 = vcmp.eq.f32.partialorder %v991_v16, 0.0  ;;  %v1106_v50 = vld [vmem:[%s1938_s18 + $0x28] sm:$0xff] (%p1403_p4) }
 0x125   : > { %1318 = vrsqrt.f32 %v992_v34  ;;  %vm1013_vm2 = vcmp.eq.f32.partialorder %v992_v34, inf  ;;  %v1016_v54 = vand.u32 2147483648, %v992_v34  ;;  %vm1015_vm4 = vcmp.eq.f32.partialorder %v992_v34, 0.0  ;;  %1107 = vst [vmem:[%s1083_s27 + $0x40] sm:$0xff] (%p1403_p4), %v1106_v50 }
 0x126   : > { %v993_v47 = vadd.f32 1.0, %v990_v36 }
 0x128   : > { %1320 = vrsqrt.f32 %v993_v47  ;;  %vm1025_vm5 = vcmp.eq.f32.partialorder %v993_v47, inf  ;;  %v1028_v1 = vand.u32 2147483648, %v993_v47  ;;  %vm1027_vm6 = vcmp.eq.f32.partialorder %v993_v47, 0.0 }
 0x129   : > { %v1317_v22 = vpop.eup %1316 }
 0x12a   : > { %v995_v30 = vmul.f32 %v1317_v22, %v991_v16 }
 0x12b   : > { %v1319_v49 = vpop.eup %1318 }
 0x12c   : > { %v996_v0 = vmul.f32 %v1317_v22, %v995_v30  ;;  %v1007_v13 = vmul.f32 %v1319_v49, %v992_v34 }
 0x12e   : > { %v1321_v31 = vpop.eup %1320  ;;  %v997_v9 = vmul.f32 0.5, %v996_v0  ;;  %v1008_v7 = vmul.f32 %v1319_v49, %v1007_v13 }
 0x12f   : > { %v1019_v40 = vmul.f32 %v1321_v31, %v993_v47 }
 0x130   : > { %v998_v35 = vsub.f32 1.5, %v997_v9  ;;  %v1009_v45 = vmul.f32 0.5, %v1008_v7 }
 0x131   : > { %v1020_v32 = vmul.f32 %v1321_v31, %v1019_v40 }
 0x132   : > { %v999_v48 = vmul.f32 %v1317_v22, %v998_v35  ;;  %v1010_v55 = vsub.f32 1.5, %v1009_v45 }
 0x133   : > { %v1021_v4 = vmul.f32 0.5, %v1020_v32 }
 0x134   : > { %v1000_v39 = vmul.f32 %v999_v48, %v991_v16  ;;  %v1011_v26 = vmul.f32 %v1319_v49, %v1010_v55 }
 0x135   : > { %v1022_v6 = vsub.f32 1.5, %v1021_v4 }
 0x136   : > { %v1002_v5 = vsel %vm1001_vm1, %v991_v16, %v1000_v39  ;;  %v1012_v57 = vmul.f32 %v1011_v26, %v992_v34 }
 0x137   : > { %v1023_v61 = vmul.f32 %v1321_v31, %v1022_v6  ;;  %v1005_v44 = vsel %vm1003_vm3, %v1004_v38, %v1002_v5 }
 0x138   : > { %v1014_v62 = vsel %vm1013_vm2, %v992_v34, %v1012_v57  ;;  %v1037_v56 = vmul.f32 %v1031_v12, %v1005_v44 }
 0x139   : > { %v1017_v41 = vsel %vm1015_vm4, %v1016_v54, %v1014_v62  ;;  %v1024_v20 = vmul.f32 %v1023_v61, %v993_v47 }
 0x13a   : > { %v1038_v23 = vmul.f32 %v1032_v42, %v1017_v41 }
 0x13b   : > { %v1026_v37 = vsel %vm1025_vm5, %v993_v47, %v1024_v20 }
 0x13c   : > { %v1029_v10 = vsel %vm1027_vm6, %v1028_v1, %v1026_v37  ;;  %v1043_v51 = vrot.slane %v1038_v23, 7 }
 0x13d   : > { %v1039_v59 = vmul.f32 %v1033_v53, %v1029_v10  ;;  %v1102_v53 = vld [vmem:[%s1938_s18 + $0x18] sm:$0xff] (%p1403_p4) }
 0x13e   : > { %v1046_v52 = vsel %vm1045_vm7, %v1037_v56, %v1043_v51  ;;  %1080 = sbr.rel (!%p1403_p4) target bundleno = 333 (0x14d), region = 44  ;;  %1103 = vst [vmem:[%s1083_s27 + $0x30] sm:$0xff] (%p1403_p4), %v1102_v53 }
 0x13f   : > { %v1044_v60 = vrot.slane %v1039_v59, 6 }
 0x141   : > { %v1048_v15 = vsel %vm1047_vm8, %v1046_v52, %v1044_v60 }
 0x142   : > { %1054 = vst.msk [vmem:[%s1938_s18] ss:$8 sm:$0x7] %vm1052_vm9, %v1048_v15 }
 0x149   : > { %v1096_v12 = vld [vmem:[%s1938_s18] sm:$0xff]  ;;  %v1098_v63 = vld [vmem:[%s1938_s18 + $0x8] sm:$0xff]  ;;  %v1100_v42 = vld [vmem:[%s1938_s18 + $0x10] sm:$0xff] }
 0x14a   : > { %1097 = vst [vmem:[%s1083_s27] sm:$0xff] %v1096_v12 }
 0x14b   : > { %1099 = vst [vmem:[%s1083_s27 + $0x8] sm:$0xff] %v1098_v63 }
 0x14c   : > { %1101 = vst [vmem:[%s1083_s27 + $0x10] sm:$0xff] %v1100_v42 }
 0x14d PF: > { %p12_p8 = scmp.ge.s32.totalorder %s1393_s22, 4   ;;  %s1996_s18 = smov %s1340_s19 }
 0x14e   : > { %s1997_s19 = smov %s1401_s25  ;;  %s1998_s20 = smov %s1393_s22 }
 0x14f   :  { %14 = sbr.rel (!%p12_p8) target bundleno = 2 (0x2), region = 96 }

// kernel: lorentz_basic_block.11
= control target key start
LH: loop header
LB: loop body
LE: loop exit
PB: predicated region body
PF: predicated region fallthrough
CT: control target
= control target key end

     0   :  { %s1202_s15 = smov 0   ;;  %s1204_s16 = smov 0   ;;  %s1384_s0 = inlined_call_operand.vmem [shape: bf16[9,768], index: 0, kind: input, shape index: {}]   ;;  %s1385_s1 = inlined_call_operand.vmem [shape: bf16[9,8,9], index: 1, kind: input, shape index: {}]   ;;  %s1386_s2 = inlined_call_operand.vmem [shape: f32[8,1], index: 2, kind: input, shape index: {}]   ;;  %s1387_s3 = inlined_call_operand.vmem [shape: f32[1,384], index: 3, kind: input, shape index: {}]   ;;  %s1388_s4 = inlined_call_operand.vmem [shape: f32[8,768], index: 4, kind: output, shape index: {}]  }
   0x1   :  { %s1206_s17 = smov 0  }
   0x2 LB: > { %s1001_s18 = sadd.s32 4294967295, %s1165_s17   ;;  %s1219_s19 = sadd.s32 1, %s1165_s17   ;;  %s1165_s17 = sphi %s1206_s17, %s1393_s17   ;;  %s1161_s16 = sphi %s1204_s16, %s1392_s16   ;;  %s1157_s15 = sphi %s1202_s15, %s1391_s15  }
   0x3   : > { %s18_s20 = ssub.s32 %s1165_s17, %s1219_s19  ;;  %s21_s21 = sadd.s32 1, %s1161_s16 }
   0x4   : > { %p19_p0 = scmp.eq.s32.totalorder %s18_s20, 0  ;;  %p28_p1 = scmp.ne.s32.totalorder %s1161_s16, %s1157_s15 }
   0x5   : > { %p29_p2 = scmp.eq.s32.totalorder %s1165_s17, 0  ;;  %p1004_p4 = scmp.ge.s32.totalorder %s1165_s17, 2 }
   0x6   : > { %s1228_s22 = scalar_select %p19_p0, %s1161_s16, %s21_s21  }
   0x7   : > { %p30_p3 = por %p29_p2, %p28_p1  ;;  %152 = sbr.rel (%p1004_p4) target bundleno = 21 (0x15), region = 28 }
   0xc   : > { %155 = sbr.rel (!%p30_p3) target bundleno = 21 (0x15), region = 32  ;;  %s157_s23 = sand.u32 (%p30_p3), 1, %s1161_s16  }
   0xd   : > { %s1093_s24 = smul.u32 (%p30_p3), 12, %s1165_s17 }
   0xe   : > { %s1105_s25 = smul.u32 (%p30_p3), 24, %s157_s23 }
   0xf   : > { %s162_s28 = scalar_lea.vmem (%p30_p3), %s1384_s0, %s1093_s24 }
  0x10   : > { %v177_v0 = vld [vmem:[%s162_s28] sm:$0xff] (%p30_p3)  ;;  %v179_v1 = vld [vmem:[%s162_s28 + $0x18] sm:$0xff] (%p30_p3)  ;;  %v1006_v2 = vld [vmem:[%s162_s28 + $0x8] sm:$0xf] (%p30_p3)  ;;  %s159_s29 = scalar_lea.vmem (%p30_p3), [#allocation3], %s1105_s25 }
  0x11   : > { %178 = vst [vmem:[%s159_s29] sm:$0xff] %v177_v0  ;;  %v1008_v3 = vld [vmem:[%s162_s28 + $0x20] sm:$0xf] }
  0x12   : > { %180 = vst [vmem:[%s159_s29 + $0xc] sm:$0xff] %v179_v1 }
  0x13   : > { %1007 = vst [vmem:[%s159_s29 + $0x8] sm:$0xf] %v1006_v2 }
  0x14   : > { %1009 = vst [vmem:[%s159_s29 + $0x14] sm:$0xf] %v1008_v3 }
  0x15 PF: > { %p1010_p5 = scmp.ge.s32.totalorder %s1165_s17, 1  ;;  %p197_p6 = scmp.lt.s32.totalorder %s1165_s17, 3 }
  0x17   : > { %p198_p7 = pnand %p1010_p5, %p197_p6 }
  0x18   : > { %s204_s30 = sand.u32 (!%p198_p7), 1, %s1157_s15   ;;  %s1167_s6 = smov (!%p198_p7), 18  }
  0x19   : > { %201 = sbr.rel (%p198_p7) target bundleno = 411 (0x19b), region = 58  ;;  %s1168_s8 = smov (!%p198_p7), 19  }
  0x1a   : > { %s1106_s5 = smul.u32 (!%p198_p7), 24, %s204_s30  ;;  %s1169_s9 = smov (!%p198_p7), 17  }
  0x1b   : > { %s1170_s10 = smov (!%p198_p7), 1   ;;  %s1171_s11 = smov (!%p198_p7), 127  }
  0x1c   : > { %s206_s7 = scalar_lea.vmem (!%p198_p7), [#allocation3], %s1106_s5  ;;  %s1172_s12 = smov (!%p198_p7), 111  }
  0x1d   : > { %s1173_s13 = smov (!%p198_p7), 110   ;;  %s1174_s14 = smov (!%p198_p7), 109  }
  0x1e   : > { %v1015_v4 = vld [vmem:[#allocation2] sm:$0xf]  ;;  %v1096_v5 = vld [vmem:[#allocation2 + $0x10] sm:$0x10]  ;;  %vm243_vm0 = vcmask 1040384   ;;  %vm246_vm2 = vcmask 1044484  }
  0x1f   : > { %v1016_v6 = vor.u32 %v1096_v5, %v1015_v4  ;;  %vm244_vm1 = vsmask.f32 256  ;;  %vm247_vm4 = vsmask.f32 4352  ;;  %v250_v8 = vld [vmem:[#allocation2 + $0x18] sm:$0x11] }
  0x20   : > { %vm1239_vm3 = vmand %vm243_vm0, %vm244_vm1  ;;  %v253_v9 = vld [vmem:[#allocation2 + $0x20] sm:$0x1]  ;;  %v239_v11 = vld [vmem:[%s206_s7 + $0xc] sm:$0x11]  ;;  %vm295_vm7 = vcmask 1043456   ;;  %vm296_vm8 = vcmask 1044480  }
  0x21   : > { %279 = vrot.lane.b32.xlu1 %v1016_v6, %s1167_s6  ;;  %vm248_vm5 = vmand %vm246_vm2, %vm247_vm4  ;;  %v237_v10 = vld [vmem:[%s206_s7] sm:$0xff]  ;;  %347 = vrot.lane.b32.xlu2 %v1016_v6, %s1168_s8  ;;  %v238_v13 = vld [vmem:[%s206_s7 + $0x8] sm:$0xf]  ;;  %v1175_v38 = vmov 65535   ;;  %vm355_vm9 = vcmask 154624   ;;  %vm291_vm10 = vcmask 72704  }
  0x22   : > { %vm249_vm6 = vmor %vm248_vm5, %vm1239_vm3  ;;  %241 = vst [vmem:[#allocation2 + $0x4] sm:$0xff] %v237_v10  ;;  %v240_v14 = vld [vmem:[%s206_s7 + $0x14] sm:$0x1]  ;;  %v1102_v34 = vld [vmem:[#allocation2 + $0x10] sm:$0xf]  ;;  %v297_v39 = vsel %vm295_vm7, 4294967295, %v1175_v38 }
  0x23   : > { %v251_v12 = vsel %vm249_vm6, %v239_v11, %v250_v8  ;;  %v254_v15 = vsel %vm1239_vm3, %v240_v14, %v253_v9  ;;  %242 = vst [vmem:[#allocation2 + $0xc] sm:$0xf] %v238_v13  ;;  %v1072_v35 = vld [vmem:[#allocation2 + $0x20] sm:$0x10]  ;;  %v1251_v40 = vsel %vm296_vm8, %v297_v39, 0  ;;  %vm287_vm11 = vcmask 146432  }
  0x24   : > { %252 = vst [vmem:[#allocation2 + $0x18] sm:$0x11] %v251_v12  ;;  %v1075_v36 = vor.u32 %v1102_v34, %v1072_v35  ;;  %v1258_v44 = vld [vmem:[%s1385_s1] sm:$0xf]  ;;  %v1012_v55 = vld [vmem:[%s1385_s1 + $0x4] sm:$0xf] }
  0x25   : > { %255 = vst [vmem:[#allocation2 + $0x20] sm:$0x1] %v254_v15  ;;  %vm420_vm12 = vcmask 138240   ;;  %vm488_vm13 = vcmask 7168   ;;  %vm649_vm14 = vcmask 1039360   ;;  %vm717_vm15 = vcmask 908288  }
  0x26   : > { %v1039_v39 = vld [vmem:[%s1385_s1 + $0xc] sm:$0xf]  ;;  %vm785_vm0 = vcmask 900096   ;;  %vm853_vm1 = vcmask 891904  }
  0x29   : > { %v1023_v16 = vld [vmem:[#allocation2 + $0x8] sm:$0xf]  ;;  %v1094_v17 = vld [vmem:[#allocation2 + $0x4] sm:$0xf] }
  0x2a   : > { %v1095_v22 = vld [vmem:[#allocation2 + $0xc] sm:$0xf]  ;;  %v1062_v25 = vld [vmem:[#allocation2 + $0x4] sm:$0xf]  ;;  %v1101_v28 = vld [vmem:[#allocation2 + $0x8] sm:$0xf] }
  0x2b   : > { %v1097_v18 = vld [vmem:[#allocation2 + $0x18] sm:$0x10]  ;;  %v1017_v19 = vld [vmem:[#allocation2 + $0x14] sm:$0x10]  ;;  %v1070_v31 = vld [vmem:[#allocation2 + $0xc] sm:$0xf] }
  0x2c   : > { %v1024_v20 = vor.u32 %v1097_v18, %v1023_v16  ;;  %v1020_v21 = vor.u32 %v1094_v17, %v1017_v19  ;;  %v1025_v23 = vld [vmem:[#allocation2 + $0x1c] sm:$0x10]  ;;  %v1103_v26 = vld [vmem:[#allocation2 + $0x14] sm:$0x10]  ;;  %v1064_v29 = vld [vmem:[#allocation2 + $0x18] sm:$0x10] }
  0x2d   : > { %v1028_v24 = vor.u32 %v1095_v22, %v1025_v23  ;;  %v1063_v27 = vor.u32 %v1103_v26, %v1062_v25  ;;  %v1067_v30 = vor.u32 %v1101_v28, %v1064_v29  ;;  %v1104_v32 = vld [vmem:[#allocation2 + $0x1c] sm:$0x10]  ;;  %v1046_v4 = vld [vmem:[#allocation2 + $0x4] sm:$0xf]  ;;  %v1099_v5 = vld [vmem:[#allocation2 + $0x14] sm:$0x10] }
  0x2e   : > { %283 = vrot.lane.b32.xlu0 %v1024_v20, %s1167_s6  ;;  %281 = vrot.lane.b32.xlu1 %v1020_v21, %s1167_s6  ;;  %v1071_v33 = vor.u32 %v1104_v32, %v1070_v31  ;;  %v1047_v7 = vor.u32 %v1099_v5, %v1046_v4  ;;  %v1098_v10 = vld [vmem:[#allocation2 + $0x8] sm:$0xf]  ;;  %v1048_v11 = vld [vmem:[#allocation2 + $0x18] sm:$0x10]  ;;  %v1100_v22 = vld [vmem:[#allocation2 + $0x1c] sm:$0x10] }
  0x2f   : > { %349 = vrot.lane.b32.xlu2 %v1020_v21, %s1168_s8  ;;  %v1051_v14 = vor.u32 %v1098_v10, %v1048_v11 }
  0x30   : > { %v569_v18 = vand.u32 %v1047_v7, %v1251_v40 }
  0x31   : > { %v572_v23 = vand.u32 %v1051_v14, %v1251_v40  ;;  %v1176_v14 = vmov 0  }
  0x32   : > { %1141 = vset.pattern.permute.xlu2 %v1176_v14  ;;  %1142 = vset.pattern.permute.xlu0 %v1176_v14 }
  0x36   : > { %285 = vrot.lane.b32.xlu0 %v1028_v24, %s1167_s6  ;;  %414 = vrot.lane.b32.xlu1 %v1020_v21, %s1169_s9 }
  0x37   : > { %351 = vrot.lane.b32.xlu2 %v1024_v20, %s1168_s8 }
  0x3e   : > { %412 = vrot.lane.b32.xlu0 %v1016_v6, %s1169_s9  ;;  %416 = vrot.lane.b32.xlu1 %v1024_v20, %s1169_s9 }
  0x3f   : > { %482 = vrot.lane.b32.xlu2 %v1020_v21, %s1170_s10  ;;  %v1054_v21 = vld [vmem:[#allocation2 + $0xc] sm:$0xf] }
  0x46   : > { %353 = vrot.lane.b32.xlu0 %v1028_v24, %s1168_s8  ;;  %418 = vrot.lane.b32.xlu1 %v1028_v24, %s1169_s9 }
  0x47   : > { %480 = vrot.lane.b32.xlu2 %v1016_v6, %s1170_s10  ;;  %v1035_v6 = vld [vmem:[%s1385_s1 + $0x8] sm:$0xf] }
  0x4e   : > { %484 = vrot.lane.b32.xlu0 %v1024_v20, %s1170_s10  ;;  %641 = vrot.lane.b32.xlu1 %v1063_v27, %s1171_s11 }
  0x4f   : > { %643 = vrot.lane.b32.xlu2 %v1067_v30, %s1171_s11 }
  0x56   : > { %486 = vrot.lane.b32.xlu0 %v1028_v24, %s1170_s10  ;;  %711 = vrot.lane.b32.xlu1 %v1067_v30, %s1172_s12  ;;  %v1055_v24 = vor.u32 %v1100_v22, %v1054_v21 }
  0x57   : > { %645 = vrot.lane.b32.xlu2 %v1071_v33, %s1171_s11 }
  0x58   : > { %v575_v28 = vand.u32 %v1055_v24, %v1251_v40 }
  0x5e   : > { %709 = vrot.lane.b32.xlu0 %v1063_v27, %s1172_s12  ;;  %713 = vrot.lane.b32.xlu1 %v1071_v33, %s1172_s12 }
  0x5f   : > { %779 = vrot.lane.b32.xlu2 %v1067_v30, %s1173_s13 }
  0x66   : > { %647 = vrot.lane.b32.xlu0 %v1075_v36, %s1171_s11  ;;  %715 = vrot.lane.b32.xlu1 %v1075_v36, %s1172_s12 }
  0x67   : > { %777 = vrot.lane.b32.xlu2 %v1063_v27, %s1173_s13 }
  0x6e   : > { %781 = vrot.lane.b32.xlu0 %v1071_v33, %s1173_s13  ;;  %849 = vrot.lane.b32.xlu1 %v1071_v33, %s1174_s14 }
  0x6f   : > { %851 = vrot.lane.b32.xlu2 %v1075_v36, %s1174_s14 }
  0x76   : > { %783 = vrot.lane.b32.xlu0 %v1075_v36, %s1173_s13  ;;  %847 = vrot.lane.b32.xlu1 %v1067_v30, %s1174_s14 }
  0x7b   : > { %v348_v37 = vpop.permute.xlu2 %347 }
  0x7e   : > { %845 = vrot.lane.b32.xlu0 %v1063_v27, %s1174_s14  ;;  %s230_s14 = smul.u32 3, %s1001_s18 }
  0x80   : > { %p231_p8 = scmp.lt.s32.totalorder %s230_s14, 5 }
  0x82   : > { %s1395_s14 = smov (!%p231_p8, %s230_s14), 5 }
  0x83   : > { %s1011_s17 = sshll.u32 %s1395_s14, 3 }
  0x84   : > { %s234_s23 = scalar_lea.vmem %s1388_s4, %s1011_s17 }
  0x89   : > { %v350_v41 = vpop.permute.xlu2 %349 }
  0x8a   : > { %v356_v42 = vsel %vm355_vm9, %v348_v37, %v350_v41 }
  0x8b   : > { %v363_v43 = vand.u32 %v356_v42, %v1251_v40 }
  0x8d   : > { %378 = vmatpush.bf16.msra.mxu3 %v363_v43 }
  0x90   : > { %1032 = vmatmul.msk.bf16.vlgmr.msra.gmra.mxu3 %vm291_vm10, %v1258_v44 }
  0x91   : > { %v352_v46 = vpop.permute.xlu2 %351 }
  0x92   : > { %v357_v47 = vsel %vm355_vm9, %v350_v41, %v352_v46 }
  0x93   : > { %v280_v45 = vpop.permute.xlu1 %279  ;;  %v366_v52 = vand.u32 %v357_v47, %v1251_v40 }
  0x99   : > { %v483_v56 = vpop.permute.xlu2 %482 }
  0xa0   : > { %v284_v48 = vpop.permute.xlu0 %283  ;;  %v282_v49 = vpop.permute.xlu1 %281 }
  0xa1   : > { %v288_v50 = vsel %vm287_vm11, %v280_v45, %v282_v49  ;;  %v289_v51 = vsel %vm287_vm11, %v282_v49, %v284_v48  ;;  %v481_v61 = vpop.permute.xlu2 %480 }
  0xa2   : > { %v300_v53 = vand.u32 %v1251_v40, %v288_v50  ;;  %v303_v54 = vand.u32 %v1251_v40, %v289_v51  ;;  %v489_v8 = vsel %vm488_vm13, %v481_v61, %v483_v56 }
  0xa3   : > { %v496_v16 = vand.u32 %v489_v8, %v1251_v40 }
  0xa4   : > { %315 = vmatpush.bf16.msra.mxu0 %v300_v53  ;;  %328 = vmatpush.bf16.msra.mxu1 %v303_v54 }
  0xa7   : > { %1029 = vmatmul.msk.bf16.vlgmr.msra.gmra.mxu0 %vm291_vm10, %v1012_v55  ;;  %1030 = vmatmul.msk.bf16.vlgmr.msra.gmra.mxu1 %vm291_vm10, %v1012_v55 }
  0xa8   : > { %391 = vmatpush.bf16.msrb.mxu0 %v366_v52  ;;  %v286_v57 = vpop.permute.xlu0 %285  ;;  %v415_v58 = vpop.permute.xlu1 %414 }
  0xa9   : > { %v290_v59 = vsel %vm287_vm11, %v284_v48, %v286_v57  ;;  %v644_v9 = vpop.permute.xlu2 %643  ;;  %v1043_v48 = vld [vmem:[%s1385_s1 + $0x10] sm:$0xf] }
  0xaa   : > { %v306_v60 = vand.u32 %v1251_v40, %v290_v59 }
  0xac   : > { %341 = vmatpush.bf16.msra.mxu2 %v306_v60 }
  0xaf   : > { %1031 = vmatmul.msk.bf16.vlgmr.msra.gmra.mxu2 %vm291_vm10, %v1012_v55 }
  0xb0   : > { %v413_v62 = vpop.permute.xlu0 %412  ;;  %v417_v63 = vpop.permute.xlu1 %416 }
  0xb1   : > { %v421_v0 = vsel %vm420_vm12, %v413_v62, %v415_v58  ;;  %v422_v1 = vsel %vm420_vm12, %v415_v58, %v417_v63  ;;  %v646_v29 = vpop.permute.xlu2 %645  ;;  %v1059_v58 = vld [vmem:[%s1385_s1 + $0x14] sm:$0xf] }
  0xb2   : > { %v428_v2 = vand.u32 %v421_v0, %v1251_v40  ;;  %v431_v3 = vand.u32 %v422_v1, %v1251_v40  ;;  %v651_v31 = vsel %vm649_vm14, %v644_v9, %v646_v29 }
  0xb3   : > { %v660_v32 = vand.u32 %v651_v31, %v1251_v40 }
  0xb4   : > { %443 = vmatpush.bf16.msrb.mxu2 %v428_v2  ;;  %456 = vmatpush.bf16.msrb.mxu3 %v431_v3 }
  0xb7   : > { %1033 = vmatmul.msk.bf16.vlgmr.msrb.gmra.mxu0 %vm291_vm10, %v1258_v44  ;;  %1037 = vmatmul.msk.bf16.vlgmr.msrb.gmra.mxu3 %vm291_vm10, %v1035_v6 }
  0xb8   : > { %v354_v12 = vpop.permute.xlu0 %353  ;;  %v419_v13 = vpop.permute.xlu1 %418 }
  0xb9   : > { %v358_v15 = vsel %vm355_vm9, %v352_v46, %v354_v12  ;;  %v423_v17 = vsel %vm420_vm12, %v417_v63, %v419_v13  ;;  %v780_v41 = vpop.permute.xlu2 %779  ;;  %v1083_v12 = vld [vmem:[%s1385_s1 + $0x1c] sm:$0xf]  ;;  %v1087_v13 = vld [vmem:[%s1385_s1 + $0x20] sm:$0xf] }
  0xba   : > { %v369_v19 = vand.u32 %v358_v15, %v1251_v40  ;;  %v434_v20 = vand.u32 %v423_v17, %v1251_v40 }
  0xbc   : > { %404 = vmatpush.bf16.msrb.mxu1 %v369_v19  ;;  %469 = vmatpush.bf16.msra.mxu0 %v434_v20 }
  0xbf   : > { %1034 = vmatmul.msk.bf16.vlgmr.msrb.gmra.mxu1 %vm291_vm10, %v1258_v44  ;;  %1036 = vmatmul.msk.bf16.vlgmr.msrb.gmra.mxu2 %vm291_vm10, %v1035_v6 }
  0xc0   : > { %511 = vmatpush.bf16.msra.mxu1 %v496_v16  ;;  %584 = vmatpush.bf16.msrb.mxu0 %v569_v18  ;;  %v485_v25 = vpop.permute.xlu0 %484  ;;  %v642_v26 = vpop.permute.xlu1 %641 }
  0xc1   : > { %v490_v27 = vsel %vm488_vm13, %v483_v56, %v485_v25  ;;  %v650_v33 = vsel %vm649_vm14, %v642_v26, %v644_v9  ;;  %v778_v49 = vpop.permute.xlu2 %777 }
  0xc2   : > { %v499_v30 = vand.u32 %v490_v27, %v1251_v40  ;;  %v657_v37 = vand.u32 %v650_v33, %v1251_v40  ;;  %v786_v53 = vsel %vm785_vm0, %v778_v49, %v780_v41 }
  0xc3   : > { %v793_v57 = vand.u32 %v786_v53, %v1251_v40 }
  0xc4   : > { %597 = vmatpush.bf16.msrb.mxu1 %v572_v23  ;;  %524 = vmatpush.bf16.msra.mxu2 %v499_v30 }
  0xc7   : > { %1038 = vmatmul.msk.bf16.vlgmr.msra.gmra.mxu0 %vm291_vm10, %v1035_v6  ;;  %v1079_v6 = vld [vmem:[%s1385_s1 + $0x18] sm:$0xf] }
  0xc8   : > { %610 = vmatpush.bf16.msrb.mxu2 %v575_v28  ;;  %v487_v34 = vpop.permute.xlu0 %486  ;;  %v712_v35 = vpop.permute.xlu1 %711  ;;  %685 = vmatpush.bf16.msra.mxu0 %v660_v32 }
  0xc9   : > { %v491_v36 = vsel %vm488_vm13, %v485_v25, %v487_v34  ;;  %v852_v63 = vpop.permute.xlu2 %851 }
  0xca   : > { %v502_v38 = vand.u32 %v491_v36, %v1251_v40 }
  0xcc   : > { %537 = vmatpush.bf16.msra.mxu3 %v502_v38 }
  0xcf   : > { %1040 = vmatmul.msk.bf16.vlgmr.msra.gmra.mxu1 %vm291_vm10, %v1039_v39  ;;  %1041 = vmatmul.msk.bf16.vlgmr.msra.gmra.mxu2 %vm291_vm10, %v1039_v39 }
  0xd0   : > { %672 = vmatpush.bf16.msrb.mxu3 %v657_v37  ;;  %v710_v42 = vpop.permute.xlu0 %709  ;;  %v714_v43 = vpop.permute.xlu1 %713 }
  0xd1   : > { %1042 = vmatmul.msk.bf16.vlgmr.msra.gmra.mxu3 %vm291_vm10, %v1039_v39  ;;  %v718_v44 = vsel %vm717_vm15, %v710_v42, %v712_v35  ;;  %v719_v45 = vsel %vm717_vm15, %v712_v35, %v714_v43 }
  0xd2   : > { %v725_v46 = vand.u32 %v718_v44, %v1251_v40  ;;  %v728_v47 = vand.u32 %v719_v45, %v1251_v40 }
  0xd4   : > { %740 = vmatpush.bf16.msra.mxu2 %v725_v46  ;;  %753 = vmatpush.bf16.msra.mxu3 %v728_v47 }
  0xd7   : > { %1056 = vmatmul.msk.bf16.vlgmr.msrb.gmra.mxu0 %vm291_vm10, %v1043_v48 }
  0xd8   : > { %v648_v50 = vpop.permute.xlu0 %647  ;;  %v716_v51 = vpop.permute.xlu1 %715 }
  0xd9   : > { %v652_v52 = vsel %vm649_vm14, %v646_v29, %v648_v50  ;;  %v720_v54 = vsel %vm717_vm15, %v714_v43, %v716_v51 }
  0xda   : > { %v663_v55 = vand.u32 %v652_v52, %v1251_v40  ;;  %v731_v56 = vand.u32 %v720_v54, %v1251_v40 }
  0xdc   : > { %698 = vmatpush.bf16.msra.mxu1 %v663_v55  ;;  %766 = vmatpush.bf16.msrb.mxu0 %v731_v56 }
  0xdf   : > { %1057 = vmatmul.msk.bf16.vlgmr.msrb.gmra.mxu1 %vm291_vm10, %v1043_v48  ;;  %1058 = vmatmul.msk.bf16.vlgmr.msrb.gmra.mxu2 %vm291_vm10, %v1043_v48 }
  0xe0   : > { %v782_v59 = vpop.permute.xlu0 %781  ;;  %808 = vmatpush.bf16.msrb.mxu1 %v793_v57  ;;  %v850_v60 = vpop.permute.xlu1 %849 }
  0xe1   : > { %1076 = vmatmul.msk.bf16.vlgmr.msrb.gmra.mxu3 %vm291_vm10, %v1059_v58  ;;  %v787_v61 = vsel %vm785_vm0, %v780_v41, %v782_v59  ;;  %v856_v5 = vsel %vm853_vm1, %v850_v60, %v852_v63 }
  0xe2   : > { %v796_v62 = vand.u32 %v787_v61, %v1251_v40  ;;  %v867_v8 = vand.u32 %v856_v5, %v1251_v40 }
  0xe4   : > { %821 = vmatpush.bf16.msrb.mxu2 %v796_v62 }
  0xe7   : > { %1077 = vmatmul.msk.bf16.vlgmr.msra.gmra.mxu0 %vm291_vm10, %v1059_v58 }
  0xe8   : > { %v784_v0 = vpop.permute.xlu0 %783  ;;  %v848_v1 = vpop.permute.xlu1 %847 }
  0xe9   : > { %v788_v2 = vsel %vm785_vm0, %v782_v59, %v784_v0  ;;  %v855_v3 = vsel %vm853_vm1, %v848_v1, %v850_v60  ;;  %v920_v60 = vld [vmem:[%s1387_s3] sm:$0x7] }
  0xea   : > { %v799_v4 = vand.u32 %v788_v2, %v1251_v40  ;;  %v864_v7 = vand.u32 %v855_v3, %v1251_v40  ;;  %vm921_vm2 = vcmp.ne.f32.partialorder %v920_v60, 0.0 }
  0xec   : > { %834 = vmatpush.bf16.msrb.mxu3 %v799_v4  ;;  %v922_v4 = vsel %vm921_vm2, 1, %v1176_v14 }
  0xef   : > { %1078 = vmatmul.msk.bf16.vlgmr.msra.gmra.mxu1 %vm291_vm10, %v1059_v58  ;;  %1080 = vmatmul.msk.bf16.vlgmr.msra.gmra.mxu2 %vm291_vm10, %v1079_v6 }
  0xf0   : > { %v846_v9 = vpop.permute.xlu0 %845  ;;  %889 = vmatpush.bf16.msra.mxu1 %v864_v7  ;;  %902 = vmatpush.bf16.msra.mxu2 %v867_v8  ;;  %v923_v8 = vperm.slane %v922_v4, 0 }
  0xf1   : > { %1081 = vmatmul.msk.bf16.vlgmr.msra.gmra.mxu3 %vm291_vm10, %v1079_v6  ;;  %v854_v10 = vsel %vm853_vm1, %v846_v9, %v848_v1 }
  0xf2   : > { %v861_v11 = vand.u32 %v854_v10, %v1251_v40  ;;  %v911_v40 = vld [vmem:[%s1386_s2] sm:$0xff]  ;;  %vm926_vm3 = vcmp.eq.s32.totalorder %v923_v8, 1 }
  0xf3   : > { %914 = vperm.xlu2 %1141, %v911_v40  }
  0xf4   : > { %876 = vmatpush.bf16.msra.mxu0 %v861_v11 }
  0xf7   : > { %1082 = vmatmul.msk.bf16.vlgmr.msrb.gmra.mxu0 %vm291_vm10, %v1079_v6 }
  0xff   : > { %1084 = vmatmul.msk.bf16.vlgmr.msrb.gmra.mxu1 %vm291_vm10, %v1083_v12  ;;  %1085 = vmatmul.msk.bf16.vlgmr.msrb.gmra.mxu2 %vm291_vm10, %v1083_v12 }
 0x101   : > { %1086 = vmatmul.msk.bf16.vlgmr.msrb.gmra.mxu3 %vm291_vm10, %v1083_v12 }
 0x107   : > { %1088 = vmatmul.msk.bf16.vlgmr.msra.gmra.mxu0 %vm291_vm10, %v1087_v13 }
 0x10f   : > { %1089 = vmatmul.msk.bf16.vlgmr.msra.gmra.mxu1 %vm291_vm10, %v1087_v13  ;;  %1090 = vmatmul.msk.bf16.vlgmr.msra.gmra.mxu2 %vm291_vm10, %v1087_v13 }
 0x113   : > { %v380_v15 = vpop.f32.mrf.mxu3 }
 0x11b   : > { %v382_v16 = vpop.f32.mrf.mxu3 }
 0x124   : > { %v317_v17 = vpop.f32.mrf.mxu0  ;;  %v330_v18 = vpop.f32.mrf.mxu1 }
 0x125   : > { %v381_v19 = vadd.f32 %v380_v15, %v317_v17 }
 0x12c   : > { %v319_v20 = vpop.f32.mrf.mxu0  ;;  %v332_v21 = vpop.f32.mrf.mxu1 }
 0x132   : > { %v343_v22 = vpop.f32.mrf.mxu2 }
 0x134   : > { %v393_v23 = vpop.f32.mrf.mxu0 }
 0x135   : > { %v394_v24 = vadd.f32 %v393_v23, %v330_v18 }
 0x13a   : > { %v345_v25 = vpop.f32.mrf.mxu2  ;;  %v458_v26 = vpop.f32.mrf.mxu3 }
 0x13b   : > { %v476_v27 = vadd.f32 %v458_v26, %v394_v24 }
 0x13c   : > { %v395_v28 = vpop.f32.mrf.mxu0  ;;  %v406_v29 = vpop.f32.mrf.mxu1 }
 0x13d   : > { %v407_v30 = vadd.f32 %v406_v29, %v343_v22  ;;  %v924_v22 = vperm.slane %v922_v4, 1 }
 0x13f   : > { %vm927_vm4 = vcmp.eq.s32.totalorder %v924_v22, 1 }
 0x142   : > { %v445_v31 = vpop.f32.mrf.mxu2  ;;  %v460_v32 = vpop.f32.mrf.mxu3 }
 0x143   : > { %v475_v61 = vadd.f32 %v445_v31, %v381_v19  ;;  %v925_v32 = vperm.slane %v922_v4, 2 }
 0x144   : > { %v408_v33 = vpop.f32.mrf.mxu1  ;;  %v471_v34 = vpop.f32.mrf.mxu0 }
 0x145   : > { %v477_v35 = vadd.f32 %v471_v34, %v407_v30  ;;  %vm928_vm5 = vcmp.eq.s32.totalorder %v925_v32, 1 }
 0x14a   : > { %v447_v36 = vpop.f32.mrf.mxu2 }
 0x14c   : > { %v473_v37 = vpop.f32.mrf.mxu0  ;;  %v513_v38 = vpop.f32.mrf.mxu1 }
 0x14d   : > { %v543_v63 = vadd.f32 %v513_v38, %v475_v61  ;;  %v915_v12 = vpop.permute.xlu2 %914 }
 0x152   : > { %v526_v39 = vpop.f32.mrf.mxu2 }
 0x153   : > { %v544_v9 = vadd.f32 %v526_v39, %v476_v27 }
 0x154   : > { %v539_v41 = vpop.f32.mrf.mxu3  ;;  %v515_v42 = vpop.f32.mrf.mxu1 }
 0x155   : > { %v586_v43 = vpop.f32.mrf.mxu0  ;;  %v545_v18 = vadd.f32 %v539_v41, %v477_v35 }
 0x156   : > { %v616_v3 = vadd.f32 %v586_v43, %v543_v63 }
 0x15a   : > { %v528_v44 = vpop.f32.mrf.mxu2 }
 0x15c   : > { %v541_v45 = vpop.f32.mrf.mxu3  ;;  %v599_v47 = vpop.f32.mrf.mxu1 }
 0x15d   : > { %v588_v46 = vpop.f32.mrf.mxu0  ;;  %v617_v15 = vadd.f32 %v599_v47, %v544_v9 }
 0x162   : > { %v612_v48 = vpop.f32.mrf.mxu2 }
 0x163   : > { %v618_v23 = vadd.f32 %v612_v48, %v545_v18 }
 0x164   : > { %v674_v49 = vpop.f32.mrf.mxu3  ;;  %v601_v50 = vpop.f32.mrf.mxu1 }
 0x165   : > { %v687_v51 = vpop.f32.mrf.mxu0  ;;  %v704_v5 = vadd.f32 %v674_v49, %v616_v3 }
 0x166   : > { %v705_v17 = vadd.f32 %v687_v51, %v617_v15 }
 0x16a   : > { %v614_v52 = vpop.f32.mrf.mxu2 }
 0x16c   : > { %v676_v53 = vpop.f32.mrf.mxu3  ;;  %v700_v55 = vpop.f32.mrf.mxu1 }
 0x16d   : > { %v689_v54 = vpop.f32.mrf.mxu0  ;;  %v706_v28 = vadd.f32 %v700_v55, %v618_v23 }
 0x172   : > { %v742_v56 = vpop.f32.mrf.mxu2 }
 0x173   : > { %v772_v6 = vadd.f32 %v742_v56, %v704_v5 }
 0x174   : > { %v755_v57 = vpop.f32.mrf.mxu3  ;;  %v702_v58 = vpop.f32.mrf.mxu1 }
 0x175   : > { %v768_v59 = vpop.f32.mrf.mxu0  ;;  %v773_v19 = vadd.f32 %v755_v57, %v705_v17 }
 0x176   : > { %v774_v30 = vadd.f32 %v768_v59, %v706_v28 }
 0x17a   : > { %v744_v62 = vpop.f32.mrf.mxu2 }
 0x17c   : > { %v757_v0 = vpop.f32.mrf.mxu3  ;;  %v810_v2 = vpop.f32.mrf.mxu1 }
 0x17d   : > { %v770_v1 = vpop.f32.mrf.mxu0  ;;  %v840_v10 = vadd.f32 %v810_v2, %v772_v6 }
 0x182   : > { %v823_v7 = vpop.f32.mrf.mxu2 }
 0x183   : > { %v841_v24 = vadd.f32 %v823_v7, %v773_v19 }
 0x184   : > { %v836_v11 = vpop.f32.mrf.mxu3  ;;  %v812_v13 = vpop.f32.mrf.mxu1 }
 0x185   : > { %v878_v40 = vpop.f32.mrf.mxu0  ;;  %v842_v33 = vadd.f32 %v836_v11, %v774_v30 }
 0x186   : > { %v908_v16 = vadd.f32 %v878_v40, %v840_v10 }
 0x188   : > { %v917_v14 = vadd.f32 %v915_v12, %v908_v16 }
 0x18a   : > { %v929_v20 = vsel %vm926_vm3, %v917_v14, 0.0  ;;  %v825_v21 = vpop.f32.mrf.mxu2 }
 0x18b   : > { %932 = vst [vmem:[%s234_s23] sm:$0xff] %v929_v20 }
 0x18c   : > { %v838_v25 = vpop.f32.mrf.mxu3  ;;  %v891_v26 = vpop.f32.mrf.mxu1 }
 0x18d   : > { %v880_v27 = vpop.f32.mrf.mxu0  ;;  %v909_v29 = vadd.f32 %v891_v26, %v841_v24 }
 0x18f   : > { %v918_v31 = vadd.f32 %v915_v12, %v909_v29 }
 0x191   : > { %v930_v34 = vsel %vm927_vm4, %v918_v31, 0.0 }
 0x192   : > { %933 = vst [vmem:[%s234_s23 + $0x8] sm:$0xff] %v930_v34  ;;  %v904_v35 = vpop.f32.mrf.mxu2 }
 0x193   : > { %v910_v36 = vadd.f32 %v904_v35, %v842_v33 }
 0x194   : > { %v893_v37 = vpop.f32.mrf.mxu1 }
 0x195   : > { %v919_v38 = vadd.f32 %v915_v12, %v910_v36 }
 0x197   : > { %v931_v39 = vsel %vm928_vm5, %v919_v38, 0.0 }
 0x198   : > { %934 = vst [vmem:[%s234_s23 + $0x10] sm:$0xff] %v931_v39 }
 0x19a   : > { %v906_v41 = vpop.f32.mrf.mxu2 }
 0x19b PF: > { %p11_p9 = scmp.ge.s32.totalorder %s1219_s19, 4   ;;  %s1391_s15 = smov %s1161_s16 }
 0x19c   : > { %s1392_s16 = smov %s1228_s22  ;;  %s1393_s17 = smov %s1219_s19 }
 0x19d   :  { %13 = sbr.rel (!%p11_p9) target bundleno = 2 (0x2), region = 111 }

</bundles_post_ra>
